<compile_context>
chip_gen: v6e
topology: v6e:2x2x1
jax: 0.10.0
libtpu: 0.0.40
codegen_flags: <defaults>
</compile_context>

<pallas_src>
import functools

import jax
import jax.numpy as jnp
from jax import lax
from jax.experimental import pallas as pl
from jax.experimental.pallas import tpu as pltpu


# ------------------------------------------------------------------ helpers --
def _conv3x3_bias(pad_ref, w_ref, b_ref, Bt, Ho, Wo, Cin_p, C_p):
    """3x3 'same' conv as 9 shifted (M, Cin)@(Cin, Cout) bf16 MXU matmuls."""
    M = Bt * Ho * Wo
    acc = jnp.zeros((M, C_p), jnp.float32)
    for dy in range(3):
        for dx in range(3):
            win = pad_ref[:, dy:dy + Ho, dx:dx + Wo, :]        # (Bt,Ho,Wo,Cin_p) f32
            lhs = win.reshape(M, Cin_p).astype(jnp.bfloat16)
            acc = acc + jnp.dot(lhs, w_ref[dy, dx],            # w already bf16
                                preferred_element_type=jnp.float32)
    return acc + b_ref[...]                                    # (M, C_p) f32


def _stats_update(s_ref, yf):
    """Accumulate per-channel sum / sum-of-squares into the (2, C_p) block."""
    s_ref[...] += jnp.concatenate(
        [jnp.sum(yf, axis=0, keepdims=True),
         jnp.sum(yf * yf, axis=0, keepdims=True)], axis=0)


def _bn_scale_shift(s_ref, g_ref, be_ref, m_total, eps):
    st = s_ref[...]                                            # (2, C_p) f32
    inv_m = 1.0 / m_total
    mean = st[0:1] * inv_m
    var = jnp.maximum(st[1:2] * inv_m - mean * mean, 0.0)      # biased var
    scale = g_ref[...] * lax.rsqrt(var + eps)
    shift = be_ref[...] - mean * scale
    return scale, shift


# ------------------------------------------------------------------ kernels --
def _conv1_stats_kernel(x_ref, w_ref, b_ref, y_ref, s_ref, pad_ref,
                        *, Bt, Ho, Wo, Cin_p, C_p):
    """conv1 + bias on the (already pooled) input; accumulate BN1 sum/sumsq."""
    n = pl.program_id(0)

    @pl.when(n == 0)
    def _init():
        s_ref[...] = jnp.zeros_like(s_ref)
        pad_ref[...] = jnp.zeros_like(pad_ref)   # zero-halo once; interior is
                                                 # fully overwritten each step

    pad_ref[:, 1:Ho + 1, 1:Wo + 1, :] = x_ref[...]

    acc = _conv3x3_bias(pad_ref, w_ref, b_ref, Bt, Ho, Wo, Cin_p, C_p)
    yb = acc.astype(y_ref.dtype)                               # bf16 store
    y_ref[...] = yb.reshape(Bt, Ho, Wo, C_p)
    _stats_update(s_ref, yb.astype(jnp.float32))               # stats of stored vals


def _bn_relu_conv_stats_kernel(y_ref, s_in_ref, g_ref, be_ref, w_ref, b_ref,
                               o_ref, s_out_ref, pad_ref,
                               *, Bt, Ho, Wo, C_p, m_total, eps):
    """BN1(batch stats)+ReLU, then conv2 + bias; accumulate BN2 sum/sumsq."""
    n = pl.program_id(0)

    @pl.when(n == 0)
    def _init():
        s_out_ref[...] = jnp.zeros_like(s_out_ref)
        pad_ref[...] = jnp.zeros_like(pad_ref)

    scale, shift = _bn_scale_shift(s_in_ref, g_ref, be_ref, m_total, eps)

    M = Bt * Ho * Wo
    y = y_ref[...].astype(jnp.float32).reshape(M, C_p)
    a = jnp.maximum(y * scale + shift, 0.0)                    # BN + ReLU (f32 VPU)
    pad_ref[:, 1:Ho + 1, 1:Wo + 1, :] = a.reshape(Bt, Ho, Wo, C_p)

    acc = _conv3x3_bias(pad_ref, w_ref, b_ref, Bt, Ho, Wo, C_p, C_p)
    yb = acc.astype(o_ref.dtype)                               # bf16 store
    o_ref[...] = yb.reshape(Bt, Ho, Wo, C_p)
    _stats_update(s_out_ref, yb.astype(jnp.float32))


def _bn_relu_kernel(y_ref, s_ref, g_ref, be_ref, o_ref,
                    *, Bt, Ho, Wo, C_p, m_total, eps):
    """Final BN2(batch stats) + ReLU (stateless across grid -> parallel)."""
    scale, shift = _bn_scale_shift(s_ref, g_ref, be_ref, m_total, eps)
    M = Bt * Ho * Wo
    y = y_ref[...].astype(jnp.float32).reshape(M, C_p)
    o_ref[...] = jnp.maximum(y * scale + shift, 0.0).reshape(Bt, Ho, Wo, C_p)


# ---------------------------------------------------------------- forward ----
def _round_up(x, m):
    return ((x + m - 1) // m) * m


def down_encoder_forward(x_nchw, params, eps=1e-5):
    N, Cin, H, W = x_nchw.shape
    Cout = params["w1"].shape[0]
    Ho, Wo = H // 2, W // 2
    LANE = 128
    Cin_p = _round_up(Cin, LANE)
    C_p = _round_up(Cout, LANE)
    m_total = N * Ho * Wo
    f32, bf16 = jnp.float32, jnp.bfloat16

    # --- 2x2/stride-2 max pool in XLA on the compact NCHW tensor, then
    #     NCHW -> lane-dense NHWC with zero-padded channels (inert through
    #     conv/BN, sliced away at the end). ---
    xp = lax.reduce_window(x_nchw.astype(f32), -jnp.inf, lax.max,
                           (1, 1, 2, 2), (1, 1, 2, 2), "VALID")
    xp = jnp.transpose(xp, (0, 2, 3, 1))
    xp = jnp.pad(xp, ((0, 0), (0, 0), (0, 0), (0, Cin_p - Cin)))

    def conv_w(w, cin_p):
        cout, cin = w.shape[0], w.shape[1]
        w = jnp.transpose(w, (2, 3, 1, 0)).astype(f32)          # (3,3,Cin,Cout)
        w = jnp.pad(w, ((0, 0), (0, 0), (0, cin_p - cin), (0, C_p - cout)))
        return w.astype(bf16)                                   # bf16 MXU operand

    def vec(v):
        return jnp.pad(v.astype(f32), (0, C_p - v.shape[0])).reshape(1, C_p)

    w1 = conv_w(params["w1"], Cin_p)
    w2 = conv_w(params["w2"], C_p)
    b1, g1, be1 = vec(params["b1"]), vec(params["g1"]), vec(params["beta1"])
    b2, g2, be2 = vec(params["b2"]), vec(params["g2"]), vec(params["beta2"])

    # --- batch tile: largest divisor of N under a ~24 MiB per-step budget ---
    C_big = max(Cin_p, C_p)
    per_img = ((Ho + 2) * (Wo + 2) * C_big * 4        # f32 halo scratch
               + 2 * 2 * Ho * Wo * C_p * 2            # bf16 in+out, 2x buffered
               + 2 * Ho * Wo * C_big * 4)             # f32 block worst case
    Bt = 1
    for d in range(1, N + 1):
        if N % d == 0 and d * per_img <= (24 << 20):
            Bt = d
    G = N // Bt

    vmem_limit = 64 * 1024 * 1024
    cp_seq = pltpu.CompilerParams(dimension_semantics=("arbitrary",),
                                  vmem_limit_bytes=vmem_limit)
    cp_par = pltpu.CompilerParams(dimension_semantics=("parallel",),
                                  vmem_limit_bytes=vmem_limit)

    def full(shape):
        return pl.BlockSpec(shape, lambda n, _l=len(shape): (0,) * _l)

    blk_in = pl.BlockSpec((Bt, Ho, Wo, Cin_p), lambda n: (n, 0, 0, 0))
    blk_mid = pl.BlockSpec((Bt, Ho, Wo, C_p), lambda n: (n, 0, 0, 0))

    # ---- pass 1: conv1 + bias on pooled input, accumulate BN1 sum/sumsq ----
    y1, s1 = pl.pallas_call(
        functools.partial(_conv1_stats_kernel,
                          Bt=Bt, Ho=Ho, Wo=Wo, Cin_p=Cin_p, C_p=C_p),
        grid=(G,),
        in_specs=[blk_in, full((3, 3, Cin_p, C_p)), full((1, C_p))],
        out_specs=[blk_mid, full((2, C_p))],
        out_shape=[jax.ShapeDtypeStruct((N, Ho, Wo, C_p), bf16),
                   jax.ShapeDtypeStruct((2, C_p), f32)],
        scratch_shapes=[pltpu.VMEM((Bt, Ho + 2, Wo + 2, Cin_p), f32)],
        compiler_params=cp_seq,
    )(xp, w1, b1)

    # ---- pass 2: BN1 + ReLU + conv2 + bias, accumulate BN2 sum/sumsq ----
    y2, s2 = pl.pallas_call(
        functools.partial(_bn_relu_conv_stats_kernel,
                          Bt=Bt, Ho=Ho, Wo=Wo, C_p=C_p, m_total=m_total, eps=eps),
        grid=(G,),
        in_specs=[blk_mid, full((2, C_p)), full((1, C_p)), full((1, C_p)),
                  full((3, 3, C_p, C_p)), full((1, C_p))],
        out_specs=[blk_mid, full((2, C_p))],
        out_shape=[jax.ShapeDtypeStruct((N, Ho, Wo, C_p), bf16),
                   jax.ShapeDtypeStruct((2, C_p), f32)],
        scratch_shapes=[pltpu.VMEM((Bt, Ho + 2, Wo + 2, C_p), f32)],
        compiler_params=cp_seq,
    )(y1, s1, g1, be1, w2, b2)

    # ---- pass 3: BN2 + ReLU (parallel over batch tiles) ----
    out = pl.pallas_call(
        functools.partial(_bn_relu_kernel,
                          Bt=Bt, Ho=Ho, Wo=Wo, C_p=C_p, m_total=m_total, eps=eps),
        grid=(G,),
        in_specs=[blk_mid, full((2, C_p)), full((1, C_p)), full((1, C_p))],
        out_specs=blk_mid,
        out_shape=jax.ShapeDtypeStruct((N, Ho, Wo, C_p), f32),
        compiler_params=cp_par,
    )(y2, s2, g2, be2)

    out = out[:, :, :, :Cout]                      # drop lane padding
    return jnp.transpose(out, (0, 3, 1, 2))        # back to NCHW (module parity)


# -------------------------------------------------------- pure-JAX reference --
def reference_forward(x, params, eps=1e-5):
    x = lax.reduce_window(x, -jnp.inf, lax.max,
                          (1, 1, 2, 2), (1, 1, 2, 2), "VALID")

    def cbr(x, w, b, g, be):
        y = lax.conv_general_dilated(
            x, w, (1, 1), "SAME",
            dimension_numbers=("NCHW", "OIHW", "NCHW")) + b[None, :, None, None]
        mean = jnp.mean(y, axis=(0, 2, 3), keepdims=True)
        var = jnp.mean((y - mean) ** 2, axis=(0, 2, 3), keepdims=True)
        yh = (y - mean) / jnp.sqrt(var + eps)
        return jnp.maximum(yh * g[None, :, None, None] + be[None, :, None, None],
                           0.0)

    x = cbr(x, params["w1"], params["b1"], params["g1"], params["beta1"])
    x = cbr(x, params["w2"], params["b2"], params["g2"], params["beta2"])
    return x


# ---------------------------------------------------------------------- main --
if __name__ == "__main__":
    key = jax.random.PRNGKey(0)
    k_x, k_w1, k_b1, k_w2, k_b2 = jax.random.split(key, 5)

    N, Cin, H, W = 2, 4, 16, 16
    Cout = 8

    x = jax.random.normal(k_x, (N, Cin, H, W), dtype=jnp.float32)

    params = {
        # conv1: Conv2d(Cin, Cout, 3, padding='same')
        "w1": jax.random.normal(k_w1, (Cout, Cin, 3, 3), jnp.float32) * 0.1,
        "b1": jax.random.normal(k_b1, (Cout,), jnp.float32) * 0.1,
        # bn1: PyTorch default init (weight=1, bias=0)
        "g1": jnp.ones((Cout,), jnp.float32),
        "beta1": jnp.zeros((Cout,), jnp.float32),
        # conv2: Conv2d(Cout, Cout, 3, padding='same')
        "w2": jax.random.normal(k_w2, (Cout, Cout, 3, 3), jnp.float32) * 0.1,
        "b2": jax.random.normal(k_b2, (Cout,), jnp.float32) * 0.1,
        # bn2
        "g2": jnp.ones((Cout,), jnp.float32),
        "beta2": jnp.zeros((Cout,), jnp.float32),
    }

    fwd = jax.jit(down_encoder_forward)
    out = jax.block_until_ready(fwd(x, params))
    ref = jax.block_until_ready(reference_forward(x, params))

    assert out.shape == (N, Cout, H // 2, W // 2), out.shape
    # bf16 MXU operands + bf16 HBM intermediates -> ~1e-2-class agreement.
    assert jnp.allclose(out, ref, atol=2e-2, rtol=2e-2), \
        float(jnp.max(jnp.abs(out - ref)))

    print("KERNEL_OK")
</pallas_src>

<mosaic_0001>
module attributes {stable_mosaic.version = 11 : i64} {
  func.func @_conv1_stats_kernel(%arg0: i32, %arg1: memref<2x8x8x128xf32, #tpu.memory_space<vmem>>, %arg2: memref<3x3x128x128xbf16, #tpu.memory_space<vmem>>, %arg3: memref<1x128xf32, #tpu.memory_space<vmem>>, %arg4: memref<2x8x8x128xbf16, #tpu.memory_space<vmem>>, %arg5: memref<2x128xf32, #tpu.memory_space<vmem>>, %arg6: memref<2x10x10x128xf32, #tpu.memory_space<vmem>>) attributes {dimension_semantics = [#tpu.dimension_semantics<arbitrary>], iteration_bounds = array<i64: 1>, scalar_prefetch = 0 : i64, scratch_operands = 1 : i64, tpu.core_type = #tpu.core_type<tc>, window_params = [{transform_indices = @transform_0, window_bounds = array<i64: 2, 8, 8, 128>}, {pipeline_mode = #tpu.pipeline_mode<synchronous>, transform_indices = @transform_1, window_bounds = array<i64: 3, 3, 128, 128>}, {pipeline_mode = #tpu.pipeline_mode<synchronous>, transform_indices = @transform_2, window_bounds = array<i64: 1, 128>}, {transform_indices = @transform_3, window_bounds = array<i64: 2, 8, 8, 128>}, {pipeline_mode = #tpu.pipeline_mode<synchronous>, transform_indices = @transform_4, window_bounds = array<i64: 2, 128>}]} {
    %c0_i32 = arith.constant 0 : i32
    %0 = arith.cmpi eq, %arg0, %c0_i32 : i32
    %1 = arith.extui %0 : i1 to i32
    %c0_i32_0 = arith.constant 0 : i32
    %2 = arith.cmpi ne, %1, %c0_i32_0 : i32
    scf.if %2 {
      %cst_99 = arith.constant 0.000000e+00 : f32
      %85 = vector.broadcast %cst_99 : f32 to vector<2x128xf32>
      %c0_100 = arith.constant 0 : index
      %c0_101 = arith.constant 0 : index
      %86 = vector.load %arg5[%c0_100, %c0_101] : memref<2x128xf32, #tpu.memory_space<vmem>>, vector<2x128xf32>
      tpu.vector_store %arg5[%c0_100, %c0_101], %85 {strides = array<i32>} : memref<2x128xf32, #tpu.memory_space<vmem>>, vector<2x128xf32>,
      %cst_102 = arith.constant 0.000000e+00 : f32
      %87 = vector.broadcast %cst_102 : f32 to vector<2x10x10x128xf32>
      %c0_103 = arith.constant 0 : index
      %c0_104 = arith.constant 0 : index
      %c0_105 = arith.constant 0 : index
      %c0_106 = arith.constant 0 : index
      %88 = vector.load %arg6[%c0_103, %c0_104, %c0_105, %c0_106] : memref<2x10x10x128xf32, #tpu.memory_space<vmem>>, vector<2x10x10x128xf32>
      tpu.vector_store %arg6[%c0_103, %c0_104, %c0_105, %c0_106], %87 {strides = array<i32>} : memref<2x10x10x128xf32, #tpu.memory_space<vmem>>, vector<2x10x10x128xf32>,
    } else {
    }
    %c0 = arith.constant 0 : index
    %c0_1 = arith.constant 0 : index
    %c0_2 = arith.constant 0 : index
    %c0_3 = arith.constant 0 : index
    %3 = vector.load %arg1[%c0, %c0_1, %c0_2, %c0_3] : memref<2x8x8x128xf32, #tpu.memory_space<vmem>>, vector<2x8x8x128xf32>
    %c0_4 = arith.constant 0 : index
    %c1 = arith.constant 1 : index
    %c1_5 = arith.constant 1 : index
    %c0_6 = arith.constant 0 : index
    %4 = vector.load %arg6[%c0_4, %c1, %c1_5, %c0_6] : memref<2x10x10x128xf32, #tpu.memory_space<vmem>>, vector<2x8x8x128xf32>
    tpu.vector_store %arg6[%c0_4, %c1, %c1_5, %c0_6], %3 {strides = array<i32>} : memref<2x10x10x128xf32, #tpu.memory_space<vmem>>, vector<2x8x8x128xf32>,
    %cst = arith.constant 0.000000e+00 : f32
    %5 = vector.broadcast %cst : f32 to vector<128x128xf32>
    %c0_7 = arith.constant 0 : index
    %c0_8 = arith.constant 0 : index
    %c0_9 = arith.constant 0 : index
    %c0_10 = arith.constant 0 : index
    %6 = vector.load %arg6[%c0_7, %c0_8, %c0_9, %c0_10] : memref<2x10x10x128xf32, #tpu.memory_space<vmem>>, vector<2x8x8x128xf32>
    %7 = vector.shape_cast %6 : vector<2x8x8x128xf32> to vector<128x128xf32>
    %8 = arith.truncf %7 : vector<128x128xf32> to vector<128x128xbf16>
    %c0_11 = arith.constant 0 : index
    %c0_12 = arith.constant 0 : index
    %c0_13 = arith.constant 0 : index
    %c0_14 = arith.constant 0 : index
    %9 = vector.load %arg2[%c0_11, %c0_12, %c0_13, %c0_14] : memref<3x3x128x128xbf16, #tpu.memory_space<vmem>>, vector<1x1x128x128xbf16>
    %10 = vector.shape_cast %9 : vector<1x1x128x128xbf16> to vector<128x128xbf16>
    %cst_15 = arith.constant dense<0.000000e+00> : vector<128x128xf32>
    %11 = tpu.matmul %8, %10, %cst_15 {dimension_numbers = #tpu.dot_dimension_numbers<[1], [0], [0], [1], [0, 0, 1, 1], [], []>} : vector<128x128xbf16>, vector<128x128xbf16>, vector<128x128xf32> -> vector<128x128xf32>
    %12 = arith.addf %5, %11 : vector<128x128xf32>
    %c0_16 = arith.constant 0 : index
    %c0_17 = arith.constant 0 : index
    %c1_18 = arith.constant 1 : index
    %c0_19 = arith.constant 0 : index
    %13 = vector.load %arg6[%c0_16, %c0_17, %c1_18, %c0_19] : memref<2x10x10x128xf32, #tpu.memory_space<vmem>>, vector<2x8x8x128xf32>
    %14 = vector.shape_cast %13 : vector<2x8x8x128xf32> to vector<128x128xf32>
    %15 = arith.truncf %14 : vector<128x128xf32> to vector<128x128xbf16>
    %c0_20 = arith.constant 0 : index
    %c1_21 = arith.constant 1 : index
    %c0_22 = arith.constant 0 : index
    %c0_23 = arith.constant 0 : index
    %16 = vector.load %arg2[%c0_20, %c1_21, %c0_22, %c0_23] : memref<3x3x128x128xbf16, #tpu.memory_space<vmem>>, vector<1x1x128x128xbf16>
    %17 = vector.shape_cast %16 : vector<1x1x128x128xbf16> to vector<128x128xbf16>
    %cst_24 = arith.constant dense<0.000000e+00> : vector<128x128xf32>
    %18 = tpu.matmul %15, %17, %cst_24 {dimension_numbers = #tpu.dot_dimension_numbers<[1], [0], [0], [1], [0, 0, 1, 1], [], []>} : vector<128x128xbf16>, vector<128x128xbf16>, vector<128x128xf32> -> vector<128x128xf32>
    %19 = arith.addf %12, %18 : vector<128x128xf32>
    %c0_25 = arith.constant 0 : index
    %c0_26 = arith.constant 0 : index
    %c2 = arith.constant 2 : index
    %c0_27 = arith.constant 0 : index
    %20 = vector.load %arg6[%c0_25, %c0_26, %c2, %c0_27] : memref<2x10x10x128xf32, #tpu.memory_space<vmem>>, vector<2x8x8x128xf32>
    %21 = vector.shape_cast %20 : vector<2x8x8x128xf32> to vector<128x128xf32>
    %22 = arith.truncf %21 : vector<128x128xf32> to vector<128x128xbf16>
    %c0_28 = arith.constant 0 : index
    %c2_29 = arith.constant 2 : index
    %c0_30 = arith.constant 0 : index
    %c0_31 = arith.constant 0 : index
    %23 = vector.load %arg2[%c0_28, %c2_29, %c0_30, %c0_31] : memref<3x3x128x128xbf16, #tpu.memory_space<vmem>>, vector<1x1x128x128xbf16>
    %24 = vector.shape_cast %23 : vector<1x1x128x128xbf16> to vector<128x128xbf16>
    %cst_32 = arith.constant dense<0.000000e+00> : vector<128x128xf32>
    %25 = tpu.matmul %22, %24, %cst_32 {dimension_numbers = #tpu.dot_dimension_numbers<[1], [0], [0], [1], [0, 0, 1, 1], [], []>} : vector<128x128xbf16>, vector<128x128xbf16>, vector<128x128xf32> -> vector<128x128xf32>
    %26 = arith.addf %19, %25 : vector<128x128xf32>
    %c0_33 = arith.constant 0 : index
    %c1_34 = arith.constant 1 : index
    %c0_35 = arith.constant 0 : index
    %c0_36 = arith.constant 0 : index
    %27 = vector.load %arg6[%c0_33, %c1_34, %c0_35, %c0_36] : memref<2x10x10x128xf32, #tpu.memory_space<vmem>>, vector<2x8x8x128xf32>
    %28 = vector.shape_cast %27 : vector<2x8x8x128xf32> to vector<128x128xf32>
    %29 = arith.truncf %28 : vector<128x128xf32> to vector<128x128xbf16>
    %c1_37 = arith.constant 1 : index
    %c0_38 = arith.constant 0 : index
    %c0_39 = arith.constant 0 : index
    %c0_40 = arith.constant 0 : index
    %30 = vector.load %arg2[%c1_37, %c0_38, %c0_39, %c0_40] : memref<3x3x128x128xbf16, #tpu.memory_space<vmem>>, vector<1x1x128x128xbf16>
    %31 = vector.shape_cast %30 : vector<1x1x128x128xbf16> to vector<128x128xbf16>
    %cst_41 = arith.constant dense<0.000000e+00> : vector<128x128xf32>
    %32 = tpu.matmul %29, %31, %cst_41 {dimension_numbers = #tpu.dot_dimension_numbers<[1], [0], [0], [1], [0, 0, 1, 1], [], []>} : vector<128x128xbf16>, vector<128x128xbf16>, vector<128x128xf32> -> vector<128x128xf32>
    %33 = arith.addf %26, %32 : vector<128x128xf32>
    %c0_42 = arith.constant 0 : index
    %c1_43 = arith.constant 1 : index
    %c1_44 = arith.constant 1 : index
    %c0_45 = arith.constant 0 : index
    %34 = vector.load %arg6[%c0_42, %c1_43, %c1_44, %c0_45] : memref<2x10x10x128xf32, #tpu.memory_space<vmem>>, vector<2x8x8x128xf32>
    %35 = vector.shape_cast %34 : vector<2x8x8x128xf32> to vector<128x128xf32>
    %36 = arith.truncf %35 : vector<128x128xf32> to vector<128x128xbf16>
    %c1_46 = arith.constant 1 : index
    %c1_47 = arith.constant 1 : index
    %c0_48 = arith.constant 0 : index
    %c0_49 = arith.constant 0 : index
    %37 = vector.load %arg2[%c1_46, %c1_47, %c0_48, %c0_49] : memref<3x3x128x128xbf16, #tpu.memory_space<vmem>>, vector<1x1x128x128xbf16>
    %38 = vector.shape_cast %37 : vector<1x1x128x128xbf16> to vector<128x128xbf16>
    %cst_50 = arith.constant dense<0.000000e+00> : vector<128x128xf32>
    %39 = tpu.matmul %36, %38, %cst_50 {dimension_numbers = #tpu.dot_dimension_numbers<[1], [0], [0], [1], [0, 0, 1, 1], [], []>} : vector<128x128xbf16>, vector<128x128xbf16>, vector<128x128xf32> -> vector<128x128xf32>
    %40 = arith.addf %33, %39 : vector<128x128xf32>
    %c0_51 = arith.constant 0 : index
    %c1_52 = arith.constant 1 : index
    %c2_53 = arith.constant 2 : index
    %c0_54 = arith.constant 0 : index
    %41 = vector.load %arg6[%c0_51, %c1_52, %c2_53, %c0_54] : memref<2x10x10x128xf32, #tpu.memory_space<vmem>>, vector<2x8x8x128xf32>
    %42 = vector.shape_cast %41 : vector<2x8x8x128xf32> to vector<128x128xf32>
    %43 = arith.truncf %42 : vector<128x128xf32> to vector<128x128xbf16>
    %c1_55 = arith.constant 1 : index
    %c2_56 = arith.constant 2 : index
    %c0_57 = arith.constant 0 : index
    %c0_58 = arith.constant 0 : index
    %44 = vector.load %arg2[%c1_55, %c2_56, %c0_57, %c0_58] : memref<3x3x128x128xbf16, #tpu.memory_space<vmem>>, vector<1x1x128x128xbf16>
    %45 = vector.shape_cast %44 : vector<1x1x128x128xbf16> to vector<128x128xbf16>
    %cst_59 = arith.constant dense<0.000000e+00> : vector<128x128xf32>
    %46 = tpu.matmul %43, %45, %cst_59 {dimension_numbers = #tpu.dot_dimension_numbers<[1], [0], [0], [1], [0, 0, 1, 1], [], []>} : vector<128x128xbf16>, vector<128x128xbf16>, vector<128x128xf32> -> vector<128x128xf32>
    %47 = arith.addf %40, %46 : vector<128x128xf32>
    %c0_60 = arith.constant 0 : index
    %c2_61 = arith.constant 2 : index
    %c0_62 = arith.constant 0 : index
    %c0_63 = arith.constant 0 : index
    %48 = vector.load %arg6[%c0_60, %c2_61, %c0_62, %c0_63] : memref<2x10x10x128xf32, #tpu.memory_space<vmem>>, vector<2x8x8x128xf32>
    %49 = vector.shape_cast %48 : vector<2x8x8x128xf32> to vector<128x128xf32>
    %50 = arith.truncf %49 : vector<128x128xf32> to vector<128x128xbf16>
    %c2_64 = arith.constant 2 : index
    %c0_65 = arith.constant 0 : index
    %c0_66 = arith.constant 0 : index
    %c0_67 = arith.constant 0 : index
    %51 = vector.load %arg2[%c2_64, %c0_65, %c0_66, %c0_67] : memref<3x3x128x128xbf16, #tpu.memory_space<vmem>>, vector<1x1x128x128xbf16>
    %52 = vector.shape_cast %51 : vector<1x1x128x128xbf16> to vector<128x128xbf16>
    %cst_68 = arith.constant dense<0.000000e+00> : vector<128x128xf32>
    %53 = tpu.matmul %50, %52, %cst_68 {dimension_numbers = #tpu.dot_dimension_numbers<[1], [0], [0], [1], [0, 0, 1, 1], [], []>} : vector<128x128xbf16>, vector<128x128xbf16>, vector<128x128xf32> -> vector<128x128xf32>
    %54 = arith.addf %47, %53 : vector<128x128xf32>
    %c0_69 = arith.constant 0 : index
    %c2_70 = arith.constant 2 : index
    %c1_71 = arith.constant 1 : index
    %c0_72 = arith.constant 0 : index
    %55 = vector.load %arg6[%c0_69, %c2_70, %c1_71, %c0_72] : memref<2x10x10x128xf32, #tpu.memory_space<vmem>>, vector<2x8x8x128xf32>
    %56 = vector.shape_cast %55 : vector<2x8x8x128xf32> to vector<128x128xf32>
    %57 = arith.truncf %56 : vector<128x128xf32> to vector<128x128xbf16>
    %c2_73 = arith.constant 2 : index
    %c1_74 = arith.constant 1 : index
    %c0_75 = arith.constant 0 : index
    %c0_76 = arith.constant 0 : index
    %58 = vector.load %arg2[%c2_73, %c1_74, %c0_75, %c0_76] : memref<3x3x128x128xbf16, #tpu.memory_space<vmem>>, vector<1x1x128x128xbf16>
    %59 = vector.shape_cast %58 : vector<1x1x128x128xbf16> to vector<128x128xbf16>
    %cst_77 = arith.constant dense<0.000000e+00> : vector<128x128xf32>
    %60 = tpu.matmul %57, %59, %cst_77 {dimension_numbers = #tpu.dot_dimension_numbers<[1], [0], [0], [1], [0, 0, 1, 1], [], []>} : vector<128x128xbf16>, vector<128x128xbf16>, vector<128x128xf32> -> vector<128x128xf32>
    %61 = arith.addf %54, %60 : vector<128x128xf32>
    %c0_78 = arith.constant 0 : index
    %c2_79 = arith.constant 2 : index
    %c2_80 = arith.constant 2 : index
    %c0_81 = arith.constant 0 : index
    %62 = vector.load %arg6[%c0_78, %c2_79, %c2_80, %c0_81] : memref<2x10x10x128xf32, #tpu.memory_space<vmem>>, vector<2x8x8x128xf32>
    %63 = vector.shape_cast %62 : vector<2x8x8x128xf32> to vector<128x128xf32>
    %64 = arith.truncf %63 : vector<128x128xf32> to vector<128x128xbf16>
    %c2_82 = arith.constant 2 : index
    %c2_83 = arith.constant 2 : index
    %c0_84 = arith.constant 0 : index
    %c0_85 = arith.constant 0 : index
    %65 = vector.load %arg2[%c2_82, %c2_83, %c0_84, %c0_85] : memref<3x3x128x128xbf16, #tpu.memory_space<vmem>>, vector<1x1x128x128xbf16>
    %66 = vector.shape_cast %65 : vector<1x1x128x128xbf16> to vector<128x128xbf16>
    %cst_86 = arith.constant dense<0.000000e+00> : vector<128x128xf32>
    %67 = tpu.matmul %64, %66, %cst_86 {dimension_numbers = #tpu.dot_dimension_numbers<[1], [0], [0], [1], [0, 0, 1, 1], [], []>} : vector<128x128xbf16>, vector<128x128xbf16>, vector<128x128xf32> -> vector<128x128xf32>
    %68 = arith.addf %61, %67 : vector<128x128xf32>
    %c0_87 = arith.constant 0 : index
    %c0_88 = arith.constant 0 : index
    %69 = vector.load %arg3[%c0_87, %c0_88] : memref<1x128xf32, #tpu.memory_space<vmem>>, vector<1x128xf32>
    %70 = vector.broadcast %69 : vector<1x128xf32> to vector<128x128xf32>
    %71 = arith.addf %68, %70 : vector<128x128xf32>
    %72 = arith.truncf %71 : vector<128x128xf32> to vector<128x128xbf16>
    %73 = vector.shape_cast %72 : vector<128x128xbf16> to vector<2x8x8x128xbf16>
    %c0_89 = arith.constant 0 : index
    %c0_90 = arith.constant 0 : index
    %c0_91 = arith.constant 0 : index
    %c0_92 = arith.constant 0 : index
    %74 = vector.load %arg4[%c0_89, %c0_90, %c0_91, %c0_92] : memref<2x8x8x128xbf16, #tpu.memory_space<vmem>>, vector<2x8x8x128xbf16>
    tpu.vector_store %arg4[%c0_89, %c0_90, %c0_91, %c0_92], %73 {strides = array<i32>} : memref<2x8x8x128xbf16, #tpu.memory_space<vmem>>, vector<2x8x8x128xbf16>,
    %75 = arith.extf %72 : vector<128x128xbf16> to vector<128x128xf32>
    %c0_93 = arith.constant 0 : index
    %c0_94 = arith.constant 0 : index
    %76 = vector.load %arg5[%c0_93, %c0_94] : memref<2x128xf32, #tpu.memory_space<vmem>>, vector<2x128xf32>
    %cst_95 = arith.constant dense<0.000000e+00> : vector<128xf32>
    %77 = vector.multi_reduction <add>, %75, %cst_95 [0] : vector<128x128xf32> to vector<128xf32>
    %78 = vector.shape_cast %77 : vector<128xf32> to vector<1x128xf32>
    %79 = arith.mulf %75, %75 : vector<128x128xf32>
    %cst_96 = arith.constant dense<0.000000e+00> : vector<128xf32>
    %80 = vector.multi_reduction <add>, %79, %cst_96 [0] : vector<128x128xf32> to vector<128xf32>
    %81 = vector.shape_cast %80 : vector<128xf32> to vector<1x128xf32>
    %82 = tpu.concatenate %78, %81 in 0 : vector<1x128xf32>, vector<1x128xf32> -> vector<2x128xf32>
    %83 = arith.addf %76, %82 : vector<2x128xf32>
    %c0_97 = arith.constant 0 : index
    %c0_98 = arith.constant 0 : index
    %84 = vector.load %arg5[%c0_97, %c0_98] : memref<2x128xf32, #tpu.memory_space<vmem>>, vector<2x128xf32>
    tpu.vector_store %arg5[%c0_97, %c0_98], %83 {strides = array<i32>} : memref<2x128xf32, #tpu.memory_space<vmem>>, vector<2x128xf32>,
    return
  }
  func.func @transform_0(%arg0: i32) -> (i32, i32, i32, i32) {
    %c0_i32 = arith.constant 0 : i32
    %c0_i32_0 = arith.constant 0 : i32
    %c0_i32_1 = arith.constant 0 : i32
    %c0_i32_2 = arith.constant 0 : i32
    return %arg0, %c0_i32, %c0_i32_0, %c0_i32_1 : i32, i32, i32, i32
  }
  func.func @transform_1(%arg0: i32) -> (i32, i32, i32, i32) {
    %c0_i32 = arith.constant 0 : i32
    %c0_i32_0 = arith.constant 0 : i32
    %c0_i32_1 = arith.constant 0 : i32
    %c0_i32_2 = arith.constant 0 : i32
    %c0_i32_3 = arith.constant 0 : i32
    return %c0_i32, %c0_i32_0, %c0_i32_1, %c0_i32_2 : i32, i32, i32, i32
  }
  func.func @transform_2(%arg0: i32) -> (i32, i32) {
    %c0_i32 = arith.constant 0 : i32
    %c0_i32_0 = arith.constant 0 : i32
    %c0_i32_1 = arith.constant 0 : i32
    return %c0_i32, %c0_i32_0 : i32, i32
  }
  func.func @transform_3(%arg0: i32) -> (i32, i32, i32, i32) {
    %c0_i32 = arith.constant 0 : i32
    %c0_i32_0 = arith.constant 0 : i32
    %c0_i32_1 = arith.constant 0 : i32
    %c0_i32_2 = arith.constant 0 : i32
    return %arg0, %c0_i32, %c0_i32_0, %c0_i32_1 : i32, i32, i32, i32
  }
  func.func @transform_4(%arg0: i32) -> (i32, i32) {
    %c0_i32 = arith.constant 0 : i32
    %c0_i32_0 = arith.constant 0 : i32
    %c0_i32_1 = arith.constant 0 : i32
    return %c0_i32, %c0_i32_0 : i32, i32
  }
}

module attributes {stable_mosaic.version = 11 : i64} {
  func.func @_bn_relu_conv_stats_kernel(%arg0: i32, %arg1: memref<2x8x8x128xbf16, #tpu.memory_space<vmem>>, %arg2: memref<2x128xf32, #tpu.memory_space<vmem>>, %arg3: memref<1x128xf32, #tpu.memory_space<vmem>>, %arg4: memref<1x128xf32, #tpu.memory_space<vmem>>, %arg5: memref<3x3x128x128xbf16, #tpu.memory_space<vmem>>, %arg6: memref<1x128xf32, #tpu.memory_space<vmem>>, %arg7: memref<2x8x8x128xbf16, #tpu.memory_space<vmem>>, %arg8: memref<2x128xf32, #tpu.memory_space<vmem>>, %arg9: memref<2x10x10x128xf32, #tpu.memory_space<vmem>>) attributes {dimension_semantics = [#tpu.dimension_semantics<arbitrary>], iteration_bounds = array<i64: 1>, scalar_prefetch = 0 : i64, scratch_operands = 1 : i64, tpu.core_type = #tpu.core_type<tc>, window_params = [{transform_indices = @transform_0, window_bounds = array<i64: 2, 8, 8, 128>}, {pipeline_mode = #tpu.pipeline_mode<synchronous>, transform_indices = @transform_1, window_bounds = array<i64: 2, 128>}, {pipeline_mode = #tpu.pipeline_mode<synchronous>, transform_indices = @transform_2, window_bounds = array<i64: 1, 128>}, {pipeline_mode = #tpu.pipeline_mode<synchronous>, transform_indices = @transform_3, window_bounds = array<i64: 1, 128>}, {pipeline_mode = #tpu.pipeline_mode<synchronous>, transform_indices = @transform_4, window_bounds = array<i64: 3, 3, 128, 128>}, {pipeline_mode = #tpu.pipeline_mode<synchronous>, transform_indices = @transform_5, window_bounds = array<i64: 1, 128>}, {transform_indices = @transform_6, window_bounds = array<i64: 2, 8, 8, 128>}, {pipeline_mode = #tpu.pipeline_mode<synchronous>, transform_indices = @transform_7, window_bounds = array<i64: 2, 128>}]} {
    %c0_i32 = arith.constant 0 : i32
    %0 = arith.cmpi eq, %arg0, %c0_i32 : i32
    %1 = arith.extui %0 : i1 to i32
    %c0_i32_0 = arith.constant 0 : i32
    %2 = arith.cmpi ne, %1, %c0_i32_0 : i32
    scf.if %2 {
      %cst_110 = arith.constant 0.000000e+00 : f32
      %113 = vector.broadcast %cst_110 : f32 to vector<2x128xf32>
      %c0_111 = arith.constant 0 : index
      %c0_112 = arith.constant 0 : index
      %114 = vector.load %arg8[%c0_111, %c0_112] : memref<2x128xf32, #tpu.memory_space<vmem>>, vector<2x128xf32>
      tpu.vector_store %arg8[%c0_111, %c0_112], %113 {strides = array<i32>} : memref<2x128xf32, #tpu.memory_space<vmem>>, vector<2x128xf32>,
      %cst_113 = arith.constant 0.000000e+00 : f32
      %115 = vector.broadcast %cst_113 : f32 to vector<2x10x10x128xf32>
      %c0_114 = arith.constant 0 : index
      %c0_115 = arith.constant 0 : index
      %c0_116 = arith.constant 0 : index
      %c0_117 = arith.constant 0 : index
      %116 = vector.load %arg9[%c0_114, %c0_115, %c0_116, %c0_117] : memref<2x10x10x128xf32, #tpu.memory_space<vmem>>, vector<2x10x10x128xf32>
      tpu.vector_store %arg9[%c0_114, %c0_115, %c0_116, %c0_117], %115 {strides = array<i32>} : memref<2x10x10x128xf32, #tpu.memory_space<vmem>>, vector<2x10x10x128xf32>,
    } else {
    }
    %c0 = arith.constant 0 : index
    %c0_1 = arith.constant 0 : index
    %3 = vector.load %arg2[%c0, %c0_1] : memref<2x128xf32, #tpu.memory_space<vmem>>, vector<2x128xf32>
    %4 = vector.extract_strided_slice %3 {offsets = [0, 0], sizes = [1, 128], strides = [1, 1]} : vector<2x128xf32> to vector<1x128xf32>
    %cst = arith.constant 7.812500e-03 : f32
    %5 = vector.broadcast %cst : f32 to vector<1x128xf32>
    %6 = arith.mulf %4, %5 : vector<1x128xf32>
    %7 = vector.extract_strided_slice %3 {offsets = [1, 0], sizes = [1, 128], strides = [1, 1]} : vector<2x128xf32> to vector<1x128xf32>
    %cst_2 = arith.constant 7.812500e-03 : f32
    %8 = vector.broadcast %cst_2 : f32 to vector<1x128xf32>
    %9 = arith.mulf %7, %8 : vector<1x128xf32>
    %10 = arith.mulf %6, %6 : vector<1x128xf32>
    %11 = arith.subf %9, %10 : vector<1x128xf32>
    %cst_3 = arith.constant 0.000000e+00 : f32
    %12 = vector.broadcast %cst_3 : f32 to vector<1x128xf32>
    %13 = arith.maximumf %11, %12 : vector<1x128xf32>
    %c0_4 = arith.constant 0 : index
    %c0_5 = arith.constant 0 : index
    %14 = vector.load %arg3[%c0_4, %c0_5] : memref<1x128xf32, #tpu.memory_space<vmem>>, vector<1x128xf32>
    %cst_6 = arith.constant 9.99999974E-6 : f32
    %15 = vector.broadcast %cst_6 : f32 to vector<1x128xf32>
    %16 = arith.addf %13, %15 : vector<1x128xf32>
    %17 = math.rsqrt %16 : vector<1x128xf32>
    %18 = arith.mulf %14, %17 : vector<1x128xf32>
    %c0_7 = arith.constant 0 : index
    %c0_8 = arith.constant 0 : index
    %19 = vector.load %arg4[%c0_7, %c0_8] : memref<1x128xf32, #tpu.memory_space<vmem>>, vector<1x128xf32>
    %20 = arith.mulf %6, %18 : vector<1x128xf32>
    %21 = arith.subf %19, %20 : vector<1x128xf32>
    %c0_9 = arith.constant 0 : index
    %c0_10 = arith.constant 0 : index
    %c0_11 = arith.constant 0 : index
    %c0_12 = arith.constant 0 : index
    %22 = vector.load %arg1[%c0_9, %c0_10, %c0_11, %c0_12] : memref<2x8x8x128xbf16, #tpu.memory_space<vmem>>, vector<2x8x8x128xbf16>
    %23 = arith.extf %22 : vector<2x8x8x128xbf16> to vector<2x8x8x128xf32>
    %24 = vector.shape_cast %23 : vector<2x8x8x128xf32> to vector<128x128xf32>
    %25 = vector.broadcast %18 : vector<1x128xf32> to vector<128x128xf32>
    %26 = arith.mulf %24, %25 : vector<128x128xf32>
    %27 = vector.broadcast %21 : vector<1x128xf32> to vector<128x128xf32>
    %28 = arith.addf %26, %27 : vector<128x128xf32>
    %cst_13 = arith.constant 0.000000e+00 : f32
    %29 = vector.broadcast %cst_13 : f32 to vector<128x128xf32>
    %30 = arith.maximumf %28, %29 : vector<128x128xf32>
    %31 = vector.shape_cast %30 : vector<128x128xf32> to vector<2x8x8x128xf32>
    %c0_14 = arith.constant 0 : index
    %c1 = arith.constant 1 : index
    %c1_15 = arith.constant 1 : index
    %c0_16 = arith.constant 0 : index
    %32 = vector.load %arg9[%c0_14, %c1, %c1_15, %c0_16] : memref<2x10x10x128xf32, #tpu.memory_space<vmem>>, vector<2x8x8x128xf32>
    tpu.vector_store %arg9[%c0_14, %c1, %c1_15, %c0_16], %31 {strides = array<i32>} : memref<2x10x10x128xf32, #tpu.memory_space<vmem>>, vector<2x8x8x128xf32>,
    %cst_17 = arith.constant 0.000000e+00 : f32
    %33 = vector.broadcast %cst_17 : f32 to vector<128x128xf32>
    %c0_18 = arith.constant 0 : index
    %c0_19 = arith.constant 0 : index
    %c0_20 = arith.constant 0 : index
    %c0_21 = arith.constant 0 : index
    %34 = vector.load %arg9[%c0_18, %c0_19, %c0_20, %c0_21] : memref<2x10x10x128xf32, #tpu.memory_space<vmem>>, vector<2x8x8x128xf32>
    %35 = vector.shape_cast %34 : vector<2x8x8x128xf32> to vector<128x128xf32>
    %36 = arith.truncf %35 : vector<128x128xf32> to vector<128x128xbf16>
    %c0_22 = arith.constant 0 : index
    %c0_23 = arith.constant 0 : index
    %c0_24 = arith.constant 0 : index
    %c0_25 = arith.constant 0 : index
    %37 = vector.load %arg5[%c0_22, %c0_23, %c0_24, %c0_25] : memref<3x3x128x128xbf16, #tpu.memory_space<vmem>>, vector<1x1x128x128xbf16>
    %38 = vector.shape_cast %37 : vector<1x1x128x128xbf16> to vector<128x128xbf16>
    %cst_26 = arith.constant dense<0.000000e+00> : vector<128x128xf32>
    %39 = tpu.matmul %36, %38, %cst_26 {dimension_numbers = #tpu.dot_dimension_numbers<[1], [0], [0], [1], [0, 0, 1, 1], [], []>} : vector<128x128xbf16>, vector<128x128xbf16>, vector<128x128xf32> -> vector<128x128xf32>
    %40 = arith.addf %33, %39 : vector<128x128xf32>
    %c0_27 = arith.constant 0 : index
    %c0_28 = arith.constant 0 : index
    %c1_29 = arith.constant 1 : index
    %c0_30 = arith.constant 0 : index
    %41 = vector.load %arg9[%c0_27, %c0_28, %c1_29, %c0_30] : memref<2x10x10x128xf32, #tpu.memory_space<vmem>>, vector<2x8x8x128xf32>
    %42 = vector.shape_cast %41 : vector<2x8x8x128xf32> to vector<128x128xf32>
    %43 = arith.truncf %42 : vector<128x128xf32> to vector<128x128xbf16>
    %c0_31 = arith.constant 0 : index
    %c1_32 = arith.constant 1 : index
    %c0_33 = arith.constant 0 : index
    %c0_34 = arith.constant 0 : index
    %44 = vector.load %arg5[%c0_31, %c1_32, %c0_33, %c0_34] : memref<3x3x128x128xbf16, #tpu.memory_space<vmem>>, vector<1x1x128x128xbf16>
    %45 = vector.shape_cast %44 : vector<1x1x128x128xbf16> to vector<128x128xbf16>
    %cst_35 = arith.constant dense<0.000000e+00> : vector<128x128xf32>
    %46 = tpu.matmul %43, %45, %cst_35 {dimension_numbers = #tpu.dot_dimension_numbers<[1], [0], [0], [1], [0, 0, 1, 1], [], []>} : vector<128x128xbf16>, vector<128x128xbf16>, vector<128x128xf32> -> vector<128x128xf32>
    %47 = arith.addf %40, %46 : vector<128x128xf32>
    %c0_36 = arith.constant 0 : index
    %c0_37 = arith.constant 0 : index
    %c2 = arith.constant 2 : index
    %c0_38 = arith.constant 0 : index
    %48 = vector.load %arg9[%c0_36, %c0_37, %c2, %c0_38] : memref<2x10x10x128xf32, #tpu.memory_space<vmem>>, vector<2x8x8x128xf32>
    %49 = vector.shape_cast %48 : vector<2x8x8x128xf32> to vector<128x128xf32>
    %50 = arith.truncf %49 : vector<128x128xf32> to vector<128x128xbf16>
    %c0_39 = arith.constant 0 : index
    %c2_40 = arith.constant 2 : index
    %c0_41 = arith.constant 0 : index
    %c0_42 = arith.constant 0 : index
    %51 = vector.load %arg5[%c0_39, %c2_40, %c0_41, %c0_42] : memref<3x3x128x128xbf16, #tpu.memory_space<vmem>>, vector<1x1x128x128xbf16>
    %52 = vector.shape_cast %51 : vector<1x1x128x128xbf16> to vector<128x128xbf16>
    %cst_43 = arith.constant dense<0.000000e+00> : vector<128x128xf32>
    %53 = tpu.matmul %50, %52, %cst_43 {dimension_numbers = #tpu.dot_dimension_numbers<[1], [0], [0], [1], [0, 0, 1, 1], [], []>} : vector<128x128xbf16>, vector<128x128xbf16>, vector<128x128xf32> -> vector<128x128xf32>
    %54 = arith.addf %47, %53 : vector<128x128xf32>
    %c0_44 = arith.constant 0 : index
    %c1_45 = arith.constant 1 : index
    %c0_46 = arith.constant 0 : index
    %c0_47 = arith.constant 0 : index
    %55 = vector.load %arg9[%c0_44, %c1_45, %c0_46, %c0_47] : memref<2x10x10x128xf32, #tpu.memory_space<vmem>>, vector<2x8x8x128xf32>
    %56 = vector.shape_cast %55 : vector<2x8x8x128xf32> to vector<128x128xf32>
    %57 = arith.truncf %56 : vector<128x128xf32> to vector<128x128xbf16>
    %c1_48 = arith.constant 1 : index
    %c0_49 = arith.constant 0 : index
    %c0_50 = arith.constant 0 : index
    %c0_51 = arith.constant 0 : index
    %58 = vector.load %arg5[%c1_48, %c0_49, %c0_50, %c0_51] : memref<3x3x128x128xbf16, #tpu.memory_space<vmem>>, vector<1x1x128x128xbf16>
    %59 = vector.shape_cast %58 : vector<1x1x128x128xbf16> to vector<128x128xbf16>
    %cst_52 = arith.constant dense<0.000000e+00> : vector<128x128xf32>
    %60 = tpu.matmul %57, %59, %cst_52 {dimension_numbers = #tpu.dot_dimension_numbers<[1], [0], [0], [1], [0, 0, 1, 1], [], []>} : vector<128x128xbf16>, vector<128x128xbf16>, vector<128x128xf32> -> vector<128x128xf32>
    %61 = arith.addf %54, %60 : vector<128x128xf32>
    %c0_53 = arith.constant 0 : index
    %c1_54 = arith.constant 1 : index
    %c1_55 = arith.constant 1 : index
    %c0_56 = arith.constant 0 : index
    %62 = vector.load %arg9[%c0_53, %c1_54, %c1_55, %c0_56] : memref<2x10x10x128xf32, #tpu.memory_space<vmem>>, vector<2x8x8x128xf32>
    %63 = vector.shape_cast %62 : vector<2x8x8x128xf32> to vector<128x128xf32>
    %64 = arith.truncf %63 : vector<128x128xf32> to vector<128x128xbf16>
    %c1_57 = arith.constant 1 : index
    %c1_58 = arith.constant 1 : index
    %c0_59 = arith.constant 0 : index
    %c0_60 = arith.constant 0 : index
    %65 = vector.load %arg5[%c1_57, %c1_58, %c0_59, %c0_60] : memref<3x3x128x128xbf16, #tpu.memory_space<vmem>>, vector<1x1x128x128xbf16>
    %66 = vector.shape_cast %65 : vector<1x1x128x128xbf16> to vector<128x128xbf16>
    %cst_61 = arith.constant dense<0.000000e+00> : vector<128x128xf32>
    %67 = tpu.matmul %64, %66, %cst_61 {dimension_numbers = #tpu.dot_dimension_numbers<[1], [0], [0], [1], [0, 0, 1, 1], [], []>} : vector<128x128xbf16>, vector<128x128xbf16>, vector<128x128xf32> -> vector<128x128xf32>
    %68 = arith.addf %61, %67 : vector<128x128xf32>
    %c0_62 = arith.constant 0 : index
    %c1_63 = arith.constant 1 : index
    %c2_64 = arith.constant 2 : index
    %c0_65 = arith.constant 0 : index
    %69 = vector.load %arg9[%c0_62, %c1_63, %c2_64, %c0_65] : memref<2x10x10x128xf32, #tpu.memory_space<vmem>>, vector<2x8x8x128xf32>
    %70 = vector.shape_cast %69 : vector<2x8x8x128xf32> to vector<128x128xf32>
    %71 = arith.truncf %70 : vector<128x128xf32> to vector<128x128xbf16>
    %c1_66 = arith.constant 1 : index
    %c2_67 = arith.constant 2 : index
    %c0_68 = arith.constant 0 : index
    %c0_69 = arith.constant 0 : index
    %72 = vector.load %arg5[%c1_66, %c2_67, %c0_68, %c0_69] : memref<3x3x128x128xbf16, #tpu.memory_space<vmem>>, vector<1x1x128x128xbf16>
    %73 = vector.shape_cast %72 : vector<1x1x128x128xbf16> to vector<128x128xbf16>
    %cst_70 = arith.constant dense<0.000000e+00> : vector<128x128xf32>
    %74 = tpu.matmul %71, %73, %cst_70 {dimension_numbers = #tpu.dot_dimension_numbers<[1], [0], [0], [1], [0, 0, 1, 1], [], []>} : vector<128x128xbf16>, vector<128x128xbf16>, vector<128x128xf32> -> vector<128x128xf32>
    %75 = arith.addf %68, %74 : vector<128x128xf32>
    %c0_71 = arith.constant 0 : index
    %c2_72 = arith.constant 2 : index
    %c0_73 = arith.constant 0 : index
    %c0_74 = arith.constant 0 : index
    %76 = vector.load %arg9[%c0_71, %c2_72, %c0_73, %c0_74] : memref<2x10x10x128xf32, #tpu.memory_space<vmem>>, vector<2x8x8x128xf32>
    %77 = vector.shape_cast %76 : vector<2x8x8x128xf32> to vector<128x128xf32>
    %78 = arith.truncf %77 : vector<128x128xf32> to vector<128x128xbf16>
    %c2_75 = arith.constant 2 : index
    %c0_76 = arith.constant 0 : index
    %c0_77 = arith.constant 0 : index
    %c0_78 = arith.constant 0 : index
    %79 = vector.load %arg5[%c2_75, %c0_76, %c0_77, %c0_78] : memref<3x3x128x128xbf16, #tpu.memory_space<vmem>>, vector<1x1x128x128xbf16>
    %80 = vector.shape_cast %79 : vector<1x1x128x128xbf16> to vector<128x128xbf16>
    %cst_79 = arith.constant dense<0.000000e+00> : vector<128x128xf32>
    %81 = tpu.matmul %78, %80, %cst_79 {dimension_numbers = #tpu.dot_dimension_numbers<[1], [0], [0], [1], [0, 0, 1, 1], [], []>} : vector<128x128xbf16>, vector<128x128xbf16>, vector<128x128xf32> -> vector<128x128xf32>
    %82 = arith.addf %75, %81 : vector<128x128xf32>
    %c0_80 = arith.constant 0 : index
    %c2_81 = arith.constant 2 : index
    %c1_82 = arith.constant 1 : index
    %c0_83 = arith.constant 0 : index
    %83 = vector.load %arg9[%c0_80, %c2_81, %c1_82, %c0_83] : memref<2x10x10x128xf32, #tpu.memory_space<vmem>>, vector<2x8x8x128xf32>
    %84 = vector.shape_cast %83 : vector<2x8x8x128xf32> to vector<128x128xf32>
    %85 = arith.truncf %84 : vector<128x128xf32> to vector<128x128xbf16>
    %c2_84 = arith.constant 2 : index
    %c1_85 = arith.constant 1 : index
    %c0_86 = arith.constant 0 : index
    %c0_87 = arith.constant 0 : index
    %86 = vector.load %arg5[%c2_84, %c1_85, %c0_86, %c0_87] : memref<3x3x128x128xbf16, #tpu.memory_space<vmem>>, vector<1x1x128x128xbf16>
    %87 = vector.shape_cast %86 : vector<1x1x128x128xbf16> to vector<128x128xbf16>
    %cst_88 = arith.constant dense<0.000000e+00> : vector<128x128xf32>
    %88 = tpu.matmul %85, %87, %cst_88 {dimension_numbers = #tpu.dot_dimension_numbers<[1], [0], [0], [1], [0, 0, 1, 1], [], []>} : vector<128x128xbf16>, vector<128x128xbf16>, vector<128x128xf32> -> vector<128x128xf32>
    %89 = arith.addf %82, %88 : vector<128x128xf32>
    %c0_89 = arith.constant 0 : index
    %c2_90 = arith.constant 2 : index
    %c2_91 = arith.constant 2 : index
    %c0_92 = arith.constant 0 : index
    %90 = vector.load %arg9[%c0_89, %c2_90, %c2_91, %c0_92] : memref<2x10x10x128xf32, #tpu.memory_space<vmem>>, vector<2x8x8x128xf32>
    %91 = vector.shape_cast %90 : vector<2x8x8x128xf32> to vector<128x128xf32>
    %92 = arith.truncf %91 : vector<128x128xf32> to vector<128x128xbf16>
    %c2_93 = arith.constant 2 : index
    %c2_94 = arith.constant 2 : index
    %c0_95 = arith.constant 0 : index
    %c0_96 = arith.constant 0 : index
    %93 = vector.load %arg5[%c2_93, %c2_94, %c0_95, %c0_96] : memref<3x3x128x128xbf16, #tpu.memory_space<vmem>>, vector<1x1x128x128xbf16>
    %94 = vector.shape_cast %93 : vector<1x1x128x128xbf16> to vector<128x128xbf16>
    %cst_97 = arith.constant dense<0.000000e+00> : vector<128x128xf32>
    %95 = tpu.matmul %92, %94, %cst_97 {dimension_numbers = #tpu.dot_dimension_numbers<[1], [0], [0], [1], [0, 0, 1, 1], [], []>} : vector<128x128xbf16>, vector<128x128xbf16>, vector<128x128xf32> -> vector<128x128xf32>
    %96 = arith.addf %89, %95 : vector<128x128xf32>
    %c0_98 = arith.constant 0 : index
    %c0_99 = arith.constant 0 : index
    %97 = vector.load %arg6[%c0_98, %c0_99] : memref<1x128xf32, #tpu.memory_space<vmem>>, vector<1x128xf32>
    %98 = vector.broadcast %97 : vector<1x128xf32> to vector<128x128xf32>
    %99 = arith.addf %96, %98 : vector<128x128xf32>
    %100 = arith.truncf %99 : vector<128x128xf32> to vector<128x128xbf16>
    %101 = vector.shape_cast %100 : vector<128x128xbf16> to vector<2x8x8x128xbf16>
    %c0_100 = arith.constant 0 : index
    %c0_101 = arith.constant 0 : index
    %c0_102 = arith.constant 0 : index
    %c0_103 = arith.constant 0 : index
    %102 = vector.load %arg7[%c0_100, %c0_101, %c0_102, %c0_103] : memref<2x8x8x128xbf16, #tpu.memory_space<vmem>>, vector<2x8x8x128xbf16>
    tpu.vector_store %arg7[%c0_100, %c0_101, %c0_102, %c0_103], %101 {strides = array<i32>} : memref<2x8x8x128xbf16, #tpu.memory_space<vmem>>, vector<2x8x8x128xbf16>,
    %103 = arith.extf %100 : vector<128x128xbf16> to vector<128x128xf32>
    %c0_104 = arith.constant 0 : index
    %c0_105 = arith.constant 0 : index
    %104 = vector.load %arg8[%c0_104, %c0_105] : memref<2x128xf32, #tpu.memory_space<vmem>>, vector<2x128xf32>
    %cst_106 = arith.constant dense<0.000000e+00> : vector<128xf32>
    %105 = vector.multi_reduction <add>, %103, %cst_106 [0] : vector<128x128xf32> to vector<128xf32>
    %106 = vector.shape_cast %105 : vector<128xf32> to vector<1x128xf32>
    %107 = arith.mulf %103, %103 : vector<128x128xf32>
    %cst_107 = arith.constant dense<0.000000e+00> : vector<128xf32>
    %108 = vector.multi_reduction <add>, %107, %cst_107 [0] : vector<128x128xf32> to vector<128xf32>
    %109 = vector.shape_cast %108 : vector<128xf32> to vector<1x128xf32>
    %110 = tpu.concatenate %106, %109 in 0 : vector<1x128xf32>, vector<1x128xf32> -> vector<2x128xf32>
    %111 = arith.addf %104, %110 : vector<2x128xf32>
    %c0_108 = arith.constant 0 : index
    %c0_109 = arith.constant 0 : index
    %112 = vector.load %arg8[%c0_108, %c0_109] : memref<2x128xf32, #tpu.memory_space<vmem>>, vector<2x128xf32>
    tpu.vector_store %arg8[%c0_108, %c0_109], %111 {strides = array<i32>} : memref<2x128xf32, #tpu.memory_space<vmem>>, vector<2x128xf32>,
    return
  }
  func.func @transform_0(%arg0: i32) -> (i32, i32, i32, i32) {
    %c0_i32 = arith.constant 0 : i32
    %c0_i32_0 = arith.constant 0 : i32
    %c0_i32_1 = arith.constant 0 : i32
    %c0_i32_2 = arith.constant 0 : i32
    return %arg0, %c0_i32, %c0_i32_0, %c0_i32_1 : i32, i32, i32, i32
  }
  func.func @transform_1(%arg0: i32) -> (i32, i32) {
    %c0_i32 = arith.constant 0 : i32
    %c0_i32_0 = arith.constant 0 : i32
    %c0_i32_1 = arith.constant 0 : i32
    return %c0_i32, %c0_i32_0 : i32, i32
  }
  func.func @transform_2(%arg0: i32) -> (i32, i32) {
    %c0_i32 = arith.constant 0 : i32
    %c0_i32_0 = arith.constant 0 : i32
    %c0_i32_1 = arith.constant 0 : i32
    return %c0_i32, %c0_i32_0 : i32, i32
  }
  func.func @transform_3(%arg0: i32) -> (i32, i32) {
    %c0_i32 = arith.constant 0 : i32
    %c0_i32_0 = arith.constant 0 : i32
    %c0_i32_1 = arith.constant 0 : i32
    return %c0_i32, %c0_i32_0 : i32, i32
  }
  func.func @transform_4(%arg0: i32) -> (i32, i32, i32, i32) {
    %c0_i32 = arith.constant 0 : i32
    %c0_i32_0 = arith.constant 0 : i32
    %c0_i32_1 = arith.constant 0 : i32
    %c0_i32_2 = arith.constant 0 : i32
    %c0_i32_3 = arith.constant 0 : i32
    return %c0_i32, %c0_i32_0, %c0_i32_1, %c0_i32_2 : i32, i32, i32, i32
  }
  func.func @transform_5(%arg0: i32) -> (i32, i32) {
    %c0_i32 = arith.constant 0 : i32
    %c0_i32_0 = arith.constant 0 : i32
    %c0_i32_1 = arith.constant 0 : i32
    return %c0_i32, %c0_i32_0 : i32, i32
  }
  func.func @transform_6(%arg0: i32) -> (i32, i32, i32, i32) {
    %c0_i32 = arith.constant 0 : i32
    %c0_i32_0 = arith.constant 0 : i32
    %c0_i32_1 = arith.constant 0 : i32
    %c0_i32_2 = arith.constant 0 : i32
    return %arg0, %c0_i32, %c0_i32_0, %c0_i32_1 : i32, i32, i32, i32
  }
  func.func @transform_7(%arg0: i32) -> (i32, i32) {
    %c0_i32 = arith.constant 0 : i32
    %c0_i32_0 = arith.constant 0 : i32
    %c0_i32_1 = arith.constant 0 : i32
    return %c0_i32, %c0_i32_0 : i32, i32
  }
}

module attributes {stable_mosaic.version = 11 : i64} {
  func.func @_bn_relu_kernel(%arg0: i32, %arg1: memref<2x8x8x128xbf16, #tpu.memory_space<vmem>>, %arg2: memref<2x128xf32, #tpu.memory_space<vmem>>, %arg3: memref<1x128xf32, #tpu.memory_space<vmem>>, %arg4: memref<1x128xf32, #tpu.memory_space<vmem>>, %arg5: memref<2x8x8x128xf32, #tpu.memory_space<vmem>>) attributes {dimension_semantics = [#tpu.dimension_semantics<parallel>], iteration_bounds = array<i64: 1>, scalar_prefetch = 0 : i64, scratch_operands = 0 : i64, tpu.core_type = #tpu.core_type<tc>, window_params = [{transform_indices = @transform_0, window_bounds = array<i64: 2, 8, 8, 128>}, {pipeline_mode = #tpu.pipeline_mode<synchronous>, transform_indices = @transform_1, window_bounds = array<i64: 2, 128>}, {pipeline_mode = #tpu.pipeline_mode<synchronous>, transform_indices = @transform_2, window_bounds = array<i64: 1, 128>}, {pipeline_mode = #tpu.pipeline_mode<synchronous>, transform_indices = @transform_3, window_bounds = array<i64: 1, 128>}, {transform_indices = @transform_4, window_bounds = array<i64: 2, 8, 8, 128>}]} {
    %c0 = arith.constant 0 : index
    %c0_0 = arith.constant 0 : index
    %0 = vector.load %arg2[%c0, %c0_0] : memref<2x128xf32, #tpu.memory_space<vmem>>, vector<2x128xf32>
    %1 = vector.extract_strided_slice %0 {offsets = [0, 0], sizes = [1, 128], strides = [1, 1]} : vector<2x128xf32> to vector<1x128xf32>
    %cst = arith.constant 7.812500e-03 : f32
    %2 = vector.broadcast %cst : f32 to vector<1x128xf32>
    %3 = arith.mulf %1, %2 : vector<1x128xf32>
    %4 = vector.extract_strided_slice %0 {offsets = [1, 0], sizes = [1, 128], strides = [1, 1]} : vector<2x128xf32> to vector<1x128xf32>
    %cst_1 = arith.constant 7.812500e-03 : f32
    %5 = vector.broadcast %cst_1 : f32 to vector<1x128xf32>
    %6 = arith.mulf %4, %5 : vector<1x128xf32>
    %7 = arith.mulf %3, %3 : vector<1x128xf32>
    %8 = arith.subf %6, %7 : vector<1x128xf32>
    %cst_2 = arith.constant 0.000000e+00 : f32
    %9 = vector.broadcast %cst_2 : f32 to vector<1x128xf32>
    %10 = arith.maximumf %8, %9 : vector<1x128xf32>
    %c0_3 = arith.constant 0 : index
    %c0_4 = arith.constant 0 : index
    %11 = vector.load %arg3[%c0_3, %c0_4] : memref<1x128xf32, #tpu.memory_space<vmem>>, vector<1x128xf32>
    %cst_5 = arith.constant 9.99999974E-6 : f32
    %12 = vector.broadcast %cst_5 : f32 to vector<1x128xf32>
    %13 = arith.addf %10, %12 : vector<1x128xf32>
    %14 = math.rsqrt %13 : vector<1x128xf32>
    %15 = arith.mulf %11, %14 : vector<1x128xf32>
    %c0_6 = arith.constant 0 : index
    %c0_7 = arith.constant 0 : index
    %16 = vector.load %arg4[%c0_6, %c0_7] : memref<1x128xf32, #tpu.memory_space<vmem>>, vector<1x128xf32>
    %17 = arith.mulf %3, %15 : vector<1x128xf32>
    %18 = arith.subf %16, %17 : vector<1x128xf32>
    %c0_8 = arith.constant 0 : index
    %c0_9 = arith.constant 0 : index
    %c0_10 = arith.constant 0 : index
    %c0_11 = arith.constant 0 : index
    %19 = vector.load %arg1[%c0_8, %c0_9, %c0_10, %c0_11] : memref<2x8x8x128xbf16, #tpu.memory_space<vmem>>, vector<2x8x8x128xbf16>
    %20 = arith.extf %19 : vector<2x8x8x128xbf16> to vector<2x8x8x128xf32>
    %21 = vector.shape_cast %20 : vector<2x8x8x128xf32> to vector<128x128xf32>
    %22 = vector.broadcast %15 : vector<1x128xf32> to vector<128x128xf32>
    %23 = arith.mulf %21, %22 : vector<128x128xf32>
    %24 = vector.broadcast %18 : vector<1x128xf32> to vector<128x128xf32>
    %25 = arith.addf %23, %24 : vector<128x128xf32>
    %cst_12 = arith.constant 0.000000e+00 : f32
    %26 = vector.broadcast %cst_12 : f32 to vector<128x128xf32>
    %27 = arith.maximumf %25, %26 : vector<128x128xf32>
    %28 = vector.shape_cast %27 : vector<128x128xf32> to vector<2x8x8x128xf32>
    %c0_13 = arith.constant 0 : index
    %c0_14 = arith.constant 0 : index
    %c0_15 = arith.constant 0 : index
    %c0_16 = arith.constant 0 : index
    %29 = vector.load %arg5[%c0_13, %c0_14, %c0_15, %c0_16] : memref<2x8x8x128xf32, #tpu.memory_space<vmem>>, vector<2x8x8x128xf32>
    tpu.vector_store %arg5[%c0_13, %c0_14, %c0_15, %c0_16], %28 {strides = array<i32>} : memref<2x8x8x128xf32, #tpu.memory_space<vmem>>, vector<2x8x8x128xf32>,
    return
  }
  func.func @transform_0(%arg0: i32) -> (i32, i32, i32, i32) {
    %c0_i32 = arith.constant 0 : i32
    %c0_i32_0 = arith.constant 0 : i32
    %c0_i32_1 = arith.constant 0 : i32
    %c0_i32_2 = arith.constant 0 : i32
    return %arg0, %c0_i32, %c0_i32_0, %c0_i32_1 : i32, i32, i32, i32
  }
  func.func @transform_1(%arg0: i32) -> (i32, i32) {
    %c0_i32 = arith.constant 0 : i32
    %c0_i32_0 = arith.constant 0 : i32
    %c0_i32_1 = arith.constant 0 : i32
    return %c0_i32, %c0_i32_0 : i32, i32
  }
  func.func @transform_2(%arg0: i32) -> (i32, i32) {
    %c0_i32 = arith.constant 0 : i32
    %c0_i32_0 = arith.constant 0 : i32
    %c0_i32_1 = arith.constant 0 : i32
    return %c0_i32, %c0_i32_0 : i32, i32
  }
  func.func @transform_3(%arg0: i32) -> (i32, i32) {
    %c0_i32 = arith.constant 0 : i32
    %c0_i32_0 = arith.constant 0 : i32
    %c0_i32_1 = arith.constant 0 : i32
    return %c0_i32, %c0_i32_0 : i32, i32
  }
  func.func @transform_4(%arg0: i32) -> (i32, i32, i32, i32) {
    %c0_i32 = arith.constant 0 : i32
    %c0_i32_0 = arith.constant 0 : i32
    %c0_i32_1 = arith.constant 0 : i32
    %c0_i32_2 = arith.constant 0 : i32
    return %arg0, %c0_i32, %c0_i32_0, %c0_i32_1 : i32, i32, i32, i32
  }
}

</mosaic_0001>

<bundles_post_ra>
// kernel: down_encoder_forward.5
= control target key start
LH: loop header
LB: loop body
LE: loop exit
PB: predicated region body
PF: predicated region fallthrough
CT: control target
= control target key end

     0   :  { %v203_v7 = vmov 1966171168   ;;  %v32_v9 = vlaneseq  ;;  %s314_s1 = inlined_call_operand.vmem [shape: f32[2,128], index: 1, kind: input, shape index: {}]   ;;  %s315_s0 = inlined_call_operand.vmem [shape: bf16[2,8,8,128], index: 0, kind: input, shape index: {}]   ;;  %s316_s2 = inlined_call_operand.vmem [shape: f32[1,128], index: 2, kind: input, shape index: {}]   ;;  %s317_s3 = inlined_call_operand.vmem [shape: f32[1,128], index: 3, kind: input, shape index: {}]   ;;  %s318_s4 = inlined_call_operand.vmem [shape: f32[2,8,8,128], index: 4, kind: output, shape index: {}]  }
   0x1   :  { %v17_v0 = vld [vmem:[%s314_s1] sm:$0x3]  ;;  %v30_v8 = vunpack.c.l.s4 %v203_v7  ;;  %v193_v17 = vld [vmem:[%s315_s0 + $0x8] sm:$0xff]   ;;  %v194_v19 = vld [vmem:[%s315_s0 + $0x10] sm:$0xff]  }
   0x2   :  { %v18_v1 = vmul.f32 0.0078125, %v17_v0  ;;  %v33_v11 = vshrl.u32 %v32_v9, 7  ;;  %v162_v16 = vld [vmem:[%s315_s0] sm:$0xff]   ;;  %v195_v22 = vld [vmem:[%s315_s0 + $0x18] sm:$0xff]   ;;  %v167_v26 = vunpack.c.l.bf16 %v193_v17  ;;  %v197_v27 = vld [vmem:[%s315_s0 + $0x28] sm:$0xff]   ;;  %v168_v29 = vunpack.c.h.bf16 %v193_v17 }
   0x3   :  { %v31_v10 = vunpack.c.0.s8 %v30_v8  ;;  %v25_v18 = vld [vmem:[%s316_s2] sm:$0x1]  ;;  %v163_v24 = vunpack.c.l.bf16 %v162_v16  ;;  %v164_v25 = vunpack.c.h.bf16 %v162_v16  ;;  %v171_v30 = vunpack.c.l.bf16 %v194_v19  ;;  %v198_v32 = vld [vmem:[%s315_s0 + $0x30] sm:$0xff]   ;;  %v259_v33 = vld [vmem:[%s315_s0 + $0x38] sm:$0xff]  }
   0x4   :  { %v19_v2 = vmul.f32 %v18_v1, %v18_v1  ;;  %v84_v21 = vsub.s32 0, %v33_v11  ;;  %v196_v23 = vld [vmem:[%s315_s0 + $0x20] sm:$0xff]   ;;  %v172_v31 = vunpack.c.h.bf16 %v194_v19  ;;  %v175_v35 = vunpack.c.l.bf16 %v195_v22 }
   0x5   :  { %v34_v12 = vsub.s32 %v31_v10, %v33_v11  ;;  %v46_v34 = vld [vmem:[%s317_s3] sm:$0x1]  ;;  %v176_v36 = vunpack.c.h.bf16 %v195_v22  ;;  %v179_v37 = vunpack.c.l.bf16 %v196_v23  ;;  %v180_v38 = vunpack.c.h.bf16 %v196_v23 }
   0x6   :  { %v21_v3 = vrot.slane %v19_v2, 7  ;;  %v183_v41 = vunpack.c.l.bf16 %v197_v27  ;;  %v184_v42 = vunpack.c.h.bf16 %v197_v27  ;;  %v187_v43 = vunpack.c.l.bf16 %v198_v32 }
   0x7   :  { %v188_v44 = vunpack.c.h.bf16 %v198_v32  ;;  %v191_v45 = vunpack.c.l.bf16 %v259_v33  ;;  %v192_v46 = vunpack.c.h.bf16 %v259_v33 }
   0x8   :  { %v23_v4 = vsub.f32 %v18_v1, %v21_v3 }
   0xa   :  { %v24_v5 = vmax.f32 %v23_v4, 0.0 }
   0xc   :  { %v26_v6 = vadd.f32 1e-05, %v24_v5 }
   0xe   :  { %201 = vrsqrt.f32 %v26_v6 }
  0x1b   :  { %v202_v13 = vpop.eup %201 }
  0x1c   :  { %v35_v14 = vrot.slane %v202_v13, %v34_v12 }
  0x1e   :  { %v36_v15 = vcombine.high %v35_v14, %v35_v14 }
  0x20   :  { %v43_v20 = vrot.slane %v36_v15, %v34_v12 }
  0x22   :  { %v45_v28 = vmul.f32 %v43_v20, %v25_v18 }
  0x24   :  { %v47_v39 = vmul.f32 %v45_v28, %v18_v1  ;;  %v85_v40 = vrot.slane %v45_v28, %v84_v21 }
  0x26   :  { %v48_v47 = vsub.f32 %v46_v34, %v47_v39  ;;  %v87_v48 = vmul.f32 %v163_v24, %v85_v40  ;;  %v88_v49 = vmul.f32 %v164_v25, %v85_v40  ;;  %v89_v50 = vmul.f32 %v167_v26, %v85_v40 }
  0x27   :  { %v90_v51 = vmul.f32 %v168_v29, %v85_v40  ;;  %v91_v52 = vmul.f32 %v171_v30, %v85_v40  ;;  %v92_v53 = vmul.f32 %v172_v31, %v85_v40  ;;  %v93_v54 = vmul.f32 %v175_v35, %v85_v40 }
  0x28   :  { %v107_v55 = vrot.slane %v48_v47, %v84_v21  ;;  %v94_v56 = vmul.f32 %v176_v36, %v85_v40  ;;  %v95_v57 = vmul.f32 %v179_v37, %v85_v40  ;;  %v96_v58 = vmul.f32 %v180_v38, %v85_v40 }
  0x29   :  { %v97_v59 = vmul.f32 %v183_v41, %v85_v40  ;;  %v98_v60 = vmul.f32 %v184_v42, %v85_v40  ;;  %v99_v61 = vmul.f32 %v187_v43, %v85_v40  ;;  %v100_v62 = vmul.f32 %v188_v44, %v85_v40 }
  0x2a   :  { %v109_v63 = vadd.f32 %v107_v55, %v87_v48  ;;  %v110_v0 = vadd.f32 %v107_v55, %v88_v49  ;;  %v111_v1 = vadd.f32 %v107_v55, %v89_v50  ;;  %v112_v2 = vadd.f32 %v107_v55, %v90_v51 }
  0x2b   :  { %v113_v3 = vadd.f32 %v107_v55, %v91_v52  ;;  %v114_v4 = vadd.f32 %v107_v55, %v92_v53  ;;  %v115_v5 = vadd.f32 %v107_v55, %v93_v54  ;;  %v116_v6 = vadd.f32 %v107_v55, %v94_v56 }
  0x2c   :  { %v125_v7 = vmax.f32 %v109_v63, 0.0  ;;  %v126_v8 = vmax.f32 %v110_v0, 0.0  ;;  %v127_v9 = vmax.f32 %v111_v1, 0.0  ;;  %v128_v10 = vmax.f32 %v112_v2, 0.0 }
  0x2d   :  { %v129_v11 = vmax.f32 %v113_v3, 0.0  ;;  %v130_v12 = vmax.f32 %v114_v4, 0.0  ;;  %v131_v13 = vmax.f32 %v115_v5, 0.0  ;;  %v132_v14 = vmax.f32 %v116_v6, 0.0 }
  0x2e   :  { %141 = vst [vmem:[%s318_s4] sm:$0xff] %v125_v7  ;;  %142 = vst [vmem:[%s318_s4 + $0x8] sm:$0xff] %v126_v8  ;;  %v117_v15 = vadd.f32 %v107_v55, %v95_v57  ;;  %v118_v16 = vadd.f32 %v107_v55, %v96_v58  ;;  %v119_v17 = vadd.f32 %v107_v55, %v97_v59 }
  0x2f   :  { %143 = vst [vmem:[%s318_s4 + $0x10] sm:$0xff] %v127_v9  ;;  %144 = vst [vmem:[%s318_s4 + $0x18] sm:$0xff] %v128_v10  ;;  %v120_v18 = vadd.f32 %v107_v55, %v98_v60  ;;  %v121_v19 = vadd.f32 %v107_v55, %v99_v61  ;;  %v122_v20 = vadd.f32 %v107_v55, %v100_v62 }
  0x30   :  { %145 = vst [vmem:[%s318_s4 + $0x20] sm:$0xff] %v129_v11  ;;  %146 = vst [vmem:[%s318_s4 + $0x28] sm:$0xff] %v130_v12  ;;  %v101_v21 = vmul.f32 %v191_v45, %v85_v40  ;;  %v102_v22 = vmul.f32 %v192_v46, %v85_v40  ;;  %v133_v23 = vmax.f32 %v117_v15, 0.0  ;;  %v134_v24 = vmax.f32 %v118_v16, 0.0 }
  0x31   :  { %147 = vst [vmem:[%s318_s4 + $0x30] sm:$0xff] %v131_v13  ;;  %148 = vst [vmem:[%s318_s4 + $0x38] sm:$0xff] %v132_v14  ;;  %v135_v25 = vmax.f32 %v119_v17, 0.0  ;;  %v136_v26 = vmax.f32 %v120_v18, 0.0  ;;  %v137_v27 = vmax.f32 %v121_v19, 0.0  ;;  %v138_v28 = vmax.f32 %v122_v20, 0.0 }
  0x32   :  { %v123_v29 = vadd.f32 %v107_v55, %v101_v21  ;;  %v124_v30 = vadd.f32 %v107_v55, %v102_v22  ;;  %149 = vst [vmem:[%s318_s4 + $0x40] sm:$0xff] %v133_v23  ;;  %150 = vst [vmem:[%s318_s4 + $0x48] sm:$0xff] %v134_v24 }
  0x33   :  { %151 = vst [vmem:[%s318_s4 + $0x50] sm:$0xff] %v135_v25  ;;  %152 = vst [vmem:[%s318_s4 + $0x58] sm:$0xff] %v136_v26 }
  0x34   :  { %153 = vst [vmem:[%s318_s4 + $0x60] sm:$0xff] %v137_v27  ;;  %154 = vst [vmem:[%s318_s4 + $0x68] sm:$0xff] %v138_v28  ;;  %v139_v31 = vmax.f32 %v123_v29, 0.0  ;;  %v140_v32 = vmax.f32 %v124_v30, 0.0 }
  0x36   :  { %155 = vst [vmem:[%s318_s4 + $0x70] sm:$0xff] %v139_v31  ;;  %156 = vst [vmem:[%s318_s4 + $0x78] sm:$0xff] %v140_v32 }

// kernel: down_encoder_forward.3
= control target key start
LH: loop header
LB: loop body
LE: loop exit
PB: predicated region body
PF: predicated region fallthrough
CT: control target
= control target key end

     0   :  { %v2873_v1 = vmov 0.0   ;;  %vm2059_vm0 = vcmask 1040384   ;;  %s3711_s1 = inlined_call_operand.vmem [shape: bf16[3,3,128,128], index: 1, kind: input, shape index: {}]   ;;  %s3712_s0 = inlined_call_operand.vmem [shape: f32[2,8,8,128], index: 0, kind: input, shape index: {}]   ;;  %s3713_s4 = inlined_call_operand.vmem [shape: f32[2,128], index: 4, kind: output, shape index: {1}]   ;;  %s3714_s2 = inlined_call_operand.vmem [shape: f32[1,128], index: 2, kind: input, shape index: {}]   ;;  %s3715_s3 = inlined_call_operand.vmem [shape: bf16[2,8,8,128], index: 3, kind: output, shape index: {0}]  }
   0x1   :  { %v2800_v0 = vld [vmem:[%s3711_s1 + $0x78] sm:$0xff]   ;;  %22 = vst [vmem:[#allocation2] sm:$0xff] %v2873_v1  ;;  %23 = vst [vmem:[#allocation2 + $0x8] sm:$0x3] %v2873_v1  ;;  %v2802_v3 = vld [vmem:[%s3711_s1 + $0x70] sm:$0xff]  }
   0x2   :  { %24 = vst [vmem:[#allocation2 + $0x10] sm:$0xff] %v2873_v1  ;;  %25 = vst [vmem:[#allocation2 + $0x18] sm:$0x3] %v2873_v1  ;;  %v2801_v2 = vld [vmem:[%s3711_s1 + $0x38] sm:$0xff]   ;;  %2495 = vmatprep.subr.bf16.mxu0 %v2800_v0  ;;  %v2803_v4 = vld [vmem:[%s3711_s1 + $0x30] sm:$0xff]  }
   0x3   :  { %26 = vst [vmem:[#allocation2 + $0x20] sm:$0xff] %v2873_v1  ;;  %27 = vst [vmem:[#allocation2 + $0x28] sm:$0x3] %v2873_v1  ;;  %2527 = vmatprep.subr.bf16.mxu1 %v2801_v2  ;;  %2496 = vmatpush3.bf16.msra.mxu0 %v2800_v0  ;;  %v2804_v5 = vld [vmem:[%s3711_s1 + $0x68] sm:$0xff]   ;;  %v2806_v7 = vld [vmem:[%s3711_s1 + $0x60] sm:$0xff]  }
   0x4   :  { %28 = vst [vmem:[#allocation2 + $0x30] sm:$0xff] %v2873_v1  ;;  %29 = vst [vmem:[#allocation2 + $0x38] sm:$0x3] %v2873_v1  ;;  %2528 = vmatpush3.bf16.msra.mxu1 %v2801_v2  ;;  %2497 = vmatprep.subr.bf16.mxu0 %v2802_v3  ;;  %v2805_v6 = vld [vmem:[%s3711_s1 + $0x28] sm:$0xff]   ;;  %v2807_v8 = vld [vmem:[%s3711_s1 + $0x20] sm:$0xff]  }
   0x5   :  { %30 = vst [vmem:[#allocation2 + $0x40] sm:$0xff] %v2873_v1  ;;  %31 = vst [vmem:[#allocation2 + $0x48] sm:$0x3] %v2873_v1  ;;  %2529 = vmatprep.subr.bf16.mxu1 %v2803_v4  ;;  %v2808_v9 = vld [vmem:[%s3711_s1 + $0x58] sm:$0xff]   ;;  %v2810_v11 = vld [vmem:[%s3711_s1 + $0x50] sm:$0xff]  }
   0x6   :  { %32 = vst [vmem:[#allocation2 + $0x50] sm:$0xff] %v2873_v1  ;;  %33 = vst [vmem:[#allocation2 + $0x58] sm:$0x3] %v2873_v1  ;;  %v2809_v10 = vld [vmem:[%s3711_s1 + $0x18] sm:$0xff]   ;;  %v2811_v12 = vld [vmem:[%s3711_s1 + $0x10] sm:$0xff]  }
   0x7   :  { %34 = vst [vmem:[#allocation2 + $0x60] sm:$0xff] %v2873_v1  ;;  %35 = vst [vmem:[#allocation2 + $0x68] sm:$0x3] %v2873_v1  ;;  %2498 = vmatpush3.bf16.msra.mxu0 %v2802_v3  ;;  %v2978_v13 = vld [vmem:[%s3712_s0] sm:$0xff]  ;;  %v2983_v15 = vld [vmem:[%s3712_s0 + $0x8] sm:$0xff] }
   0x8   :  { %36 = vst [vmem:[#allocation2 + $0x70] sm:$0xff] %v2873_v1  ;;  %37 = vst [vmem:[#allocation2 + $0x78] sm:$0x3] %v2873_v1  ;;  %2530 = vmatpush3.bf16.msra.mxu1 %v2803_v4  ;;  %2499 = vmatprep.subr.bf16.mxu0 %v2804_v5  ;;  %v135_v14 = vld [vmem:[#allocation2 + $0x1] sm:$0xff]  ;;  %v2990_v17 = vld [vmem:[%s3712_s0 + $0x10] sm:$0xff]  ;;  %v886_v18 = vpack.c.bf16 %v2983_v15, %v2978_v13 }
   0x9   :  { %38 = vst [vmem:[#allocation2 + $0x80] sm:$0xff] %v2873_v1  ;;  %39 = vst [vmem:[#allocation2 + $0x88] sm:$0x3] %v2873_v1  ;;  %2531 = vmatprep.subr.bf16.mxu1 %v2805_v6  ;;  %v151_v16 = vpack.c.bf16 %v2978_v13, %v135_v14  ;;  %v2812_v19 = vld [vmem:[%s3711_s1 + $0x48] sm:$0xff]   ;;  %v3005_v21 = vld [vmem:[%s3712_s0 + $0x18] sm:$0xff]  ;;  %v3072_v39 = vpack.c.bf16 %v2990_v17, %v2983_v15 }
   0xa   :  { %40 = vst [vmem:[#allocation2 + $0x90] sm:$0xff] %v2873_v1  ;;  %41 = vst [vmem:[#allocation2 + $0x98] sm:$0x3] %v2873_v1  ;;  %v2813_v20 = vld [vmem:[%s3711_s1 + $0x8] sm:$0xff]   ;;  %v3010_v22 = vld [vmem:[%s3712_s0 + $0x20] sm:$0xff]  ;;  %v887_v25 = vpack.c.bf16 %v3005_v21, %v2990_v17 }
   0xb   :  { %42 = vst [vmem:[#allocation2 + $0xa0] sm:$0xff] %v2873_v1  ;;  %43 = vst [vmem:[#allocation2 + $0xa8] sm:$0x3] %v2873_v1  ;;  %2500 = vmatpush3.bf16.msra.mxu0 %v2804_v5  ;;  %2511 = vmatprep.mubr.bf16.mxu0 %v151_v16  ;;  %v3017_v23 = vld [vmem:[%s3712_s0 + $0x28] sm:$0xff]  ;;  %v3022_v24 = vld [vmem:[%s3712_s0 + $0x30] sm:$0xff]  ;;  %v3090_v45 = vpack.c.bf16 %v3010_v22, %v3005_v21 }
   0xc   :  { %44 = vst [vmem:[#allocation2 + $0xb0] sm:$0xff] %v2873_v1  ;;  %45 = vst [vmem:[#allocation2 + $0xb8] sm:$0x3] %v2873_v1  ;;  %2532 = vmatpush3.bf16.msra.mxu1 %v2805_v6  ;;  %2501 = vmatprep.subr.bf16.mxu0 %v2806_v7  ;;  %v888_v26 = vpack.c.bf16 %v3017_v23, %v3010_v22  ;;  %v2814_v27 = vld [vmem:[%s3711_s1 + $0x40] sm:$0xff]   ;;  %v2816_v31 = vld [vmem:[%s3711_s1 + $0xb8] sm:$0xff]   ;;  %v3140_v57 = vpack.c.bf16 %v3022_v24, %v3017_v23 }
   0xd   :  { %46 = vst [vmem:[#allocation2 + $0xc0] sm:$0xff] %v2873_v1  ;;  %47 = vst [vmem:[#allocation2 + $0xc8] sm:$0x3] %v2873_v1  ;;  %2533 = vmatprep.subr.bf16.mxu1 %v2807_v8  ;;  %v2815_v29 = vld [vmem:[%s3711_s1] sm:$0xff]   ;;  %v3056_v35 = vld [vmem:[%s3712_s0 + $0x48] sm:$0xff] }
   0xe   :  { %48 = vst [vmem:[#allocation2 + $0xd0] sm:$0xff] %v2873_v1  ;;  %49 = vst [vmem:[#allocation2 + $0xd8] sm:$0x3] %v2873_v1  ;;  %v3048_v33 = vld [vmem:[%s3712_s0 + $0x40] sm:$0xff]  ;;  %v3061_v36 = vld [vmem:[%s3712_s0 + $0x50] sm:$0xff] }
   0xf   :  { %50 = vst [vmem:[#allocation2 + $0xe0] sm:$0xff] %v2873_v1  ;;  %51 = vst [vmem:[#allocation2 + $0xe8] sm:$0x3] %v2873_v1  ;;  %2502 = vmatpush3.bf16.msra.mxu0 %v2806_v7  ;;  %v2817_v37 = vld [vmem:[%s3711_s1 + $0xf8] sm:$0xff]   ;;  %v890_v38 = vpack.c.bf16 %v3056_v35, %v3048_v33  ;;  %v2818_v43 = vld [vmem:[%s3711_s1 + $0xb0] sm:$0xff]  }
  0x10   :  { %52 = vst [vmem:[#allocation2 + $0xf0] sm:$0xff] %v2873_v1  ;;  %53 = vst [vmem:[#allocation2 + $0xf8] sm:$0x3] %v2873_v1  ;;  %2534 = vmatpush3.bf16.msra.mxu1 %v2807_v8  ;;  %2503 = vmatprep.subr.bf16.mxu0 %v2808_v9  ;;  %v2819_v44 = vld [vmem:[%s3711_s1 + $0xf0] sm:$0xff]   ;;  %v3100_v47 = vld [vmem:[%s3712_s0 + $0x58] sm:$0xff] }
  0x11   :  { %54 = vst [vmem:[#allocation2 + $0x100] sm:$0xff] %v2873_v1  ;;  %55 = vst [vmem:[#allocation2 + $0x108] sm:$0x3] %v2873_v1  ;;  %2535 = vmatprep.subr.bf16.mxu1 %v2809_v10  ;;  %v3105_v48 = vld [vmem:[%s3712_s0 + $0x60] sm:$0xff]  ;;  %v2820_v49 = vld [vmem:[%s3711_s1 + $0xa8] sm:$0xff]   ;;  %v891_v52 = vpack.c.bf16 %v3100_v47, %v3061_v36 }
  0x12   :  { %56 = vst [vmem:[#allocation2 + $0x110] sm:$0xff] %v2873_v1  ;;  %57 = vst [vmem:[#allocation2 + $0x118] sm:$0x3] %v2873_v1  ;;  %v3116_v50 = vld [vmem:[%s3712_s0 + $0x68] sm:$0xff]  ;;  %v3121_v51 = vld [vmem:[%s3712_s0 + $0x70] sm:$0xff] }
  0x13   :  { %58 = vst [vmem:[#allocation2 + $0x120] sm:$0xff] %v2873_v1  ;;  %59 = vst [vmem:[#allocation2 + $0x128] sm:$0x3] %v2873_v1  ;;  %2504 = vmatpush3.bf16.msra.mxu0 %v2808_v9  ;;  %v2821_v56 = vld [vmem:[%s3711_s1 + $0xe8] sm:$0xff]   ;;  %v2822_v61 = vld [vmem:[%s3711_s1 + $0xa0] sm:$0xff]  }
  0x14   :  { %60 = vst [vmem:[#allocation2 + $0x130] sm:$0xff] %v2873_v1  ;;  %61 = vst [vmem:[#allocation2 + $0x138] sm:$0x3] %v2873_v1  ;;  %2536 = vmatpush3.bf16.msra.mxu1 %v2809_v10  ;;  %2505 = vmatprep.subr.bf16.mxu0 %v2810_v11  ;;  %v143_v58 = vld [vmem:[#allocation2 + $0xa1] sm:$0xff]  ;;  %v2824_v3 = vld [vmem:[%s3711_s1 + $0x98] sm:$0xff]  }
  0x15   :  { %79 = vst [vmem:[#allocation2 + $0x11] sm:$0xff] %v2978_v13  ;;  %80 = vst [vmem:[#allocation2 + $0x21] sm:$0xff] %v2983_v15  ;;  %2537 = vmatprep.subr.bf16.mxu1 %v2811_v12  ;;  %v2823_v62 = vld [vmem:[%s3711_s1 + $0xe0] sm:$0xff]   ;;  %v155_v63 = vpack.c.bf16 %v3048_v33, %v143_v58  ;;  %v2825_v5 = vld [vmem:[%s3711_s1 + $0xd8] sm:$0xff]  }
  0x16   :  { %81 = vst [vmem:[#allocation2 + $0x31] sm:$0xff] %v2990_v17  ;;  %82 = vst [vmem:[#allocation2 + $0x41] sm:$0xff] %v3005_v21  ;;  %v2826_v9 = vld [vmem:[%s3711_s1 + $0x90] sm:$0xff]   ;;  %v3187_v10 = vld [vmem:[%s3712_s0 + $0x38] sm:$0xff] }
  0x17   :  { %83 = vst [vmem:[#allocation2 + $0x51] sm:$0xff] %v3010_v22  ;;  %2506 = vmatpush3.bf16.msra.mxu0 %v2810_v11  ;;  %84 = vst [vmem:[#allocation2 + $0x61] sm:$0xff] %v3017_v23  ;;  %v2827_v11 = vld [vmem:[%s3711_s1 + $0xd0] sm:$0xff]   ;;  %v2828_v16 = vld [vmem:[%s3711_s1 + $0x88] sm:$0xff]   ;;  %v889_v21 = vpack.c.bf16 %v3187_v10, %v3022_v24 }
  0x18   :  { %85 = vst [vmem:[#allocation2 + $0x71] sm:$0xff] %v3022_v24  ;;  %2538 = vmatpush3.bf16.msra.mxu1 %v2811_v12  ;;  %2507 = vmatprep.subr.bf16.mxu0 %v2812_v19  ;;  %87 = vst [vmem:[#allocation2 + $0xb1] sm:$0xff] %v3048_v33  ;;  %v3194_v12 = vpack.c.bf16 %v3105_v48, %v3100_v47  ;;  %v2851_v13 = vld [vmem:[%s3711_s1 + $0x1f0] sm:$0xff]   ;;  %v2853_v17 = vld [vmem:[%s3711_s1 + $0x1e8] sm:$0xff]  }
  0x19   :  { %2539 = vmatprep.subr.bf16.mxu1 %v2813_v20  ;;  %88 = vst [vmem:[#allocation2 + $0xc1] sm:$0xff] %v3056_v35  ;;  %89 = vst [vmem:[#allocation2 + $0xd1] sm:$0xff] %v3061_v36  ;;  %v2855_v22 = vld [vmem:[%s3711_s1 + $0x1e0] sm:$0xff]   ;;  %v2856_v24 = vld [vmem:[%s3711_s1 + $0x198] sm:$0xff]  }
  0x1a   :  { %90 = vst [vmem:[#allocation2 + $0xe1] sm:$0xff] %v3100_v47  ;;  %91 = vst [vmem:[#allocation2 + $0xf1] sm:$0xff] %v3105_v48  ;;  %v2859_v33 = vld [vmem:[%s3711_s1 + $0x1d0] sm:$0xff]  }
  0x1b   :  { %2508 = vmatpush3.bf16.msra.mxu0 %v2812_v19  ;;  %92 = vst [vmem:[#allocation2 + $0x101] sm:$0xff] %v3116_v50  ;;  %93 = vst [vmem:[#allocation2 + $0x111] sm:$0xff] %v3121_v51 }
  0x1c   :  { %v3033_v28 = vld [vmem:[#allocation2 + $0x10] sm:$0xff]  ;;  %v3043_v32 = vld [vmem:[#allocation2 + $0x20] sm:$0xff]  ;;  %2540 = vmatpush3.bf16.msra.mxu1 %v2813_v20  ;;  %2509 = vmatprep.subr.bf16.mxu0 %v2814_v27  ;;  %86 = vst [vmem:[#allocation2 + $0x81] sm:$0xff] %v3187_v10 }
  0x1d   :  { %v111_v30 = vpack.c.bf16 %v3033_v28, %v2873_v1  ;;  %v3050_v34 = vld [vmem:[#allocation2 + $0x30] sm:$0xff]  ;;  %2541 = vmatprep.subr.bf16.mxu1 %v2815_v29  ;;  %v3074_v40 = vld [vmem:[#allocation2 + $0x40] sm:$0xff] }
  0x1e   :  { %v3078_v41 = vpack.c.bf16 %v3050_v34, %v3043_v32  ;;  %v3080_v42 = vld [vmem:[#allocation2 + $0x50] sm:$0xff]  ;;  %v3125_v53 = vld [vmem:[#allocation2 + $0x60] sm:$0xff] }
  0x1f   :  { %2543 = vmatprep.mubr.bf16.mxu1 %v111_v30  ;;  %2510 = vmatpush3.bf16.msra.mxu0 %v2814_v27  ;;  %v3095_v46 = vpack.c.bf16 %v3080_v42, %v3074_v40  ;;  %v3127_v54 = vld [vmem:[#allocation2 + $0x70] sm:$0xff]  ;;  %v2829_v27 = vld [vmem:[%s3711_s1 + $0xc8] sm:$0xff]   ;;  %v3217_v30 = vpack.c.bf16 %v3121_v51, %v3116_v50 }
  0x20   :  { %2542 = vmatpush3.bf16.msra.mxu1 %v2815_v29  ;;  %2559 = vmatprep.subr.bf16.mxu0 %v2816_v31  ;;  %v3144_v59 = vpack.c.bf16 %v3127_v54, %v3125_v53  ;;  %v3146_v60 = vld [vmem:[#allocation2 + $0xb0] sm:$0xff]  ;;  %v3159_v2 = vld [vmem:[#allocation2 + $0xc0] sm:$0xff] }
  0x21   :  { %2591 = vmatprep.subr.bf16.mxu1 %v2817_v37  ;;  %v115_v0 = vpack.c.bf16 %v3146_v60, %v2873_v1  ;;  %v3164_v4 = vld [vmem:[#allocation2 + $0xd0] sm:$0xff]  ;;  %v3171_v1 = vpack.c.bf16 %v3061_v36, %v3056_v35  ;;  %v3177_v7 = vld [vmem:[#allocation2 + $0xe0] sm:$0xff]  ;;  %v2861_v36 = vld [vmem:[%s3711_s1 + $0x1c8] sm:$0xff]  }
  0x22   :  { %2512 = vmatmul.mubr.bf16.vlgmr.msra.gmra.mxu0 %v3072_v39  ;;  %v3175_v6 = vpack.c.bf16 %v3164_v4, %v3159_v2  ;;  %v3179_v8 = vld [vmem:[#allocation2 + $0xf0] sm:$0xff]  ;;  %v3206_v19 = vld [vmem:[#allocation2 + $0x100] sm:$0xff] }
  0x23   :  { %2544 = vmatmul.mubr.bf16.vlgmr.msra.gmra.mxu1 %v3078_v41  ;;  %2560 = vmatpush3.bf16.msra.mxu0 %v2816_v31  ;;  %v3200_v14 = vpack.c.bf16 %v3179_v8, %v3177_v7  ;;  %v3208_v20 = vld [vmem:[#allocation2 + $0x110] sm:$0xff]  ;;  %v466_v29 = vld [vmem:[#allocation2 + $0x2] sm:$0xff] }
  0x24   :  { %2592 = vmatpush3.bf16.msra.mxu1 %v2817_v37  ;;  %2561 = vmatprep.subr.bf16.mxu0 %v2818_v43  ;;  %v3219_v31 = vld [vmem:[#allocation2 + $0x12] sm:$0xff]  ;;  %v3223_v37 = vpack.c.bf16 %v3208_v20, %v3206_v19  ;;  %v3235_v58 = vld [vmem:[#allocation2 + $0x22] sm:$0xff] }
  0x25   :  { %2593 = vmatprep.subr.bf16.mxu1 %v2819_v44  ;;  %2515 = vmatprep.mubr.bf16.mxu0 %v3090_v45  ;;  %v3316_v55 = vld [vmem:[#allocation2 + $0xe2] sm:$0xff] }
  0x26   :  { %2547 = vmatprep.mubr.bf16.mxu1 %v3095_v46 }
  0x27   :  { %2562 = vmatpush3.bf16.msra.mxu0 %v2818_v43  ;;  %v2830_v43 = vld [vmem:[%s3711_s1 + $0x80] sm:$0xff]  }
  0x28   :  { %2594 = vmatpush3.bf16.msra.mxu1 %v2819_v44  ;;  %2563 = vmatprep.subr.bf16.mxu0 %v2820_v49  ;;  %v2831_v44 = vld [vmem:[%s3711_s1 + $0xc0] sm:$0xff]  }
  0x29   :  { %2595 = vmatprep.subr.bf16.mxu1 %v2821_v56 }
  0x2a   :  { %2516 = vmatmul.mubr.bf16.gmra.mxu0 %v3140_v57 }
  0x2b   :  { %2548 = vmatmul.mubr.bf16.gmra.mxu1 %v3144_v59  ;;  %2564 = vmatpush3.bf16.msra.mxu0 %v2820_v49  ;;  %v482_v49 = vpack.c.bf16 %v3219_v31, %v466_v29  ;;  %v3279_v29 = vld [vmem:[#allocation2 + $0x80] sm:$0xff] }
  0x2c   :  { %2596 = vmatpush3.bf16.msra.mxu1 %v2821_v56  ;;  %2565 = vmatprep.subr.bf16.mxu0 %v2822_v61  ;;  %v684_v56 = vpack.c.bf16 %v3043_v32, %v3033_v28  ;;  %v3249_v28 = vld [vmem:[%s3712_s0 + $0x78] sm:$0xff]  ;;  %v3251_v32 = vld [vmem:[#allocation2 + $0x42] sm:$0xff] }
  0x2d   :  { %2597 = vmatprep.subr.bf16.mxu1 %v2823_v62  ;;  %2519 = vmatprep.mubr.bf16.mxu0 %v155_v63  ;;  %v2833_v63 = vld [vmem:[%s3711_s1 + $0x178] sm:$0xff]   ;;  %94 = vst [vmem:[#allocation2 + $0x121] sm:$0xff] %v3249_v28  ;;  %v893_v47 = vpack.c.bf16 %v3249_v28, %v3121_v51  ;;  %v2865_v51 = vld [vmem:[%s3711_s1 + $0x230] sm:$0xff]  }
  0x2e   :  { %2551 = vmatprep.mubr.bf16.mxu1 %v115_v0 }
  0x2f   :  { %2566 = vmatpush3.bf16.msra.mxu0 %v2822_v61  ;;  %v3238_v61 = vld [vmem:[#allocation2 + $0x32] sm:$0xff] }
  0x30   :  { %2598 = vmatpush3.bf16.msra.mxu1 %v2823_v62  ;;  %2567 = vmatprep.subr.bf16.mxu0 %v2824_v3  ;;  %v2832_v62 = vld [vmem:[%s3711_s1 + $0x138] sm:$0xff]   ;;  %v3256_v0 = vpack.c.bf16 %v3238_v61, %v3235_v58 }
  0x31   :  { %2599 = vmatprep.subr.bf16.mxu1 %v2825_v5 }
  0x32   :  { %2520 = vmatmul.mubr.bf16.gmra.mxu0 %v3171_v1 }
  0x33   :  { %2552 = vmatmul.mubr.bf16.gmra.mxu1 %v3175_v6  ;;  %2568 = vmatpush3.bf16.msra.mxu0 %v2824_v3  ;;  %v3258_v3 = vld [vmem:[#allocation2 + $0x52] sm:$0xff] }
  0x34   :  { %2600 = vmatpush3.bf16.msra.mxu1 %v2825_v5  ;;  %2569 = vmatprep.subr.bf16.mxu0 %v2826_v9  ;;  %v685_v5 = vpack.c.bf16 %v3074_v40, %v3050_v34  ;;  %v686_v34 = vpack.c.bf16 %v3125_v53, %v3080_v42  ;;  %v3275_v40 = vld [vmem:[#allocation2 + $0x62] sm:$0xff] }
  0x35   :  { %2601 = vmatprep.subr.bf16.mxu1 %v2827_v11  ;;  %2523 = vmatprep.mubr.bf16.mxu0 %v3194_v12  ;;  %v474_v42 = vld [vmem:[#allocation2 + $0xa2] sm:$0xff]  ;;  %v1090_v15 = vpack.c.bf16 %v3275_v40, %v3258_v3 }
  0x36   :  { %2555 = vmatprep.mubr.bf16.mxu1 %v3200_v14 }
  0x37   :  { %2570 = vmatpush3.bf16.msra.mxu0 %v2826_v9  ;;  %v2834_v9 = vld [vmem:[%s3711_s1 + $0x130] sm:$0xff]  }
  0x38   :  { %2602 = vmatpush3.bf16.msra.mxu1 %v2827_v11  ;;  %2571 = vmatprep.subr.bf16.mxu0 %v2828_v16  ;;  %v2835_v11 = vld [vmem:[%s3711_s1 + $0x170] sm:$0xff]  }
  0x39   :  { %2603 = vmatprep.subr.bf16.mxu1 %v2829_v27 }
  0x3a   :  { %2524 = vmatmul.mubr.bf16.gmra.mxu0 %v3217_v30 }
  0x3b   :  { %2556 = vmatmul.mubr.bf16.gmra.mxu1 %v3223_v37  ;;  %2572 = vmatpush3.bf16.msra.mxu0 %v2828_v16  ;;  %v3270_v16 = vpack.c.bf16 %v3258_v3, %v3251_v32 }
  0x3c   :  { %2604 = vmatpush3.bf16.msra.mxu1 %v2829_v27  ;;  %2573 = vmatprep.subr.bf16.mxu0 %v2830_v43  ;;  %v3277_v27 = vld [vmem:[#allocation2 + $0x72] sm:$0xff] }
  0x3d   :  { %2605 = vmatprep.subr.bf16.mxu1 %v2831_v44  ;;  %2575 = vmatprep.mubr.bf16.mxu0 %v482_v49  ;;  %v3290_v53 = vpack.c.bf16 %v3277_v27, %v3275_v40  ;;  %v3292_v49 = vld [vmem:[#allocation2 + $0xb2] sm:$0xff] }
  0x3e   :  { %2607 = vmatprep.mubr.bf16.mxu1 %v684_v56  ;;  %v687_v56 = vpack.c.bf16 %v3279_v29, %v3127_v54  ;;  %v688_v54 = vpack.c.bf16 %v3159_v2, %v3146_v60  ;;  %v3322_v2 = vld [vmem:[#allocation2 + $0xf2] sm:$0xff] }
  0x3f   :  { %2574 = vmatpush3.bf16.msra.mxu0 %v2830_v43  ;;  %v2836_v43 = vld [vmem:[%s3711_s1 + $0x128] sm:$0xff]   ;;  %v2858_v40 = vld [vmem:[%s3711_s1 + $0x190] sm:$0xff]  }
  0x40   :  { %2606 = vmatpush3.bf16.msra.mxu1 %v2831_v44  ;;  %2623 = vmatprep.subr.bf16.mxu0 %v2832_v62  ;;  %v2837_v44 = vld [vmem:[%s3711_s1 + $0x168] sm:$0xff]  }
  0x41   :  { %2655 = vmatprep.subr.bf16.mxu1 %v2833_v63 }
  0x42   :  { %2576 = vmatmul.mubr.bf16.vlgmr.msra.gmra.mxu0 %v3256_v0 }
  0x43   :  { %2608 = vmatmul.mubr.bf16.vlgmr.msra.gmra.mxu1 %v685_v5  ;;  %2624 = vmatpush3.bf16.msra.mxu0 %v2832_v62  ;;  %v2838_v62 = vld [vmem:[%s3711_s1 + $0x120] sm:$0xff]   ;;  %v486_v5 = vpack.c.bf16 %v3292_v49, %v474_v42  ;;  %v2841_v42 = vld [vmem:[%s3711_s1 + $0x158] sm:$0xff]  }
  0x44   :  { %2656 = vmatpush3.bf16.msra.mxu1 %v2833_v63  ;;  %2625 = vmatprep.subr.bf16.mxu0 %v2834_v9  ;;  %v2839_v63 = vld [vmem:[%s3711_s1 + $0x160] sm:$0xff]  }
  0x45   :  { %2657 = vmatprep.subr.bf16.mxu1 %v2835_v11  ;;  %2579 = vmatprep.mubr.bf16.mxu0 %v3270_v16 }
  0x46   :  { %2611 = vmatprep.mubr.bf16.mxu1 %v686_v34  ;;  %v3303_v34 = vld [vmem:[#allocation2 + $0xc2] sm:$0xff] }
  0x47   :  { %2626 = vmatpush3.bf16.msra.mxu0 %v2834_v9  ;;  %v3308_v9 = vld [vmem:[#allocation2 + $0xd2] sm:$0xff]  ;;  %v1092_v23 = vpack.c.bf16 %v3303_v34, %v3292_v49  ;;  %v2862_v49 = vld [vmem:[%s3711_s1 + $0x180] sm:$0xff]  }
  0x48   :  { %2658 = vmatpush3.bf16.msra.mxu1 %v2835_v11  ;;  %2627 = vmatprep.subr.bf16.mxu0 %v2836_v43  ;;  %v2840_v11 = vld [vmem:[%s3711_s1 + $0x118] sm:$0xff]   ;;  %v3320_v60 = vpack.c.bf16 %v3308_v9, %v3303_v34  ;;  %v1093_v3 = vpack.c.bf16 %v3316_v55, %v3308_v9  ;;  %v2867_v9 = vld [vmem:[%s3711_s1 + $0x220] sm:$0xff]  }
  0x49   :  { %2659 = vmatprep.subr.bf16.mxu1 %v2837_v44  ;;  %v1484_v34 = vld [vmem:[#allocation2 + $0x91] sm:$0xff] }
  0x4a   :  { %2580 = vmatmul.mubr.bf16.gmra.mxu0 %v3290_v53 }
  0x4b   :  { %2612 = vmatmul.mubr.bf16.gmra.mxu1 %v687_v56  ;;  %2628 = vmatpush3.bf16.msra.mxu0 %v2836_v43  ;;  %v689_v43 = vpack.c.bf16 %v3177_v7, %v3164_v4  ;;  %v2843_v56 = vld [vmem:[%s3711_s1 + $0x150] sm:$0xff]   ;;  %v690_v4 = vpack.c.bf16 %v3206_v19, %v3179_v8  ;;  %v3339_v7 = vld [vmem:[#allocation2 + $0x102] sm:$0xff] }
  0x4c   :  { %2660 = vmatpush3.bf16.msra.mxu1 %v2837_v44  ;;  %2629 = vmatprep.subr.bf16.mxu0 %v2838_v62  ;;  %v2842_v44 = vld [vmem:[%s3711_s1 + $0x110] sm:$0xff]   ;;  %v2845_v8 = vld [vmem:[%s3711_s1 + $0x148] sm:$0xff]   ;;  %v1094_v35 = vpack.c.bf16 %v3339_v7, %v3322_v2 }
  0x4d   :  { %2661 = vmatprep.subr.bf16.mxu1 %v2839_v63  ;;  %2583 = vmatprep.mubr.bf16.mxu0 %v486_v5  ;;  %v3334_v5 = vpack.c.bf16 %v3322_v2, %v3316_v55  ;;  %v2860_v55 = vld [vmem:[%s3711_s1 + $0x188] sm:$0xff]  }
  0x4e   :  { %2615 = vmatprep.mubr.bf16.mxu1 %v688_v54  ;;  %v3346_v54 = vld [vmem:[#allocation2 + $0x120] sm:$0xff] }
  0x4f   :  { %2630 = vmatpush3.bf16.msra.mxu0 %v2838_v62  ;;  %v3341_v62 = vld [vmem:[#allocation2 + $0x112] sm:$0xff] }
  0x50   :  { %2662 = vmatpush3.bf16.msra.mxu1 %v2839_v63  ;;  %2631 = vmatprep.subr.bf16.mxu0 %v2840_v11  ;;  %v2844_v63 = vld [vmem:[%s3711_s1 + $0x108] sm:$0xff]   ;;  %v3354_v19 = vpack.c.bf16 %v3341_v62, %v3339_v7 }
  0x51   :  { %2663 = vmatprep.subr.bf16.mxu1 %v2841_v42 }
  0x52   :  { %2584 = vmatmul.mubr.bf16.gmra.mxu0 %v3320_v60 }
  0x53   :  { %2616 = vmatmul.mubr.bf16.gmra.mxu1 %v689_v43  ;;  %2632 = vmatpush3.bf16.msra.mxu0 %v2840_v11  ;;  %v691_v11 = vpack.c.bf16 %v3346_v54, %v3208_v20  ;;  %v2847_v43 = vld [vmem:[%s3711_s1 + $0x140] sm:$0xff]   ;;  %v2848_v20 = vld [vmem:[%s3711_s1 + $0x1b8] sm:$0xff]  }
  0x54   :  { %2664 = vmatpush3.bf16.msra.mxu1 %v2841_v42  ;;  %2633 = vmatprep.subr.bf16.mxu0 %v2842_v44  ;;  %v2846_v42 = vld [vmem:[%s3711_s1 + $0x100] sm:$0xff]  }
  0x55   :  { %2665 = vmatprep.subr.bf16.mxu1 %v2843_v56  ;;  %2587 = vmatprep.mubr.bf16.mxu0 %v3334_v5 }
  0x56   :  { %2619 = vmatprep.mubr.bf16.mxu1 %v690_v4  ;;  %v1088_v4 = vpack.c.bf16 %v3235_v58, %v3219_v31  ;;  %v1089_v31 = vpack.c.bf16 %v3251_v32, %v3238_v61  ;;  %v2850_v58 = vld [vmem:[%s3711_s1 + $0x1b0] sm:$0xff]   ;;  %v2852_v61 = vld [vmem:[%s3711_s1 + $0x1a8] sm:$0xff]   ;;  %v2854_v32 = vld [vmem:[%s3711_s1 + $0x1a0] sm:$0xff]  }
  0x57   :  { %2634 = vmatpush3.bf16.msra.mxu0 %v2842_v44  ;;  %v2849_v44 = vld [vmem:[%s3711_s1 + $0x1f8] sm:$0xff]  }
  0x58   :  { %2666 = vmatpush3.bf16.msra.mxu1 %v2843_v56  ;;  %2635 = vmatprep.subr.bf16.mxu0 %v2844_v63 }
  0x59   :  { %2667 = vmatprep.subr.bf16.mxu1 %v2845_v8 }
  0x5a   :  { %2588 = vmatmul.mubr.bf16.gmra.mxu0 %v3354_v19 }
  0x5b   :  { %2620 = vmatmul.mubr.bf16.gmra.mxu1 %v691_v11  ;;  %2636 = vmatpush3.bf16.msra.mxu0 %v2844_v63 }
  0x5c   :  { %2668 = vmatpush3.bf16.msra.mxu1 %v2845_v8  ;;  %2637 = vmatprep.subr.bf16.mxu0 %v2846_v42 }
  0x5d   :  { %2669 = vmatprep.subr.bf16.mxu1 %v2847_v43  ;;  %2639 = vmatprep.mubr.bf16.mxu0 %v886_v18  ;;  %v3389_v18 = vld [vmem:[#allocation2 + $0x82] sm:$0xff] }
  0x5e   :  { %2671 = vmatprep.mubr.bf16.mxu1 %v1088_v4 }
  0x5f   :  { %2638 = vmatpush3.bf16.msra.mxu0 %v2846_v42 }
  0x60   :  { %2670 = vmatpush3.bf16.msra.mxu1 %v2847_v43  ;;  %2687 = vmatprep.subr.bf16.mxu0 %v2848_v20 }
  0x61   :  { %2719 = vmatprep.subr.bf16.mxu1 %v2849_v44 }
  0x62   :  { %2640 = vmatmul.mubr.bf16.vlgmr.msra.gmra.mxu0 %v887_v25  ;;  %v1091_v25 = vpack.c.bf16 %v3389_v18, %v3277_v27  ;;  %v3716_v27 = vpack.c.bf16 %v3116_v50, %v3105_v48  ;;  %v2863_v48 = vld [vmem:[%s3711_s1 + $0x1c0] sm:$0xff]   ;;  %v2864_v50 = vld [vmem:[%s3711_s1 + $0x238] sm:$0xff]  }
  0x63   :  { %2672 = vmatmul.mubr.bf16.vlgmr.msra.gmra.mxu1 %v1089_v31  ;;  %2688 = vmatpush3.bf16.msra.mxu0 %v2848_v20 }
  0x64   :  { %2720 = vmatpush3.bf16.msra.mxu1 %v2849_v44  ;;  %2689 = vmatprep.subr.bf16.mxu0 %v2850_v58 }
  0x65   :  { %2721 = vmatprep.subr.bf16.mxu1 %v2851_v13  ;;  %2643 = vmatprep.mubr.bf16.mxu0 %v888_v26  ;;  %v2857_v26 = vld [vmem:[%s3711_s1 + $0x1d8] sm:$0xff]  }
  0x66   :  { %2675 = vmatprep.mubr.bf16.mxu1 %v1090_v15 }
  0x67   :  { %2690 = vmatpush3.bf16.msra.mxu0 %v2850_v58 }
  0x68   :  { %2722 = vmatpush3.bf16.msra.mxu1 %v2851_v13  ;;  %2691 = vmatprep.subr.bf16.mxu0 %v2852_v61 }
  0x69   :  { %2723 = vmatprep.subr.bf16.mxu1 %v2853_v17 }
  0x6a   :  { %2644 = vmatmul.mubr.bf16.gmra.mxu0 %v889_v21 }
  0x6b   :  { %2676 = vmatmul.mubr.bf16.gmra.mxu1 %v1091_v25  ;;  %2692 = vmatpush3.bf16.msra.mxu0 %v2852_v61 }
  0x6c   :  { %2724 = vmatpush3.bf16.msra.mxu1 %v2853_v17  ;;  %2693 = vmatprep.subr.bf16.mxu0 %v2854_v32 }
  0x6d   :  { %2725 = vmatprep.subr.bf16.mxu1 %v2855_v22  ;;  %2647 = vmatprep.mubr.bf16.mxu0 %v890_v38  ;;  %v3434_v38 = vld [vmem:[#allocation2 + $0x122] sm:$0xff] }
  0x6e   :  { %2679 = vmatprep.mubr.bf16.mxu1 %v1092_v23 }
  0x6f   :  { %2694 = vmatpush3.bf16.msra.mxu0 %v2854_v32 }
  0x70   :  { %2726 = vmatpush3.bf16.msra.mxu1 %v2855_v22  ;;  %2695 = vmatprep.subr.bf16.mxu0 %v2856_v24 }
  0x71   :  { %2727 = vmatprep.subr.bf16.mxu1 %v2857_v26 }
  0x72   :  { %2648 = vmatmul.mubr.bf16.gmra.mxu0 %v891_v52  ;;  %v1095_v52 = vpack.c.bf16 %v3434_v38, %v3341_v62 }
  0x73   :  { %2680 = vmatmul.mubr.bf16.gmra.mxu1 %v1093_v3  ;;  %2696 = vmatpush3.bf16.msra.mxu0 %v2856_v24 }
  0x74   :  { %2728 = vmatpush3.bf16.msra.mxu1 %v2857_v26  ;;  %2697 = vmatprep.subr.bf16.mxu0 %v2858_v40 }
  0x75   :  { %2729 = vmatprep.subr.bf16.mxu1 %v2859_v33  ;;  %2651 = vmatprep.mubr.bf16.mxu0 %v3716_v27 }
  0x76   :  { %2683 = vmatprep.mubr.bf16.mxu1 %v1094_v35 }
  0x77   :  { %2698 = vmatpush3.bf16.msra.mxu0 %v2858_v40 }
  0x78   :  { %2730 = vmatpush3.bf16.msra.mxu1 %v2859_v33  ;;  %2699 = vmatprep.subr.bf16.mxu0 %v2860_v55 }
  0x79   :  { %2731 = vmatprep.subr.bf16.mxu1 %v2861_v36 }
  0x7a   :  { %2652 = vmatmul.mubr.bf16.gmra.mxu0 %v893_v47 }
  0x7b   :  { %2684 = vmatmul.mubr.bf16.gmra.mxu1 %v1095_v52  ;;  %2700 = vmatpush3.bf16.msra.mxu0 %v2860_v55 }
  0x7c   :  { %2732 = vmatpush3.bf16.msra.mxu1 %v2861_v36  ;;  %2701 = vmatprep.subr.bf16.mxu0 %v2862_v49 }
  0x7d   :  { %2733 = vmatprep.subr.bf16.mxu1 %v2863_v48  ;;  %2703 = vmatprep.mubr.bf16.mxu0 %v3078_v41  ;;  %v3470_v41 = vld [vmem:[#allocation2] sm:$0xff] }
  0x7e   :  { %2735 = vmatprep.mubr.bf16.mxu1 %v3072_v39  ;;  %v2866_v39 = vld [vmem:[%s3711_s1 + $0x228] sm:$0xff]   ;;  %21 = vst [vmem:[%s3713_s4] sm:$0x3] %v3470_v41 }
  0x7f   :  { %2702 = vmatpush3.bf16.msra.mxu0 %v2862_v49 }
  0x80   :  { %2734 = vmatpush3.bf16.msra.mxu1 %v2863_v48  ;;  %2751 = vmatprep.subr.bf16.mxu0 %v2864_v50 }
  0x81   :  { %2783 = vmatprep.subr.bf16.mxu1 %v2864_v50 }
  0x82   :  { %2704 = vmatmul.mubr.bf16.vlgmr.msra.gmra.mxu0 %v3095_v46  ;;  %v1294_v46 = vpack.c.bf16 %v3470_v41, %v3279_v29 }
  0x83   :  { %2736 = vmatmul.mubr.bf16.vlgmr.msra.gmra.mxu1 %v3090_v45  ;;  %2752 = vmatpush3.bf16.msra.mxu0 %v2864_v50  ;;  %v1496_v45 = vpack.c.bf16 %v1484_v34, %v3187_v10  ;;  %v1492_v10 = vld [vmem:[#allocation2 + $0x131] sm:$0xff] }
  0x84   :  { %2791 = vmatpush3.bf16.msra.mxu1 %v2864_v50  ;;  %2753 = vmatprep.subr.bf16.mxu0 %v2865_v51 }
  0x85   :  { %2784 = vmatprep.subr.bf16.mxu1 %v2865_v51  ;;  %2707 = vmatprep.mubr.bf16.mxu0 %v3144_v59  ;;  %v2869_v59 = vld [vmem:[%s3711_s1 + $0x210] sm:$0xff]  }
  0x86   :  { %2739 = vmatprep.mubr.bf16.mxu1 %v3140_v57  ;;  %v2868_v57 = vld [vmem:[%s3711_s1 + $0x218] sm:$0xff]  }
  0x87   :  { %2754 = vmatpush3.bf16.msra.mxu0 %v2865_v51 }
  0x88   :  { %2792 = vmatpush3.bf16.msra.mxu1 %v2865_v51  ;;  %2755 = vmatprep.subr.bf16.mxu0 %v2866_v39 }
  0x89   :  { %2785 = vmatprep.subr.bf16.mxu1 %v2866_v39 }
  0x8a   :  { %2708 = vmatmul.mubr.bf16.gmra.mxu0 %v1294_v46 }
  0x8b   :  { %2740 = vmatmul.mubr.bf16.gmra.mxu1 %v1496_v45  ;;  %2756 = vmatpush3.bf16.msra.mxu0 %v2866_v39 }
  0x8c   :  { %2793 = vmatpush3.bf16.msra.mxu1 %v2866_v39  ;;  %2757 = vmatprep.subr.bf16.mxu0 %v2867_v9 }
  0x8d   :  { %2786 = vmatprep.subr.bf16.mxu1 %v2867_v9  ;;  %2711 = vmatprep.mubr.bf16.mxu0 %v3175_v6  ;;  %v1298_v6 = vpack.c.bf16 %v3470_v41, %v3346_v54 }
  0x8e   :  { %2743 = vmatprep.mubr.bf16.mxu1 %v3171_v1  ;;  %v2870_v1 = vld [vmem:[%s3711_s1 + $0x208] sm:$0xff]  }
  0x8f   :  { %2758 = vmatpush3.bf16.msra.mxu0 %v2867_v9 }
  0x90   :  { %2794 = vmatpush3.bf16.msra.mxu1 %v2867_v9  ;;  %2759 = vmatprep.subr.bf16.mxu0 %v2868_v57 }
  0x91   :  { %2787 = vmatprep.subr.bf16.mxu1 %v2868_v57 }
  0x92   :  { %2712 = vmatmul.mubr.bf16.gmra.mxu0 %v3200_v14  ;;  %v1500_v14 = vpack.c.bf16 %v1492_v10, %v3249_v28 }
  0x93   :  { %2744 = vmatmul.mubr.bf16.gmra.mxu1 %v3194_v12  ;;  %2760 = vmatpush3.bf16.msra.mxu0 %v2868_v57  ;;  %v2871_v12 = vld [vmem:[%s3711_s1 + $0x200] sm:$0xff]  }
  0x94   :  { %2795 = vmatpush3.bf16.msra.mxu1 %v2868_v57  ;;  %2761 = vmatprep.subr.bf16.mxu0 %v2869_v59 }
  0x95   :  { %2788 = vmatprep.subr.bf16.mxu1 %v2869_v59  ;;  %2715 = vmatprep.mubr.bf16.mxu0 %v3223_v37  ;;  %v1694_v37 = vld [vmem:[#allocation2 + $0x132] sm:$0xff] }
  0x96   :  { %2747 = vmatprep.mubr.bf16.mxu1 %v3217_v30  ;;  %v1686_v30 = vld [vmem:[#allocation2 + $0x92] sm:$0xff]  ;;  %v1702_v29 = vpack.c.bf16 %v1694_v37, %v3434_v38 }
  0x97   :  { %2762 = vmatpush3.bf16.msra.mxu0 %v2869_v59  ;;  %v1698_v28 = vpack.c.bf16 %v1686_v30, %v3389_v18 }
  0x98   :  { %2796 = vmatpush3.bf16.msra.mxu1 %v2869_v59  ;;  %2763 = vmatprep.subr.bf16.mxu0 %v2870_v1 }
  0x99   :  { %2789 = vmatprep.subr.bf16.mxu1 %v2870_v1 }
  0x9a   :  { %2716 = vmatmul.mubr.bf16.gmra.mxu0 %v1298_v6 }
  0x9b   :  { %2748 = vmatmul.mubr.bf16.gmra.mxu1 %v1500_v14  ;;  %2764 = vmatpush3.bf16.msra.mxu0 %v2870_v1 }
  0x9c   :  { %2797 = vmatpush3.bf16.msra.mxu1 %v2870_v1  ;;  %2765 = vmatprep.subr.bf16.mxu0 %v2871_v12 }
  0x9d   :  { %2790 = vmatprep.subr.bf16.mxu1 %v2871_v12  ;;  %2767 = vmatprep.mubr.bf16.mxu0 %v3256_v0 }
  0x9e   :  { %2775 = vmatprep.mubr.bf16.mxu1 %v3320_v60 }
  0x9f   :  { %2766 = vmatpush3.bf16.msra.mxu0 %v2871_v12 }
  0xa0   :  { %2798 = vmatpush3.bf16.msra.mxu1 %v2871_v12 }
  0xa2   :  { %2768 = vmatmul.mubr.bf16.vlgmr.msra.gmra.mxu0 %v3270_v16 }
  0xa3   :  { %2776 = vmatmul.mubr.bf16.vlgmr.msra.gmra.mxu1 %v3334_v5  ;;  %2771 = vmatprep.mubr.bf16.mxu0 %v3290_v53 }
  0xa4   :  { %2779 = vmatprep.mubr.bf16.mxu1 %v3354_v19 }
  0xaa   :  { %2772 = vmatmul.mubr.bf16.gmra.mxu0 %v1698_v28 }
  0xab   :  { %2780 = vmatmul.mubr.bf16.gmra.mxu1 %v1702_v29 }
  0xe2   :  { %v2513_v0 = vpop.f32.mrf.mxu0 }
  0xe3   :  { %v2545_v60 = vpop.f32.mrf.mxu1 }
  0xe4   :  { %v412_v2 = vadd.f32 %v2545_v60, %v2513_v0  ;;  %v258_v56 = vpop.f32.mrf.mxu0 }
  0xe5   :  { %v403_v7 = vpop.f32.mrf.mxu1 }
  0xe6   :  { %v404_v16 = vadd.f32 %v403_v7, %v258_v56  ;;  %v2514_v62 = vpop.f32.mrf.mxu0 }
  0xe7   :  { %v2546_v5 = vpop.f32.mrf.mxu1 }
  0xe8   :  { %v415_v63 = vadd.f32 %v2546_v5, %v2514_v62  ;;  %v261_v53 = vpop.f32.mrf.mxu0 }
  0xe9   :  { %v406_v54 = vpop.f32.mrf.mxu1 }
  0xea   :  { %v407_v8 = vadd.f32 %v406_v54, %v261_v53  ;;  %v2517_v19 = vpop.f32.mrf.mxu0 }
  0xeb   :  { %v2549_v11 = vpop.f32.mrf.mxu1 }
  0xec   :  { %v428_v42 = vadd.f32 %v2549_v11, %v2517_v19  ;;  %v274_v43 = vpop.f32.mrf.mxu0 }
  0xed   :  { %v419_v4 = vpop.f32.mrf.mxu1 }
  0xee   :  { %v420_v20 = vadd.f32 %v419_v4, %v274_v43  ;;  %v2518_v44 = vpop.f32.mrf.mxu0 }
  0xef   :  { %v2550_v31 = vpop.f32.mrf.mxu1 }
  0xf0   :  { %v431_v58 = vadd.f32 %v2550_v31, %v2518_v44  ;;  %v277_v13 = vpop.f32.mrf.mxu0 }
  0xf1   :  { %v422_v15 = vpop.f32.mrf.mxu1 }
  0xf2   :  { %v423_v18 = vadd.f32 %v422_v15, %v277_v13  ;;  %v2521_v61 = vpop.f32.mrf.mxu0 }
  0xf3   :  { %v2553_v17 = vpop.f32.mrf.mxu1 }
  0xf4   :  { %v444_v21 = vadd.f32 %v2553_v17, %v2521_v61  ;;  %v290_v25 = vpop.f32.mrf.mxu0 }
  0xf5   :  { %v435_v32 = vpop.f32.mrf.mxu1 }
  0xf6   :  { %v436_v22 = vadd.f32 %v435_v32, %v290_v25  ;;  %v2522_v23 = vpop.f32.mrf.mxu0 }
  0xf7   :  { %v2554_v24 = vpop.f32.mrf.mxu1 }
  0xf8   :  { %v447_v26 = vadd.f32 %v2554_v24, %v2522_v23  ;;  %v293_v3 = vpop.f32.mrf.mxu0 }
  0xf9   :  { %v438_v40 = vpop.f32.mrf.mxu1 }
  0xfa   :  { %v439_v33 = vadd.f32 %v438_v40, %v293_v3  ;;  %v2525_v35 = vpop.f32.mrf.mxu0 }
  0xfb   :  { %v2557_v38 = vpop.f32.mrf.mxu1 }
  0xfc   :  { %v460_v55 = vadd.f32 %v2557_v38, %v2525_v35  ;;  %v306_v27 = vpop.f32.mrf.mxu0 }
  0xfd   :  { %v451_v36 = vpop.f32.mrf.mxu1 }
  0xfe   :  { %v452_v47 = vadd.f32 %v451_v36, %v306_v27  ;;  %v2526_v52 = vpop.f32.mrf.mxu0 }
  0xff   :  { %v2558_v49 = vpop.f32.mrf.mxu1 }
 0x100   :  { %v3507_v48 = vadd.f32 %v2558_v49, %v2526_v52  ;;  %v309_v50 = vpop.f32.mrf.mxu0 }
 0x101   :  { %v454_v51 = vpop.f32.mrf.mxu1 }
 0x102   :  { %v3509_v34 = vadd.f32 %v454_v51, %v309_v50  ;;  %v2577_v39 = vpop.f32.mrf.mxu0 }
 0x103   :  { %v654_v46 = vadd.f32 %v2577_v39, %v412_v2  ;;  %v2609_v45 = vpop.f32.mrf.mxu1 }
 0x104   :  { %v589_v9 = vpop.f32.mrf.mxu0 }
 0x105   :  { %v3511_v57 = vadd.f32 %v2609_v45, %v654_v46  ;;  %v652_v59 = vadd.f32 %v589_v9, %v404_v16  ;;  %v791_v10 = vpop.f32.mrf.mxu1 }
 0x106   :  { %v2578_v1 = vpop.f32.mrf.mxu0 }
 0x107   :  { %v3513_v6 = vadd.f32 %v791_v10, %v652_v59  ;;  %v655_v14 = vadd.f32 %v2578_v1, %v415_v63  ;;  %v2610_v12 = vpop.f32.mrf.mxu1 }
 0x108   :  { %v592_v30 = vpop.f32.mrf.mxu0 }
 0x109   :  { %v3519_v37 = vadd.f32 %v2610_v12, %v655_v14  ;;  %v653_v28 = vadd.f32 %v592_v30, %v407_v8  ;;  %v794_v29 = vpop.f32.mrf.mxu1 }
 0x10a   :  { %v2581_v0 = vpop.f32.mrf.mxu0 }
 0x10b   :  { %v3521_v60 = vadd.f32 %v794_v29, %v653_v28  ;;  %v658_v2 = vadd.f32 %v2581_v0, %v428_v42  ;;  %v2613_v56 = vpop.f32.mrf.mxu1 }
 0x10c   :  { %v605_v7 = vpop.f32.mrf.mxu0 }
 0x10d   :  { %v860_v16 = vadd.f32 %v2613_v56, %v658_v2  ;;  %v656_v62 = vadd.f32 %v605_v7, %v420_v20  ;;  %v807_v5 = vpop.f32.mrf.mxu1 }
 0x10e   :  { %v2582_v63 = vpop.f32.mrf.mxu0 }
 0x10f   :  { %v858_v53 = vadd.f32 %v807_v5, %v656_v62  ;;  %v659_v54 = vadd.f32 %v2582_v63, %v431_v58  ;;  %v2614_v19 = vpop.f32.mrf.mxu1 }
 0x110   :  { %v608_v11 = vpop.f32.mrf.mxu0 }
 0x111   :  { %v3523_v41 = vadd.f32 %v2614_v19, %v659_v54  ;;  %v657_v43 = vadd.f32 %v608_v11, %v423_v18  ;;  %v810_v4 = vpop.f32.mrf.mxu1 }
 0x112   :  { %v2585_v8 = vpop.f32.mrf.mxu0 }
 0x113   :  { %v3525_v44 = vadd.f32 %v810_v4, %v657_v43  ;;  %v662_v31 = vadd.f32 %v2585_v8, %v444_v21  ;;  %v2617_v13 = vpop.f32.mrf.mxu1 }
 0x114   :  { %v621_v42 = vpop.f32.mrf.mxu0 }
 0x115   :  { %v3527_v15 = vadd.f32 %v2617_v13, %v662_v31  ;;  %v660_v61 = vadd.f32 %v621_v42, %v436_v22  ;;  %v823_v20 = vpop.f32.mrf.mxu1 }
 0x116   :  { %v2586_v17 = vpop.f32.mrf.mxu0 }
 0x117   :  { %v3529_v25 = vadd.f32 %v823_v20, %v660_v61  ;;  %v663_v58 = vadd.f32 %v2586_v17, %v447_v26  ;;  %v2618_v32 = vpop.f32.mrf.mxu1 }
 0x118   :  { %v624_v23 = vpop.f32.mrf.mxu0 }
 0x119   :  { %v3531_v24 = vadd.f32 %v2618_v32, %v663_v58  ;;  %v661_v18 = vadd.f32 %v624_v23, %v439_v33  ;;  %v826_v3 = vpop.f32.mrf.mxu1 }
 0x11a   :  { %v2589_v40 = vpop.f32.mrf.mxu0 }
 0x11b   :  { %v3533_v35 = vadd.f32 %v826_v3, %v661_v18  ;;  %v666_v21 = vadd.f32 %v2589_v40, %v460_v55  ;;  %v2621_v38 = vpop.f32.mrf.mxu1 }
 0x11c   :  { %v637_v27 = vpop.f32.mrf.mxu0 }
 0x11d   :  { %v3535_v36 = vadd.f32 %v2621_v38, %v666_v21  ;;  %v664_v22 = vadd.f32 %v637_v27, %v452_v47  ;;  %v839_v52 = vpop.f32.mrf.mxu1 }
 0x11e   :  { %v2590_v49 = vpop.f32.mrf.mxu0 }
 0x11f   :  { %v3537_v50 = vadd.f32 %v839_v52, %v664_v22  ;;  %v667_v26 = vadd.f32 %v2590_v49, %v3507_v48  ;;  %v2622_v51 = vpop.f32.mrf.mxu1 }
 0x120   :  { %v640_v39 = vpop.f32.mrf.mxu0 }
 0x121   :  { %v3540_v46 = vadd.f32 %v2622_v51, %v667_v26  ;;  %v665_v33 = vadd.f32 %v640_v39, %v3509_v34  ;;  %v842_v45 = vpop.f32.mrf.mxu1 }
 0x122   :  { %v2641_v9 = vpop.f32.mrf.mxu0 }
 0x123   :  { %v3543_v55 = vadd.f32 %v842_v45, %v665_v33  ;;  %v3545_v59 = vpop.f32.mrf.mxu1 }
 0x124   :  { %v993_v10 = vpop.f32.mrf.mxu0 }
 0x125   :  { %v3547_v47 = vpop.f32.mrf.mxu1 }
 0x126   :  { %v2642_v1 = vpop.f32.mrf.mxu0 }
 0x127   :  { %v3549_v14 = vpop.f32.mrf.mxu1 }
 0x128   :  { %v996_v12 = vpop.f32.mrf.mxu0 }
 0x129   :  { %v3551_v48 = vpop.f32.mrf.mxu1 }
 0x12a   :  { %v2645_v30 = vpop.f32.mrf.mxu0 }
 0x12b   :  { %v1062_v28 = vadd.f32 %v2645_v30, %v860_v16  ;;  %v2677_v29 = vpop.f32.mrf.mxu1 }
 0x12c   :  { %v1009_v0 = vpop.f32.mrf.mxu0 }
 0x12d   :  { %v3553_v34 = vadd.f32 %v2677_v29, %v1062_v28  ;;  %v1060_v2 = vadd.f32 %v1009_v0, %v858_v53  ;;  %v1211_v56 = vpop.f32.mrf.mxu1 }
 0x12e   :  { %v2646_v7 = vpop.f32.mrf.mxu0 }
 0x12f   :  { %v3555_v62 = vadd.f32 %v1211_v56, %v1060_v2  ;;  %v3557_v5 = vpop.f32.mrf.mxu1 }
 0x130   :  { %v1012_v63 = vpop.f32.mrf.mxu0 }
 0x131   :  { %3717 = vst [vmem:[#allocation3_spill] sm:$0xff] %v3555_v62  ;;  %v3559_v54 = vpop.f32.mrf.mxu1 }
 0x132   :  { %v2649_v19 = vpop.f32.mrf.mxu0 }
 0x133   :  { %v2681_v11 = vpop.f32.mrf.mxu1 }
 0x134   :  { %v1025_v43 = vpop.f32.mrf.mxu0 }
 0x135   :  { %v1227_v4 = vpop.f32.mrf.mxu1 }
 0x136   :  { %v2650_v8 = vpop.f32.mrf.mxu0 }
 0x137   :  { %v2682_v16 = vpop.f32.mrf.mxu1 }
 0x138   :  { %v1028_v31 = vpop.f32.mrf.mxu0 }
 0x139   :  { %v3561_v13 = vpop.f32.mrf.mxu1 }
 0x13a   :  { %v2653_v42 = vpop.f32.mrf.mxu0 }
 0x13b   :  { %v3563_v53 = vpop.f32.mrf.mxu1 }
 0x13c   :  { %v1041_v61 = vpop.f32.mrf.mxu0 }
 0x13d   :  { %v3565_v20 = vpop.f32.mrf.mxu1 }
 0x13e   :  { %v2654_v17 = vpop.f32.mrf.mxu0 }
 0x13f   :  { %v3567_v58 = vpop.f32.mrf.mxu1 }
 0x140   :  { %v1044_v32 = vpop.f32.mrf.mxu0 }
 0x141   :  { %v3569_v23 = vpop.f32.mrf.mxu1 }
 0x142   :  { %3718 = vst [vmem:[#allocation4_spill] sm:$0xff] %v3569_v23  ;;  %v2705_v18 = vpop.f32.mrf.mxu0 }
 0x143   :  { %v3571_v3 = vpop.f32.mrf.mxu1 }
 0x144   :  { %v1398_v40 = vpop.f32.mrf.mxu0 }
 0x145   :  { %v3573_v21 = vpop.f32.mrf.mxu1 }
 0x146   :  { %3719 = vst [vmem:[#allocation5_spill] sm:$0xff] %v3573_v21  ;;  %v2706_v38 = vpop.f32.mrf.mxu0 }
 0x147   :  { %v3575_v27 = vpop.f32.mrf.mxu1 }
 0x148   :  { %3720 = vst [vmem:[#allocation6_spill] sm:$0xff] %v3575_v27  ;;  %v1401_v22 = vpop.f32.mrf.mxu0 }
 0x149   :  { %v3577_v52 = vpop.f32.mrf.mxu1 }
 0x14a   :  { %3721 = vst [vmem:[#allocation7_spill] sm:$0xff] %v3577_v52  ;;  %v2709_v49 = vpop.f32.mrf.mxu0 }
 0x14b   :  { %v3579_v26 = vpop.f32.mrf.mxu1 }
 0x14c   :  { %3722 = vst [vmem:[#allocation8_spill] sm:$0xff] %v3579_v26  ;;  %v3581_v51 = vpop.f32.mrf.mxu0  ;;  %v1058_v26 = vadd.f32 %v2641_v9, %v3511_v57  ;;  %v1067_v57 = vadd.f32 %v2650_v8, %v3531_v24  ;;  %v1070_v24 = vadd.f32 %v2653_v42, %v3535_v36 }
 0x14d   :  { %3723 = vst [vmem:[#allocation9_spill] sm:$0xff] %v3581_v51  ;;  %v3583_v39 = vpop.f32.mrf.mxu1 }
 0x14e   :  { %3724 = vst [vmem:[#allocation10_spill] sm:$0xff] %v3583_v39  ;;  %v3585_v33 = vpop.f32.mrf.mxu0  ;;  %v1056_v39 = vadd.f32 %v993_v10, %v3513_v6  ;;  %v1063_v10 = vadd.f32 %v2646_v7, %v3523_v41  ;;  %v1069_v7 = vadd.f32 %v1044_v32, %v3543_v55  ;;  %v1272_v55 = vadd.f32 %v3563_v53, %v1070_v24 }
 0x14f   :  { %3725 = vst [vmem:[#allocation11_spill] sm:$0xff] %v3585_v33  ;;  %v3587_v45 = vpop.f32.mrf.mxu1  ;;  %v1059_v33 = vadd.f32 %v2642_v1, %v3519_v37 }
 0x150   :  { %3726 = vst [vmem:[#allocation12_spill] sm:$0xff] %v3587_v45  ;;  %v3589_v30 = vpop.f32.mrf.mxu0  ;;  %v1057_v45 = vadd.f32 %v996_v12, %v3521_v60  ;;  %v1258_v6 = vadd.f32 %v3547_v47, %v1056_v39  ;;  %v1061_v60 = vadd.f32 %v1012_v63, %v3525_v44  ;;  %v1068_v47 = vadd.f32 %v1041_v61, %v3537_v50 }
 0x151   :  { %3727 = vst [vmem:[#allocation13_spill] sm:$0xff] %v3589_v30  ;;  %v3591_v28 = vpop.f32.mrf.mxu1  ;;  %v1064_v30 = vadd.f32 %v1025_v43, %v3529_v25  ;;  %v1261_v37 = vadd.f32 %v3549_v14, %v1059_v33  ;;  %v1071_v14 = vadd.f32 %v2654_v17, %v3540_v46  ;;  %v1269_v44 = vadd.f32 %v2682_v16, %v1067_v57 }
 0x152   :  { %3728 = vst [vmem:[#allocation14_spill] sm:$0xff] %v3591_v28  ;;  %v2713_v29 = vpop.f32.mrf.mxu0  ;;  %v1066_v28 = vadd.f32 %v2649_v19, %v3527_v15  ;;  %v1259_v25 = vadd.f32 %v3551_v48, %v1057_v45  ;;  %v1461_v63 = vadd.f32 %v1398_v40, %v1258_v6  ;;  %v1467_v46 = vadd.f32 %v2709_v49, %v3553_v34  ;;  %v3732_v34 = vld [vmem:[#allocation6_spill] sm:$0xff] }
 0x153   :  { %v2745_v0 = vpop.f32.mrf.mxu1  ;;  %v1266_v12 = vadd.f32 %v1227_v4, %v1064_v30  ;;  %v1265_v4 = vadd.f32 %v3557_v5, %v1063_v10  ;;  %v1464_v8 = vadd.f32 %v2706_v38, %v1261_v37  ;;  %v1270_v17 = vadd.f32 %v3565_v20, %v1068_v47  ;;  %v3731_v38 = vld [vmem:[#allocation5_spill] sm:$0xff]  ;;  %v3734_v20 = vld [vmem:[#allocation8_spill] sm:$0xff] }
 0x154   :  { %v1430_v2 = vpop.f32.mrf.mxu0  ;;  %v1268_v1 = vadd.f32 %v2681_v11, %v1066_v28  ;;  %v1273_v32 = vadd.f32 %v3567_v58, %v1071_v14  ;;  %v1669_v28 = vadd.f32 %v3734_v20, %v1467_v46  ;;  %v3737_v57 = vld [vmem:[#allocation9_spill] sm:$0xff] }
 0x155   :  { %v3593_v56 = vpop.f32.mrf.mxu1  ;;  %v1469_v42 = vadd.f32 %v1430_v2, %v1266_v12  ;;  %v1666_v49 = vadd.f32 %v3732_v34, %v1464_v8  ;;  %v3644_v2 = vld [vmem:[%s3714_s2] ss:$0 sm:$0xff] }
 0x156   :  { %3729 = vst [vmem:[#allocation15_spill] sm:$0xff] %v3593_v56  ;;  %v2714_v62 = vpop.f32.mrf.mxu0  ;;  %v1260_v56 = vadd.f32 %v3545_v59, %v1058_v26  ;;  %v1065_v59 = vadd.f32 %v1028_v31, %v3533_v35  ;;  %v1471_v48 = vadd.f32 %v2713_v29, %v1268_v1  ;;  %v1263_v35 = vadd.f32 %v3559_v54, %v1061_v60  ;;  %v3738_v37 = vld [vmem:[#allocation11_spill] sm:$0xff] }
 0x157   :  { %v2746_v52 = vpop.f32.mrf.mxu1  ;;  %v1462_v31 = vadd.f32 %v1401_v22, %v1259_v25  ;;  %v1472_v61 = vadd.f32 %v2714_v62, %v1269_v44  ;;  %v1663_v22 = vadd.f32 %v3731_v38, %v1461_v63  ;;  %v3733_v62 = vld [vmem:[#allocation7_spill] sm:$0xff]  ;;  %v1468_v10 = vadd.f32 %v3738_v37, %v1265_v4 }
 0x158   :  { %v1433_v51 = vpop.f32.mrf.mxu0  ;;  %v1463_v43 = vadd.f32 %v2705_v18, %v1260_v56  ;;  %v1267_v50 = vadd.f32 %v3561_v13, %v1065_v59  ;;  %v3730_v18 = vld [vmem:[#allocation4_spill] sm:$0xff]  ;;  %v1673_v26 = vadd.f32 %v2745_v0, %v1471_v48  ;;  %v3736_v56 = vld [vmem:[#allocation3_spill] sm:$0xff]  ;;  %v3739_v1 = vld [vmem:[#allocation13_spill] sm:$0xff] }
 0x159   :  { %v3598_v27 = vpop.f32.mrf.mxu1  ;;  %v1271_v40 = vadd.f32 %v3730_v18, %v1069_v7  ;;  %v1664_v33 = vadd.f32 %v3733_v62, %v1462_v31  ;;  %v1465_v6 = vadd.f32 %v3737_v57, %v3736_v56  ;;  %v1466_v12 = vadd.f32 %v3739_v1, %v1263_v35  ;;  %v3741_v18 = vld [vmem:[#allocation12_spill] sm:$0xff] }
 0x15a   :  { %v2717_v21 = vpop.f32.mrf.mxu0  ;;  %v1665_v5 = vadd.f32 %v3571_v3, %v1463_v43  ;;  %v1470_v13 = vadd.f32 %v1433_v51, %v1267_v50  ;;  %v1674_v3 = vadd.f32 %v2746_v52, %v1472_v61  ;;  %v1670_v38 = vadd.f32 %v3741_v18, %v1468_v10 }
 0x15b   :  { %v3603_v23 = vpop.f32.mrf.mxu1  ;;  %v1475_v45 = vadd.f32 %v2717_v21, %v1272_v55 }
 0x15c   :  { %v3607_v9 = vpop.f32.mrf.mxu0  ;;  %v1672_v59 = vadd.f32 %v3598_v27, %v1470_v13  ;;  %v3742_v13 = vld [vmem:[#allocation14_spill] sm:$0xff] }
 0x15d   :  { %v3613_v15 = vpop.f32.mrf.mxu1  ;;  %v3735_v58 = vld [vmem:[#allocation15_spill] sm:$0xff]  ;;  %v1677_v14 = vadd.f32 %v3603_v23, %v1475_v45  ;;  %v1473_v48 = vadd.f32 %v3607_v9, %v1270_v17 }
 0x15e   :  { %v3617_v19 = vpop.f32.mrf.mxu0  ;;  %v1671_v29 = vadd.f32 %v3735_v58, %v1469_v42 }
 0x15f   :  { %v3622_v41 = vpop.f32.mrf.mxu1  ;;  %v1476_v27 = vadd.f32 %v3617_v19, %v1273_v32  ;;  %v1675_v45 = vadd.f32 %v3613_v15, %v1473_v48 }
 0x160   :  { %v1449_v11 = vpop.f32.mrf.mxu0 }
 0x161   :  { %v3627_v36 = vpop.f32.mrf.mxu1  ;;  %v1474_v61 = vadd.f32 %v1449_v11, %v1271_v40 }
 0x162   :  { %v2769_v16 = vpop.f32.mrf.mxu0 }
 0x163   :  { %v2777_v54 = vpop.f32.mrf.mxu1  ;;  %v1867_v53 = vadd.f32 %v2769_v16, %v1665_v5  ;;  %v3740_v5 = vld [vmem:[#allocation10_spill] sm:$0xff] }
 0x164   :  { %v1802_v39 = vpop.f32.mrf.mxu0  ;;  %v1875_v0 = vadd.f32 %v2777_v54, %v1673_v26  ;;  %v1667_v54 = vadd.f32 %v3740_v5, %v1465_v6 }
 0x165   :  { %v1834_v30 = vpop.f32.mrf.mxu1  ;;  %v1865_v21 = vadd.f32 %v1802_v39, %v1663_v22  ;;  %v1890_v43 = vadd.f32 %v3644_v2, %v1867_v53  ;;  %v1668_v39 = vadd.f32 %v3742_v13, %v1466_v12  ;;  %v1678_v53 = vadd.f32 %v3622_v41, %v1476_v27 }
 0x166   :  { %v2770_v51 = vpop.f32.mrf.mxu0  ;;  %v1873_v52 = vadd.f32 %v1834_v30, %v1671_v29  ;;  %v1898_v4 = vadd.f32 %v3644_v2, %v1875_v0  ;;  %v1676_v30 = vadd.f32 %v3627_v36, %v1474_v61 }
 0x167   :  { %v1868_v60 = vadd.f32 %v2770_v51, %v1666_v49  ;;  %v2778_v25 = vpop.f32.mrf.mxu1  ;;  %v1888_v50 = vadd.f32 %v3644_v2, %v1865_v21 }
 0x168   :  { %v1876_v24 = vadd.f32 %v2778_v25, %v1674_v3  ;;  %v1805_v47 = vpop.f32.mrf.mxu0  ;;  %v1896_v16 = vadd.f32 %v3644_v2, %v1873_v52 }
 0x169   :  { %v1891_v44 = vadd.f32 %v3644_v2, %v1868_v60  ;;  %v1866_v7 = vadd.f32 %v1805_v47, %v1664_v33  ;;  %v1837_v63 = vpop.f32.mrf.mxu1 }
 0x16a   :  { %v1899_v8 = vadd.f32 %v3644_v2, %v1876_v24  ;;  %v1874_v35 = vadd.f32 %v1837_v63, %v1672_v59  ;;  %v2773_v31 = vpop.f32.mrf.mxu0 }
 0x16b   :  { %v1905_v46 = vpack.c.bf16 %v1891_v44, %v1890_v43  ;;  %v1889_v23 = vadd.f32 %v3644_v2, %v1866_v7  ;;  %v2781_v42 = vpop.f32.mrf.mxu1  ;;  %v1871_v40 = vadd.f32 %v2773_v31, %v1669_v28 }
 0x16c   :  { %v3661_v55 = vpack.c.bf16 %v1899_v8, %v1898_v4  ;;  %v1897_v9 = vadd.f32 %v3644_v2, %v1874_v35  ;;  %v1818_v17 = vpop.f32.mrf.mxu0  ;;  %v1879_v22 = vadd.f32 %v2781_v42, %v1677_v14 }
 0x16d   :  { %2344 = vst [vmem:[%s3715_s3 + $0x8] sm:$0xff] %v1905_v46   ;;  %v1904_v19 = vpack.c.bf16 %v1889_v23, %v1888_v50  ;;  %v1850_v32 = vpop.f32.mrf.mxu1  ;;  %v1986_v34 = vunpack.c.l.bf16 %v1905_v46  ;;  %v1987_v20 = vunpack.c.h.bf16 %v1905_v46  ;;  %v1869_v3 = vadd.f32 %v1818_v17, %v1667_v54 }
 0x16e   :  { %2348 = vst [vmem:[%s3715_s3 + $0x28] sm:$0xff] %v3661_v55   ;;  %v1908_v11 = vpack.c.bf16 %v1897_v9, %v1896_v16  ;;  %v2774_v26 = vpop.f32.mrf.mxu0  ;;  %v1894_v56 = vadd.f32 %v3644_v2, %v1871_v40  ;;  %v1902_v57 = vadd.f32 %v3644_v2, %v1879_v22  ;;  %v1877_v15 = vadd.f32 %v1850_v32, %v1675_v45 }
 0x16f   :  { %2308 = vst [vmem:[%s3715_s3] sm:$0xff] %v1904_v19   ;;  %v1984_v49 = vunpack.c.l.bf16 %v1904_v19  ;;  %v1985_v62 = vunpack.c.h.bf16 %v1904_v19  ;;  %v2782_v33 = vpop.f32.mrf.mxu1  ;;  %v1872_v6 = vadd.f32 %v2774_v26, %v1670_v38  ;;  %v2024_v41 = vmul.f32 %v1986_v34, %v1986_v34 }
 0x170   :  { %2347 = vst [vmem:[%s3715_s3 + $0x20] sm:$0xff] %v1908_v11   ;;  %v1821_v0 = vpop.f32.mrf.mxu0  ;;  %v1880_v10 = vadd.f32 %v2782_v33, %v1678_v53  ;;  %v2025_v21 = vmul.f32 %v1987_v20, %v1987_v20  ;;  %v1892_v59 = vadd.f32 %v3644_v2, %v1869_v3  ;;  %v1900_v47 = vadd.f32 %v3644_v2, %v1877_v15 }
 0x171   :  { %v2001_v28 = vadd.f32 %v1985_v62, %v1984_v49  ;;  %v2022_v58 = vmul.f32 %v1984_v49, %v1984_v49  ;;  %v2023_v29 = vmul.f32 %v1985_v62, %v1985_v62  ;;  %v1853_v51 = vpop.f32.mrf.mxu1  ;;  %v1895_v60 = vadd.f32 %v3644_v2, %v1872_v6 }
 0x172   :  { %v1870_v25 = vadd.f32 %v1821_v0, %v1668_v39  ;;  %v1878_v1 = vadd.f32 %v1853_v51, %v1676_v30  ;;  %v1903_v52 = vadd.f32 %v3644_v2, %v1880_v10  ;;  %v1992_v61 = vunpack.c.l.bf16 %v1908_v11 }
 0x173   :  { %v2002_v37 = vadd.f32 %v2001_v28, %v1986_v34  ;;  %v2038_v36 = vadd.f32 %v2023_v29, %v2022_v58  ;;  %v1907_v14 = vpack.c.bf16 %v1895_v60, %v1894_v56  ;;  %v1993_v5 = vunpack.c.h.bf16 %v1908_v11 }
 0x174   :  { %v1893_v43 = vadd.f32 %v3644_v2, %v1870_v25  ;;  %v1901_v44 = vadd.f32 %v3644_v2, %v1878_v1  ;;  %v1911_v7 = vpack.c.bf16 %v1903_v52, %v1902_v57  ;;  %v1994_v18 = vunpack.c.l.bf16 %v3661_v55 }
 0x175   :  { %v2039_v12 = vadd.f32 %v2038_v36, %v2024_v41  ;;  %v2003_v24 = vadd.f32 %v2002_v37, %v1987_v20  ;;  %2346 = vst [vmem:[%s3715_s3 + $0x18] sm:$0xff] %v1907_v14   ;;  %v1990_v2 = vunpack.c.l.bf16 %v1907_v14  ;;  %v1991_v50 = vunpack.c.h.bf16 %v1907_v14 }
 0x176   :  { %v1906_v48 = vpack.c.bf16 %v1893_v43, %v1892_v59  ;;  %v1910_v4 = vpack.c.bf16 %v1901_v44, %v1900_v47  ;;  %2350 = vst [vmem:[%s3715_s3 + $0x38] sm:$0xff] %v1911_v7   ;;  %v2030_v38 = vmul.f32 %v1992_v61, %v1992_v61  ;;  %v1995_v26 = vunpack.c.h.bf16 %v3661_v55  ;;  %v2000_v43 = vld [vmem:[%s3713_s4] sm:$0x3] }
 0x177   :  { %v2040_v63 = vadd.f32 %v2039_v12, %v2025_v21  ;;  %v2028_v16 = vmul.f32 %v1990_v2, %v1990_v2  ;;  %v2029_v54 = vmul.f32 %v1991_v50, %v1991_v50  ;;  %v2031_v13 = vmul.f32 %v1993_v5, %v1993_v5 }
 0x178   :  { %2345 = vst [vmem:[%s3715_s3 + $0x10] sm:$0xff] %v1906_v48   ;;  %v1988_v8 = vunpack.c.l.bf16 %v1906_v48  ;;  %v1989_v35 = vunpack.c.h.bf16 %v1906_v48  ;;  %2349 = vst [vmem:[%s3715_s3 + $0x30] sm:$0xff] %v1910_v4   ;;  %v2032_v49 = vmul.f32 %v1994_v18, %v1994_v18  ;;  %v1996_v62 = vunpack.c.l.bf16 %v1910_v4 }
 0x179   :  { %v2033_v53 = vmul.f32 %v1995_v26, %v1995_v26  ;;  %v1997_v30 = vunpack.c.h.bf16 %v1910_v4  ;;  %v1998_v28 = vunpack.c.l.bf16 %v1911_v7  ;;  %v1999_v0 = vunpack.c.h.bf16 %v1911_v7 }
 0x17a   :  { %v2004_v31 = vadd.f32 %v2003_v24, %v1988_v8  ;;  %v2026_v27 = vmul.f32 %v1988_v8, %v1988_v8  ;;  %v2027_v23 = vmul.f32 %v1989_v35, %v1989_v35  ;;  %v2034_v29 = vmul.f32 %v1996_v62, %v1996_v62 }
 0x17b   :  { %v2035_v56 = vmul.f32 %v1997_v30, %v1997_v30  ;;  %v2036_v55 = vmul.f32 %v1998_v28, %v1998_v28  ;;  %v2037_v41 = vmul.f32 %v1999_v0, %v1999_v0 }
 0x17c   :  { %v2005_v46 = vadd.f32 %v2004_v31, %v1989_v35  ;;  %v2041_v42 = vadd.f32 %v2040_v63, %v2026_v27 }
 0x17e   :  { %v2006_v9 = vadd.f32 %v2005_v46, %v1990_v2  ;;  %v2042_v17 = vadd.f32 %v2041_v42, %v2027_v23 }
 0x180   :  { %v2007_v19 = vadd.f32 %v2006_v9, %v1991_v50  ;;  %v2043_v32 = vadd.f32 %v2042_v17, %v2028_v16 }
 0x182   :  { %v2008_v40 = vadd.f32 %v2007_v19, %v1992_v61  ;;  %v2044_v22 = vadd.f32 %v2043_v32, %v2029_v54 }
 0x184   :  { %v2045_v39 = vadd.f32 %v2044_v22, %v2030_v38  ;;  %v2009_v34 = vadd.f32 %v2008_v40, %v1993_v5 }
 0x186   :  { %v2010_v33 = vadd.f32 %v2009_v34, %v1994_v18  ;;  %v2046_v45 = vadd.f32 %v2045_v39, %v2031_v13 }
 0x188   :  { %v2011_v11 = vadd.f32 %v2010_v33, %v1995_v26  ;;  %v2047_v20 = vadd.f32 %v2046_v45, %v2032_v49 }
 0x18a   :  { %v2012_v58 = vadd.f32 %v2011_v11, %v1996_v62  ;;  %v2048_v3 = vadd.f32 %v2047_v20, %v2033_v53 }
 0x18c   :  { %v2013_v51 = vadd.f32 %v2012_v58, %v1997_v30  ;;  %v2049_v57 = vadd.f32 %v2048_v3, %v2034_v29 }
 0x18e   :  { %v2014_v15 = vadd.f32 %v2013_v51, %v1998_v28  ;;  %v2050_v6 = vadd.f32 %v2049_v57, %v2035_v56 }
 0x190   :  { %v2015_v37 = vadd.f32 %v2014_v15, %v1999_v0  ;;  %v2051_v36 = vadd.f32 %v2050_v6, %v2036_v55 }
 0x192   :  { %v2016_v10 = vrot.slane %v2015_v37, 4  ;;  %v2052_v21 = vadd.f32 %v2051_v36, %v2037_v41 }
 0x194   :  { %v2017_v60 = vadd.f32 %v2016_v10, %v2015_v37  ;;  %v2053_v25 = vrot.slane %v2052_v21, 4 }
 0x196   :  { %v2018_v1 = vrot.slane %v2017_v60, 2  ;;  %v2054_v12 = vadd.f32 %v2053_v25, %v2052_v21 }
 0x198   :  { %v2019_v59 = vadd.f32 %v2018_v1, %v2017_v60  ;;  %v2055_v52 = vrot.slane %v2054_v12, 2 }
 0x19a   :  { %v2020_v24 = vrot.slane %v2019_v59, 1  ;;  %v2056_v47 = vadd.f32 %v2055_v52, %v2054_v12 }
 0x19c   :  { %v2057_v14 = vrot.slane %v2056_v47, 1  ;;  %v2021_v44 = vadd.f32 %v2020_v24, %v2019_v59 }
 0x19e   :  { %v2058_v7 = vadd.f32 %v2057_v14, %v2056_v47 }
 0x1a0   :  { %v2060_v63 = vsel %vm2059_vm0, %v2021_v44, %v2058_v7 }
 0x1a1   :  { %v2061_v48 = vadd.f32 %v2060_v63, %v2000_v43 }
 0x1a3   :  { %2062 = vst [vmem:[%s3713_s4] sm:$0x3] %v2061_v48 }

// kernel: down_encoder_forward.4
= control target key start
LH: loop header
LB: loop body
LE: loop exit
PB: predicated region body
PF: predicated region fallthrough
CT: control target
= control target key end

     0   :  { %v3032_v1 = vmov 0.0   ;;  %v3033_v26 = vmov 1966171168   ;;  %v86_v28 = vlaneseq  ;;  %vm2176_vm0 = vcmask 1040384   ;;  %s3922_s4 = inlined_call_operand.vmem [shape: bf16[3,3,128,128], index: 4, kind: input, shape index: {}]   ;;  %s3923_s1 = inlined_call_operand.vmem [shape: f32[2,128], index: 1, kind: input, shape index: {}]   ;;  %s3924_s0 = inlined_call_operand.vmem [shape: bf16[2,8,8,128], index: 0, kind: input, shape index: {}]   ;;  %s3925_s2 = inlined_call_operand.vmem [shape: f32[1,128], index: 2, kind: input, shape index: {}]   ;;  %s3926_s3 = inlined_call_operand.vmem [shape: f32[1,128], index: 3, kind: input, shape index: {}]   ;;  %s3927_s7 = inlined_call_operand.vmem [shape: f32[2,128], index: 7, kind: output, shape index: {1}]   ;;  %s3928_s5 = inlined_call_operand.vmem [shape: f32[1,128], index: 5, kind: input, shape index: {}]   ;;  %s3929_s6 = inlined_call_operand.vmem [shape: bf16[2,8,8,128], index: 6, kind: output, shape index: {0}]  }
   0x1   :  { %v2957_v0 = vld [vmem:[%s3922_s4 + $0x78] sm:$0xff]   ;;  %31 = vst [vmem:[#allocation2] sm:$0xff] %v3032_v1  ;;  %32 = vst [vmem:[#allocation2 + $0x8] sm:$0x3] %v3032_v1  ;;  %v2959_v3 = vld [vmem:[%s3922_s4 + $0x70] sm:$0xff]   ;;  %v84_v27 = vunpack.c.l.s4 %v3033_v26 }
   0x2   :  { %33 = vst [vmem:[#allocation2 + $0x10] sm:$0xff] %v3032_v1  ;;  %34 = vst [vmem:[#allocation2 + $0x18] sm:$0x3] %v3032_v1  ;;  %v2958_v2 = vld [vmem:[%s3922_s4 + $0x38] sm:$0xff]   ;;  %2651 = vmatprep.subr.bf16.mxu0 %v2957_v0  ;;  %v2960_v4 = vld [vmem:[%s3922_s4 + $0x30] sm:$0xff]   ;;  %v87_v30 = vshrl.u32 %v86_v28, 7 }
   0x3   :  { %35 = vst [vmem:[#allocation2 + $0x20] sm:$0xff] %v3032_v1  ;;  %36 = vst [vmem:[#allocation2 + $0x28] sm:$0x3] %v3032_v1  ;;  %2652 = vmatpush3.bf16.msra.mxu0 %v2957_v0  ;;  %2683 = vmatprep.subr.bf16.mxu1 %v2958_v2  ;;  %v2961_v5 = vld [vmem:[%s3922_s4 + $0x68] sm:$0xff]   ;;  %v2963_v7 = vld [vmem:[%s3922_s4 + $0x60] sm:$0xff]   ;;  %v85_v29 = vunpack.c.0.s8 %v84_v27 }
   0x4   :  { %37 = vst [vmem:[#allocation2 + $0x30] sm:$0xff] %v3032_v1  ;;  %38 = vst [vmem:[#allocation2 + $0x38] sm:$0x3] %v3032_v1  ;;  %2684 = vmatpush3.bf16.msra.mxu1 %v2958_v2  ;;  %2653 = vmatprep.subr.bf16.mxu0 %v2959_v3  ;;  %v2962_v6 = vld [vmem:[%s3922_s4 + $0x28] sm:$0xff]   ;;  %v2964_v8 = vld [vmem:[%s3922_s4 + $0x20] sm:$0xff]   ;;  %v138_v42 = vsub.s32 0, %v87_v30 }
   0x5   :  { %39 = vst [vmem:[#allocation2 + $0x40] sm:$0xff] %v3032_v1  ;;  %40 = vst [vmem:[#allocation2 + $0x48] sm:$0x3] %v3032_v1  ;;  %2685 = vmatprep.subr.bf16.mxu1 %v2960_v4  ;;  %v2965_v9 = vld [vmem:[%s3922_s4 + $0x58] sm:$0xff]   ;;  %v2967_v11 = vld [vmem:[%s3922_s4 + $0x50] sm:$0xff]   ;;  %v88_v31 = vsub.s32 %v85_v29, %v87_v30 }
   0x6   :  { %41 = vst [vmem:[#allocation2 + $0x50] sm:$0xff] %v3032_v1  ;;  %42 = vst [vmem:[#allocation2 + $0x58] sm:$0x3] %v3032_v1  ;;  %v2966_v10 = vld [vmem:[%s3922_s4 + $0x18] sm:$0xff]   ;;  %v71_v12 = vld [vmem:[%s3923_s1] sm:$0x3] }
   0x7   :  { %43 = vst [vmem:[#allocation2 + $0x60] sm:$0xff] %v3032_v1  ;;  %44 = vst [vmem:[#allocation2 + $0x68] sm:$0x3] %v3032_v1  ;;  %2654 = vmatpush3.bf16.msra.mxu0 %v2959_v3  ;;  %v2968_v13 = vld [vmem:[%s3922_s4 + $0x10] sm:$0xff]   ;;  %v3153_v14 = vmul.f32 0.0078125, %v71_v12  ;;  %v2969_v16 = vld [vmem:[%s3922_s4 + $0x48] sm:$0xff]  }
   0x8   :  { %45 = vst [vmem:[#allocation2 + $0x70] sm:$0xff] %v3032_v1  ;;  %46 = vst [vmem:[#allocation2 + $0x78] sm:$0x3] %v3032_v1  ;;  %2686 = vmatpush3.bf16.msra.mxu1 %v2960_v4  ;;  %2655 = vmatprep.subr.bf16.mxu0 %v2961_v5  ;;  %v2970_v17 = vld [vmem:[%s3922_s4 + $0x8] sm:$0xff]   ;;  %v2971_v20 = vld [vmem:[%s3922_s4 + $0x40] sm:$0xff]  }
   0x9   :  { %47 = vst [vmem:[#allocation2 + $0x80] sm:$0xff] %v3032_v1  ;;  %48 = vst [vmem:[#allocation2 + $0x88] sm:$0x3] %v3032_v1  ;;  %2687 = vmatprep.subr.bf16.mxu1 %v2962_v6  ;;  %v73_v15 = vmul.f32 %v3153_v14, %v3153_v14  ;;  %v2972_v21 = vld [vmem:[%s3922_s4] sm:$0xff]   ;;  %v3173_v24 = vld [vmem:[%s3922_s4 + $0xb8] sm:$0xff]  }
   0xa   :  { %49 = vst [vmem:[#allocation2 + $0x90] sm:$0xff] %v3032_v1  ;;  %50 = vst [vmem:[#allocation2 + $0x98] sm:$0x3] %v3032_v1  ;;  %v3178_v25 = vld [vmem:[%s3922_s4 + $0xf8] sm:$0xff]   ;;  %v2422_v34 = vld [vmem:[%s3924_s0] sm:$0xff]  }
   0xb   :  { %51 = vst [vmem:[#allocation2 + $0xa0] sm:$0xff] %v3032_v1  ;;  %52 = vst [vmem:[#allocation2 + $0xa8] sm:$0x3] %v3032_v1  ;;  %2656 = vmatpush3.bf16.msra.mxu0 %v2961_v5  ;;  %v75_v18 = vrot.slane %v73_v15, 7  ;;  %v79_v35 = vld [vmem:[%s3925_s2] sm:$0x1]  ;;  %v2423_v44 = vunpack.c.l.bf16 %v2422_v34  ;;  %v2424_v45 = vunpack.c.h.bf16 %v2422_v34 }
   0xc   :  { %53 = vst [vmem:[#allocation2 + $0xb0] sm:$0xff] %v3032_v1  ;;  %54 = vst [vmem:[#allocation2 + $0xb8] sm:$0x3] %v3032_v1  ;;  %2688 = vmatpush3.bf16.msra.mxu1 %v2962_v6  ;;  %2657 = vmatprep.subr.bf16.mxu0 %v2963_v7  ;;  %v2493_v36 = vld [vmem:[%s3924_s0 + $0x8] sm:$0xff]   ;;  %v2494_v37 = vld [vmem:[%s3924_s0 + $0x10] sm:$0xff]  }
   0xd   :  { %55 = vst [vmem:[#allocation2 + $0xc0] sm:$0xff] %v3032_v1  ;;  %56 = vst [vmem:[#allocation2 + $0xc8] sm:$0x3] %v3032_v1  ;;  %2689 = vmatprep.subr.bf16.mxu1 %v2964_v8  ;;  %v77_v19 = vsub.f32 %v3153_v14, %v75_v18  ;;  %v3197_v39 = vld [vmem:[%s3924_s0 + $0x18] sm:$0xff]   ;;  %v2496_v40 = vld [vmem:[%s3924_s0 + $0x20] sm:$0xff]   ;;  %v2427_v46 = vunpack.c.l.bf16 %v2493_v36  ;;  %v2428_v49 = vunpack.c.h.bf16 %v2493_v36  ;;  %v2431_v50 = vunpack.c.l.bf16 %v2494_v37 }
   0xe   :  { %57 = vst [vmem:[#allocation2 + $0xd0] sm:$0xff] %v3032_v1  ;;  %58 = vst [vmem:[#allocation2 + $0xd8] sm:$0x3] %v3032_v1  ;;  %v2497_v43 = vld [vmem:[%s3924_s0 + $0x28] sm:$0xff]   ;;  %v2498_v47 = vld [vmem:[%s3924_s0 + $0x30] sm:$0xff]   ;;  %v2432_v51 = vunpack.c.h.bf16 %v2494_v37  ;;  %v2435_v54 = vunpack.c.l.bf16 %v3197_v39  ;;  %v2439_v55 = vunpack.c.l.bf16 %v2496_v40  ;;  %v2440_v56 = vunpack.c.h.bf16 %v2496_v40 }
   0xf   :  { %59 = vst [vmem:[#allocation2 + $0xe0] sm:$0xff] %v3032_v1  ;;  %60 = vst [vmem:[#allocation2 + $0xe8] sm:$0x3] %v3032_v1  ;;  %2658 = vmatpush3.bf16.msra.mxu0 %v2963_v7  ;;  %v78_v22 = vmax.f32 %v77_v19, 0.0  ;;  %v3211_v52 = vld [vmem:[%s3924_s0 + $0x38] sm:$0xff]   ;;  %v2436_v57 = vunpack.c.h.bf16 %v3197_v39  ;;  %v2443_v60 = vunpack.c.l.bf16 %v2497_v43  ;;  %v2444_v61 = vunpack.c.h.bf16 %v2497_v43  ;;  %v2975_v43 = vld [vmem:[%s3922_s4 + $0xb0] sm:$0xff]  }
  0x10   :  { %61 = vst [vmem:[#allocation2 + $0xf0] sm:$0xff] %v3032_v1  ;;  %62 = vst [vmem:[#allocation2 + $0xf8] sm:$0x3] %v3032_v1  ;;  %2690 = vmatpush3.bf16.msra.mxu1 %v2964_v8  ;;  %2659 = vmatprep.subr.bf16.mxu0 %v2965_v9  ;;  %v100_v53 = vld [vmem:[%s3926_s3] sm:$0x1]  ;;  %v2447_v62 = vunpack.c.l.bf16 %v2498_v47  ;;  %v2448_v63 = vunpack.c.h.bf16 %v2498_v47  ;;  %v2451_v0 = vunpack.c.l.bf16 %v3211_v52  ;;  %v2452_v2 = vunpack.c.h.bf16 %v3211_v52  ;;  %v2977_v39 = vld [vmem:[%s3922_s4 + $0xa8] sm:$0xff]  }
  0x11   :  { %63 = vst [vmem:[#allocation2 + $0x100] sm:$0xff] %v3032_v1  ;;  %64 = vst [vmem:[#allocation2 + $0x108] sm:$0x3] %v3032_v1  ;;  %2691 = vmatprep.subr.bf16.mxu1 %v2966_v10  ;;  %v80_v23 = vadd.f32 1e-05, %v78_v22 }
  0x12   :  { %65 = vst [vmem:[#allocation2 + $0x110] sm:$0xff] %v3032_v1  ;;  %66 = vst [vmem:[#allocation2 + $0x118] sm:$0x3] %v3032_v1 }
  0x13   :  { %67 = vst [vmem:[#allocation2 + $0x120] sm:$0xff] %v3032_v1  ;;  %68 = vst [vmem:[#allocation2 + $0x128] sm:$0x3] %v3032_v1  ;;  %2660 = vmatpush3.bf16.msra.mxu0 %v2965_v9  ;;  %3029 = vrsqrt.f32 %v80_v23  ;;  %v252_v23 = vld [vmem:[#allocation2 + $0x1] sm:$0xff] }
  0x14   :  { %69 = vst [vmem:[#allocation2 + $0x130] sm:$0xff] %v3032_v1  ;;  %70 = vst [vmem:[#allocation2 + $0x138] sm:$0x3] %v3032_v1  ;;  %2692 = vmatpush3.bf16.msra.mxu1 %v2966_v10  ;;  %2661 = vmatprep.subr.bf16.mxu0 %v2967_v11 }
  0x15   :  { %2693 = vmatprep.subr.bf16.mxu1 %v2968_v13 }
  0x17   :  { %2662 = vmatpush3.bf16.msra.mxu0 %v2967_v11 }
  0x18   :  { %2694 = vmatpush3.bf16.msra.mxu1 %v2968_v13  ;;  %2663 = vmatprep.subr.bf16.mxu0 %v2969_v16 }
  0x19   :  { %2695 = vmatprep.subr.bf16.mxu1 %v2970_v17 }
  0x1b   :  { %2664 = vmatpush3.bf16.msra.mxu0 %v2969_v16 }
  0x1c   :  { %2696 = vmatpush3.bf16.msra.mxu1 %v2970_v17  ;;  %2665 = vmatprep.subr.bf16.mxu0 %v2971_v20 }
  0x1d   :  { %2697 = vmatprep.subr.bf16.mxu1 %v2972_v21 }
  0x1f   :  { %2666 = vmatpush3.bf16.msra.mxu0 %v2971_v20 }
  0x20   :  { %2698 = vmatpush3.bf16.msra.mxu1 %v2972_v21  ;;  %2715 = vmatprep.subr.bf16.mxu0 %v3173_v24  ;;  %v3030_v32 = vpop.eup %3029 }
  0x21   :  { %2747 = vmatprep.subr.bf16.mxu1 %v3178_v25  ;;  %v89_v33 = vrot.slane %v3030_v32, %v88_v31 }
  0x23   :  { %v90_v38 = vcombine.high %v89_v33, %v89_v33 }
  0x25   :  { %v97_v41 = vrot.slane %v90_v38, %v88_v31 }
  0x27   :  { %v99_v48 = vmul.f32 %v97_v41, %v79_v35 }
  0x29   :  { %v101_v58 = vmul.f32 %v99_v48, %v3153_v14  ;;  %v3219_v59 = vrot.slane %v99_v48, %v138_v42 }
  0x2b   :  { %v102_v3 = vsub.f32 %v100_v53, %v101_v58  ;;  %v141_v4 = vmul.f32 %v2423_v44, %v3219_v59  ;;  %v142_v5 = vmul.f32 %v2424_v45, %v3219_v59  ;;  %v143_v6 = vmul.f32 %v2427_v46, %v3219_v59 }
  0x2c   :  { %v144_v7 = vmul.f32 %v2428_v49, %v3219_v59  ;;  %v145_v8 = vmul.f32 %v2431_v50, %v3219_v59  ;;  %v146_v9 = vmul.f32 %v2432_v51, %v3219_v59  ;;  %v147_v10 = vmul.f32 %v2435_v54, %v3219_v59 }
  0x2d   :  { %v161_v11 = vrot.slane %v102_v3, %v138_v42  ;;  %v149_v12 = vmul.f32 %v2439_v55, %v3219_v59  ;;  %v150_v13 = vmul.f32 %v2440_v56, %v3219_v59  ;;  %v151_v14 = vmul.f32 %v2443_v60, %v3219_v59 }
  0x2e   :  { %v152_v15 = vmul.f32 %v2444_v61, %v3219_v59  ;;  %v153_v16 = vmul.f32 %v2447_v62, %v3219_v59  ;;  %v154_v17 = vmul.f32 %v2448_v63, %v3219_v59  ;;  %v155_v18 = vmul.f32 %v2451_v0, %v3219_v59 }
  0x2f   :  { %v163_v19 = vadd.f32 %v161_v11, %v141_v4  ;;  %v164_v20 = vadd.f32 %v161_v11, %v142_v5  ;;  %v165_v21 = vadd.f32 %v161_v11, %v143_v6  ;;  %v166_v22 = vadd.f32 %v161_v11, %v144_v7 }
  0x30   :  { %v167_v26 = vadd.f32 %v161_v11, %v145_v8  ;;  %v168_v27 = vadd.f32 %v161_v11, %v146_v9  ;;  %v169_v28 = vadd.f32 %v161_v11, %v147_v10  ;;  %v171_v29 = vadd.f32 %v161_v11, %v149_v12 }
  0x31   :  { %v3237_v30 = vmax.f32 %v163_v19, 0.0  ;;  %v3239_v31 = vmax.f32 %v164_v20, 0.0  ;;  %v3241_v32 = vmax.f32 %v165_v21, 0.0  ;;  %v3243_v33 = vmax.f32 %v166_v22, 0.0  ;;  %v2978_v19 = vld [vmem:[%s3922_s4 + $0xe8] sm:$0xff]  }
  0x32   :  { %v3245_v34 = vmax.f32 %v167_v26, 0.0  ;;  %v3247_v35 = vmax.f32 %v168_v27, 0.0  ;;  %v3249_v36 = vmax.f32 %v169_v28, 0.0  ;;  %v3251_v37 = vmax.f32 %v171_v29, 0.0  ;;  %v2980_v26 = vld [vmem:[%s3922_s4 + $0xe0] sm:$0xff]   ;;  %v2983_v27 = vld [vmem:[%s3922_s4 + $0x90] sm:$0xff]  }
  0x33   :  { %196 = vst [vmem:[#allocation2 + $0x11] sm:$0xff] %v3237_v30  ;;  %v268_v38 = vpack.c.bf16 %v3237_v30, %v252_v23  ;;  %197 = vst [vmem:[#allocation2 + $0x21] sm:$0xff] %v3239_v31  ;;  %v3259_v40 = vpack.c.bf16 %v3241_v32, %v3239_v31  ;;  %v172_v41 = vadd.f32 %v161_v11, %v150_v13 }
  0x34   :  { %198 = vst [vmem:[#allocation2 + $0x31] sm:$0xff] %v3241_v32  ;;  %199 = vst [vmem:[#allocation2 + $0x41] sm:$0xff] %v3243_v33  ;;  %v173_v42 = vadd.f32 %v161_v11, %v151_v14  ;;  %v3268_v44 = vpack.c.bf16 %v3245_v34, %v3243_v33  ;;  %v174_v45 = vadd.f32 %v161_v11, %v152_v15  ;;  %v2979_v14 = vld [vmem:[%s3922_s4 + $0xa0] sm:$0xff]  }
  0x35   :  { %200 = vst [vmem:[#allocation2 + $0x51] sm:$0xff] %v3245_v34  ;;  %201 = vst [vmem:[#allocation2 + $0x61] sm:$0xff] %v3247_v35  ;;  %2667 = vmatprep.mubr.bf16.mxu0 %v268_v38  ;;  %v3273_v46 = vmax.f32 %v172_v41, 0.0  ;;  %v175_v48 = vadd.f32 %v161_v11, %v153_v16  ;;  %v176_v49 = vadd.f32 %v161_v11, %v154_v17  ;;  %v2982_v38 = vld [vmem:[%s3922_s4 + $0xd8] sm:$0xff]   ;;  %v2992_v16 = vld [vmem:[%s3922_s4 + $0x170] sm:$0xff]  }
  0x36   :  { %202 = vst [vmem:[#allocation2 + $0x71] sm:$0xff] %v3249_v36  ;;  %204 = vst [vmem:[#allocation2 + $0xb1] sm:$0xff] %v3251_v37  ;;  %v3275_v47 = vmax.f32 %v173_v42, 0.0  ;;  %2668 = vmatmul.mubr.bf16.vlgmr.msra.gmra.mxu0 %v3259_v40  ;;  %v3278_v50 = vmax.f32 %v174_v45, 0.0  ;;  %v177_v51 = vadd.f32 %v161_v11, %v155_v18  ;;  %v148_v52 = vmul.f32 %v2436_v57, %v3219_v59 }
  0x37   :  { %v156_v53 = vmul.f32 %v2452_v2, %v3219_v59  ;;  %2716 = vmatpush3.bf16.msra.mxu0 %v3173_v24  ;;  %2671 = vmatprep.mubr.bf16.mxu0 %v3268_v44  ;;  %205 = vst [vmem:[#allocation2 + $0xc1] sm:$0xff] %v3273_v46  ;;  %v3288_v54 = vmax.f32 %v175_v48, 0.0  ;;  %v3290_v55 = vmax.f32 %v176_v49, 0.0  ;;  %v1004_v58 = vpack.c.bf16 %v3243_v33, %v3241_v32  ;;  %v260_v59 = vld [vmem:[#allocation2 + $0xa1] sm:$0xff]  ;;  %v3008_v33 = vld [vmem:[%s3922_s4 + $0x1f0] sm:$0xff]  }
  0x38   :  { %206 = vst [vmem:[#allocation2 + $0xd1] sm:$0xff] %v3275_v47  ;;  %2717 = vmatprep.subr.bf16.mxu0 %v2975_v43  ;;  %207 = vst [vmem:[#allocation2 + $0xe1] sm:$0xff] %v3278_v50  ;;  %v3296_v56 = vmax.f32 %v177_v51, 0.0  ;;  %v170_v24 = vadd.f32 %v161_v11, %v148_v52  ;;  %v1005_v60 = vpack.c.bf16 %v3247_v35, %v3245_v34  ;;  %v583_v49 = vld [vmem:[#allocation2 + $0x2] sm:$0xff] }
  0x39   :  { %v178_v57 = vadd.f32 %v161_v11, %v156_v53  ;;  %208 = vst [vmem:[#allocation2 + $0xf1] sm:$0xff] %v3288_v54  ;;  %209 = vst [vmem:[#allocation2 + $0x101] sm:$0xff] %v3290_v55  ;;  %v3316_v3 = vpack.c.bf16 %v3249_v36, %v3247_v35  ;;  %v2976_v11 = vld [vmem:[%s3922_s4 + $0xf0] sm:$0xff]   ;;  %v272_v15 = vpack.c.bf16 %v3251_v37, %v260_v59  ;;  %v3011_v34 = vld [vmem:[%s3922_s4 + $0x1a0] sm:$0xff]  }
  0x3a   :  { %v3308_v63 = vld [vmem:[#allocation2 + $0x10] sm:$0xff]  ;;  %v3310_v0 = vld [vmem:[#allocation2 + $0x20] sm:$0xff]  ;;  %210 = vst [vmem:[#allocation2 + $0x111] sm:$0xff] %v3296_v56  ;;  %v3319_v4 = vmax.f32 %v170_v24, 0.0  ;;  %v3374_v22 = vpack.c.bf16 %v3275_v47, %v3273_v46  ;;  %v3388_v29 = vpack.c.bf16 %v3288_v54, %v3278_v50  ;;  %v3411_v48 = vpack.c.bf16 %v3296_v56, %v3290_v55 }
  0x3b   :  { %v3312_v2 = vld [vmem:[#allocation2 + $0x30] sm:$0xff]  ;;  %v3321_v5 = vmax.f32 %v178_v57, 0.0  ;;  %v228_v7 = vpack.c.bf16 %v3308_v63, %v3032_v1  ;;  %2718 = vmatpush3.bf16.msra.mxu0 %v2975_v43  ;;  %v3331_v9 = vld [vmem:[#allocation2 + $0x40] sm:$0xff]  ;;  %v2985_v43 = vld [vmem:[%s3922_s4 + $0x88] sm:$0xff]  }
  0x3c   :  { %v3329_v8 = vpack.c.bf16 %v3312_v2, %v3310_v0  ;;  %v3333_v10 = vld [vmem:[#allocation2 + $0x50] sm:$0xff]  ;;  %2719 = vmatprep.subr.bf16.mxu0 %v2977_v39  ;;  %203 = vst [vmem:[#allocation2 + $0x81] sm:$0xff] %v3319_v4  ;;  %v1006_v13 = vpack.c.bf16 %v3319_v4, %v3249_v36  ;;  %v3356_v17 = vld [vmem:[#allocation2 + $0x60] sm:$0xff] }
  0x3d   :  { %v3340_v12 = vpack.c.bf16 %v3333_v10, %v3331_v9  ;;  %211 = vst [vmem:[#allocation2 + $0x121] sm:$0xff] %v3321_v5  ;;  %2699 = vmatprep.mubr.bf16.mxu1 %v228_v7  ;;  %v3358_v18 = vld [vmem:[#allocation2 + $0x70] sm:$0xff]  ;;  %v2986_v7 = vld [vmem:[%s3922_s4 + $0xc8] sm:$0xff]  }
  0x3e   :  { %2700 = vmatmul.mubr.bf16.vlgmr.msra.gmra.mxu1 %v3329_v8  ;;  %2672 = vmatmul.mubr.bf16.gmra.mxu0 %v3316_v3  ;;  %v3363_v20 = vld [vmem:[#allocation2 + $0xb0] sm:$0xff]  ;;  %v3370_v21 = vpack.c.bf16 %v3358_v18, %v3356_v17  ;;  %v3384_v28 = vld [vmem:[#allocation2 + $0xc0] sm:$0xff] }
  0x3f   :  { %2748 = vmatpush3.bf16.msra.mxu1 %v3178_v25  ;;  %2703 = vmatprep.mubr.bf16.mxu1 %v3340_v12  ;;  %v2981_v25 = vld [vmem:[%s3922_s4 + $0x98] sm:$0xff]   ;;  %v232_v23 = vpack.c.bf16 %v3363_v20, %v3032_v1  ;;  %v3392_v1 = vld [vmem:[#allocation2 + $0xd0] sm:$0xff]  ;;  %v3397_v41 = vld [vmem:[#allocation2 + $0xe0] sm:$0xff] }
  0x40   :  { %2749 = vmatprep.subr.bf16.mxu1 %v2976_v11  ;;  %2720 = vmatpush3.bf16.msra.mxu0 %v2977_v39  ;;  %v3399_v42 = vld [vmem:[#allocation2 + $0xf0] sm:$0xff]  ;;  %v3407_v45 = vpack.c.bf16 %v3392_v1, %v3384_v28  ;;  %v2987_v39 = vld [vmem:[%s3922_s4 + $0x80] sm:$0xff]  }
  0x41   :  { %2721 = vmatprep.subr.bf16.mxu0 %v2979_v14  ;;  %2675 = vmatprep.mubr.bf16.mxu0 %v272_v15  ;;  %v3413_v51 = vld [vmem:[#allocation2 + $0x12] sm:$0xff]  ;;  %v3417_v52 = vpack.c.bf16 %v3399_v42, %v3397_v41  ;;  %v3428_v57 = vld [vmem:[#allocation2 + $0x100] sm:$0xff] }
  0x42   :  { %v2984_v53 = vld [vmem:[%s3922_s4 + $0xd0] sm:$0xff]   ;;  %v599_v24 = vpack.c.bf16 %v3413_v51, %v583_v49  ;;  %v3473_v49 = vld [vmem:[#allocation2 + $0x62] sm:$0xff] }
  0x43   :  { %2750 = vmatpush3.bf16.msra.mxu1 %v2976_v11  ;;  %v3431_v59 = vld [vmem:[#allocation2 + $0x110] sm:$0xff]  ;;  %v2989_v11 = vld [vmem:[%s3922_s4 + $0x138] sm:$0xff]   ;;  %v3601_v35 = vld [vmem:[#allocation2 + $0x82] sm:$0xff] }
  0x44   :  { %2751 = vmatprep.subr.bf16.mxu1 %v2978_v19  ;;  %2722 = vmatpush3.bf16.msra.mxu0 %v2979_v14  ;;  %v3439_v14 = vld [vmem:[#allocation2 + $0x22] sm:$0xff]  ;;  %v3441_v15 = vld [vmem:[#allocation2 + $0x32] sm:$0xff] }
  0x45   :  { %2723 = vmatprep.subr.bf16.mxu0 %v2981_v25  ;;  %v3514_v6 = vld [vmem:[#allocation2 + $0xf2] sm:$0xff] }
  0x46   :  { %2704 = vmatmul.mubr.bf16.gmra.mxu1 %v3370_v21  ;;  %2676 = vmatmul.mubr.bf16.gmra.mxu0 %v3374_v22 }
  0x47   :  { %2752 = vmatpush3.bf16.msra.mxu1 %v2978_v19  ;;  %2707 = vmatprep.mubr.bf16.mxu1 %v232_v23  ;;  %v3445_v19 = vpack.c.bf16 %v3431_v59, %v3428_v57  ;;  %v3449_v23 = vld [vmem:[#allocation2 + $0x52] sm:$0xff] }
  0x48   :  { %2753 = vmatprep.subr.bf16.mxu1 %v2980_v26  ;;  %2724 = vmatpush3.bf16.msra.mxu0 %v2981_v25  ;;  %v3447_v25 = vld [vmem:[#allocation2 + $0x42] sm:$0xff]  ;;  %v1207_v32 = vpack.c.bf16 %v3473_v49, %v3449_v23 }
  0x49   :  { %2725 = vmatprep.subr.bf16.mxu0 %v2983_v27  ;;  %2679 = vmatprep.mubr.bf16.mxu0 %v3388_v29 }
  0x4b   :  { %2754 = vmatpush3.bf16.msra.mxu1 %v2980_v26  ;;  %v801_v26 = vpack.c.bf16 %v3310_v0, %v3308_v63  ;;  %v2991_v63 = vld [vmem:[%s3922_s4 + $0x130] sm:$0xff]   ;;  %v2990_v0 = vld [vmem:[%s3922_s4 + $0x178] sm:$0xff]  }
  0x4c   :  { %2755 = vmatprep.subr.bf16.mxu1 %v2982_v38  ;;  %2726 = vmatpush3.bf16.msra.mxu0 %v2983_v27  ;;  %v2988_v27 = vld [vmem:[%s3922_s4 + $0xc0] sm:$0xff]  }
  0x4d   :  { %2727 = vmatprep.subr.bf16.mxu0 %v2985_v43 }
  0x4e   :  { %2708 = vmatmul.mubr.bf16.gmra.mxu1 %v3407_v45  ;;  %2680 = vmatmul.mubr.bf16.gmra.mxu0 %v3411_v48 }
  0x4f   :  { %2756 = vmatpush3.bf16.msra.mxu1 %v2982_v38  ;;  %2711 = vmatprep.mubr.bf16.mxu1 %v3417_v52  ;;  %v3458_v38 = vpack.c.bf16 %v3441_v15, %v3439_v14 }
  0x50   :  { %2757 = vmatprep.subr.bf16.mxu1 %v2984_v53  ;;  %2728 = vmatpush3.bf16.msra.mxu0 %v2985_v43  ;;  %v3462_v43 = vpack.c.bf16 %v3449_v23, %v3447_v25  ;;  %v3014_v23 = vld [vmem:[%s3922_s4 + $0x1d8] sm:$0xff]  }
  0x51   :  { %2729 = vmatprep.subr.bf16.mxu0 %v2987_v39  ;;  %2731 = vmatprep.mubr.bf16.mxu0 %v599_v24  ;;  %v2993_v24 = vld [vmem:[%s3922_s4 + $0x128] sm:$0xff]  }
  0x53   :  { %2758 = vmatpush3.bf16.msra.mxu1 %v2984_v53  ;;  %v3475_v53 = vld [vmem:[#allocation2 + $0x72] sm:$0xff] }
  0x54   :  { %2759 = vmatprep.subr.bf16.mxu1 %v2986_v7  ;;  %2730 = vmatpush3.bf16.msra.mxu0 %v2987_v39  ;;  %v802_v39 = vpack.c.bf16 %v3331_v9, %v3312_v2  ;;  %v3491_v2 = vpack.c.bf16 %v3475_v53, %v3473_v49  ;;  %v3932_v49 = vpack.c.bf16 %v3290_v55, %v3288_v54  ;;  %v3019_v54 = vld [vmem:[%s3922_s4 + $0x180] sm:$0xff]  }
  0x55   :  { %2779 = vmatprep.subr.bf16.mxu0 %v2989_v11  ;;  %v3647_v55 = vld [vmem:[#allocation2 + $0x122] sm:$0xff] }
  0x56   :  { %2712 = vmatmul.mubr.bf16.gmra.mxu1 %v3445_v19 }
  0x57   :  { %2760 = vmatpush3.bf16.msra.mxu1 %v2986_v7  ;;  %2763 = vmatprep.mubr.bf16.mxu1 %v801_v26  ;;  %v591_v7 = vld [vmem:[#allocation2 + $0xa2] sm:$0xff]  ;;  %v3482_v26 = vld [vmem:[#allocation2 + $0xb2] sm:$0xff] }
  0x58   :  { %2761 = vmatprep.subr.bf16.mxu1 %v2988_v27  ;;  %2732 = vmatmul.mubr.bf16.vlgmr.msra.gmra.mxu0 %v3458_v38  ;;  %v603_v9 = vpack.c.bf16 %v3482_v26, %v591_v7 }
  0x59   :  { %2780 = vmatpush3.bf16.msra.mxu0 %v2989_v11  ;;  %2735 = vmatprep.mubr.bf16.mxu0 %v3462_v43  ;;  %v803_v11 = vpack.c.bf16 %v3356_v17, %v3333_v10  ;;  %v3497_v10 = vld [vmem:[#allocation2 + $0x80] sm:$0xff]  ;;  %v2994_v17 = vld [vmem:[%s3922_s4 + $0x168] sm:$0xff]  }
  0x5a   :  { %2781 = vmatprep.subr.bf16.mxu0 %v2991_v63  ;;  %v804_v7 = vpack.c.bf16 %v3497_v10, %v3358_v18 }
  0x5b   :  { %2762 = vmatpush3.bf16.msra.mxu1 %v2988_v27  ;;  %v2995_v27 = vld [vmem:[%s3922_s4 + $0x120] sm:$0xff]  }
  0x5c   :  { %2811 = vmatprep.subr.bf16.mxu1 %v2990_v0 }
  0x5d   :  { %2782 = vmatpush3.bf16.msra.mxu0 %v2991_v63  ;;  %v3503_v63 = vld [vmem:[#allocation2 + $0xc2] sm:$0xff] }
  0x5e   :  { %2764 = vmatmul.mubr.bf16.vlgmr.msra.gmra.mxu1 %v802_v39  ;;  %2783 = vmatprep.subr.bf16.mxu0 %v2993_v24  ;;  %v3505_v39 = vld [vmem:[#allocation2 + $0xd2] sm:$0xff]  ;;  %v1209_v36 = vpack.c.bf16 %v3503_v63, %v3482_v26  ;;  %v3017_v26 = vld [vmem:[%s3922_s4 + $0x188] sm:$0xff]  }
  0x5f   :  { %2812 = vmatpush3.bf16.msra.mxu1 %v2990_v0  ;;  %2767 = vmatprep.mubr.bf16.mxu1 %v803_v11  ;;  %v2997_v0 = vld [vmem:[%s3922_s4 + $0x118] sm:$0xff]   ;;  %v3512_v11 = vld [vmem:[#allocation2 + $0xe2] sm:$0xff]  ;;  %v3523_v18 = vpack.c.bf16 %v3505_v39, %v3503_v63 }
  0x60   :  { %2813 = vmatprep.subr.bf16.mxu1 %v2992_v16  ;;  %2736 = vmatmul.mubr.bf16.gmra.mxu0 %v3491_v2  ;;  %v3527_v62 = vpack.c.bf16 %v3514_v6, %v3512_v11  ;;  %v3018_v63 = vld [vmem:[%s3922_s4 + $0x1c8] sm:$0xff]  }
  0x61   :  { %2784 = vmatpush3.bf16.msra.mxu0 %v2993_v24  ;;  %2739 = vmatprep.mubr.bf16.mxu0 %v603_v9  ;;  %v805_v24 = vpack.c.bf16 %v3384_v28, %v3363_v20  ;;  %v2996_v9 = vld [vmem:[%s3922_s4 + $0x160] sm:$0xff]   ;;  %v2998_v20 = vld [vmem:[%s3922_s4 + $0x158] sm:$0xff]  }
  0x62   :  { %2785 = vmatprep.subr.bf16.mxu0 %v2995_v27  ;;  %v3537_v28 = vld [vmem:[#allocation2 + $0x102] sm:$0xff] }
  0x63   :  { %2814 = vmatpush3.bf16.msra.mxu1 %v2992_v16  ;;  %v2999_v16 = vld [vmem:[%s3922_s4 + $0x110] sm:$0xff]  }
  0x64   :  { %2815 = vmatprep.subr.bf16.mxu1 %v2994_v17 }
  0x65   :  { %2786 = vmatpush3.bf16.msra.mxu0 %v2995_v27  ;;  %v3539_v27 = vld [vmem:[#allocation2 + $0x112] sm:$0xff] }
  0x66   :  { %2768 = vmatmul.mubr.bf16.gmra.mxu1 %v804_v7  ;;  %2787 = vmatprep.subr.bf16.mxu0 %v2997_v0  ;;  %v806_v7 = vpack.c.bf16 %v3397_v41, %v3392_v1  ;;  %v3553_v61 = vpack.c.bf16 %v3539_v27, %v3537_v28  ;;  %v1003_v1 = vpack.c.bf16 %v3239_v31, %v3237_v30  ;;  %v3003_v41 = vld [vmem:[%s3922_s4 + $0x100] sm:$0xff]   ;;  %v3005_v31 = vld [vmem:[%s3922_s4 + $0x1b8] sm:$0xff]  }
  0x67   :  { %2816 = vmatpush3.bf16.msra.mxu1 %v2994_v17  ;;  %2771 = vmatprep.mubr.bf16.mxu1 %v805_v24  ;;  %v3001_v17 = vld [vmem:[%s3922_s4 + $0x108] sm:$0xff]   ;;  %v807_v24 = vpack.c.bf16 %v3428_v57, %v3399_v42  ;;  %v3560_v42 = vld [vmem:[#allocation2 + $0x120] sm:$0xff] }
  0x68   :  { %2817 = vmatprep.subr.bf16.mxu1 %v2996_v9  ;;  %2740 = vmatmul.mubr.bf16.gmra.mxu0 %v3523_v18  ;;  %v3002_v57 = vld [vmem:[%s3922_s4 + $0x148] sm:$0xff]   ;;  %v808_v30 = vpack.c.bf16 %v3560_v42, %v3431_v59  ;;  %v3007_v59 = vld [vmem:[%s3922_s4 + $0x1b0] sm:$0xff]  }
  0x69   :  { %2788 = vmatpush3.bf16.msra.mxu0 %v2997_v0  ;;  %2743 = vmatprep.mubr.bf16.mxu0 %v3527_v62  ;;  %v3000_v0 = vld [vmem:[%s3922_s4 + $0x150] sm:$0xff]  }
  0x6a   :  { %2789 = vmatprep.subr.bf16.mxu0 %v2999_v16 }
  0x6b   :  { %2818 = vmatpush3.bf16.msra.mxu1 %v2996_v9  ;;  %v1205_v9 = vpack.c.bf16 %v3439_v14, %v3413_v51  ;;  %v3006_v51 = vld [vmem:[%s3922_s4 + $0x1f8] sm:$0xff]   ;;  %v1206_v14 = vpack.c.bf16 %v3447_v25, %v3441_v15  ;;  %v1208_v15 = vpack.c.bf16 %v3601_v35, %v3475_v53  ;;  %v1210_v53 = vpack.c.bf16 %v3512_v11, %v3505_v39 }
  0x6c   :  { %2819 = vmatprep.subr.bf16.mxu1 %v2998_v20  ;;  %v3013_v25 = vld [vmem:[%s3922_s4 + $0x198] sm:$0xff]   ;;  %v1212_v39 = vpack.c.bf16 %v3647_v55, %v3539_v27  ;;  %v3673_v27 = vld [vmem:[#allocation2] sm:$0xff] }
  0x6d   :  { %2790 = vmatpush3.bf16.msra.mxu0 %v2999_v16  ;;  %v3004_v16 = vld [vmem:[%s3922_s4 + $0x140] sm:$0xff]   ;;  %v3021_v11 = vld [vmem:[%s3922_s4 + $0x238] sm:$0xff]   ;;  %30 = vst [vmem:[%s3927_s7] sm:$0x3] %v3673_v27 }
  0x6e   :  { %2772 = vmatmul.mubr.bf16.gmra.mxu1 %v806_v7  ;;  %2791 = vmatprep.subr.bf16.mxu0 %v3001_v17  ;;  %v1411_v7 = vpack.c.bf16 %v3673_v27, %v3497_v10 }
  0x6f   :  { %2820 = vmatpush3.bf16.msra.mxu1 %v2998_v20  ;;  %2775 = vmatprep.mubr.bf16.mxu1 %v807_v24  ;;  %v3009_v20 = vld [vmem:[%s3922_s4 + $0x1a8] sm:$0xff]  }
  0x70   :  { %2821 = vmatprep.subr.bf16.mxu1 %v3000_v0  ;;  %2744 = vmatmul.mubr.bf16.gmra.mxu0 %v3553_v61 }
  0x71   :  { %2792 = vmatpush3.bf16.msra.mxu0 %v3001_v17  ;;  %2795 = vmatprep.mubr.bf16.mxu0 %v1003_v1 }
  0x72   :  { %2793 = vmatprep.subr.bf16.mxu0 %v3003_v41 }
  0x73   :  { %2822 = vmatpush3.bf16.msra.mxu1 %v3000_v0 }
  0x74   :  { %2823 = vmatprep.subr.bf16.mxu1 %v3002_v57 }
  0x75   :  { %2794 = vmatpush3.bf16.msra.mxu0 %v3003_v41 }
  0x76   :  { %2776 = vmatmul.mubr.bf16.gmra.mxu1 %v808_v30  ;;  %2843 = vmatprep.subr.bf16.mxu0 %v3005_v31 }
  0x77   :  { %2824 = vmatpush3.bf16.msra.mxu1 %v3002_v57  ;;  %2827 = vmatprep.mubr.bf16.mxu1 %v1205_v9 }
  0x78   :  { %2825 = vmatprep.subr.bf16.mxu1 %v3004_v16  ;;  %2796 = vmatmul.mubr.bf16.vlgmr.msra.gmra.mxu0 %v1004_v58  ;;  %v3010_v58 = vld [vmem:[%s3922_s4 + $0x1e8] sm:$0xff]  }
  0x79   :  { %2844 = vmatpush3.bf16.msra.mxu0 %v3005_v31  ;;  %2799 = vmatprep.mubr.bf16.mxu0 %v1005_v60  ;;  %v3930_v60 = vpack.c.bf16 %v3273_v46, %v3251_v37  ;;  %v3015_v37 = vld [vmem:[%s3922_s4 + $0x190] sm:$0xff]   ;;  %v3931_v46 = vpack.c.bf16 %v3278_v50, %v3275_v47  ;;  %v1211_v47 = vpack.c.bf16 %v3537_v28, %v3514_v6  ;;  %v3023_v28 = vld [vmem:[%s3922_s4 + $0x228] sm:$0xff]  }
  0x7a   :  { %2845 = vmatprep.subr.bf16.mxu0 %v3007_v59  ;;  %v3016_v50 = vld [vmem:[%s3922_s4 + $0x1d0] sm:$0xff]   ;;  %v3933_v6 = vpack.c.bf16 %v3321_v5, %v3296_v56  ;;  %v3020_v56 = vld [vmem:[%s3922_s4 + $0x1c0] sm:$0xff]  }
  0x7b   :  { %2826 = vmatpush3.bf16.msra.mxu1 %v3004_v16 }
  0x7c   :  { %2875 = vmatprep.subr.bf16.mxu1 %v3006_v51 }
  0x7d   :  { %2846 = vmatpush3.bf16.msra.mxu0 %v3007_v59 }
  0x7e   :  { %2828 = vmatmul.mubr.bf16.vlgmr.msra.gmra.mxu1 %v1206_v14  ;;  %2847 = vmatprep.subr.bf16.mxu0 %v3009_v20 }
  0x7f   :  { %2876 = vmatpush3.bf16.msra.mxu1 %v3006_v51  ;;  %2831 = vmatprep.mubr.bf16.mxu1 %v1207_v32 }
  0x80   :  { %2877 = vmatprep.subr.bf16.mxu1 %v3008_v33  ;;  %2800 = vmatmul.mubr.bf16.gmra.mxu0 %v1006_v13  ;;  %v3012_v13 = vld [vmem:[%s3922_s4 + $0x1e0] sm:$0xff]  }
  0x81   :  { %2848 = vmatpush3.bf16.msra.mxu0 %v3009_v20  ;;  %2803 = vmatprep.mubr.bf16.mxu0 %v3930_v60 }
  0x82   :  { %2849 = vmatprep.subr.bf16.mxu0 %v3011_v34 }
  0x83   :  { %2878 = vmatpush3.bf16.msra.mxu1 %v3008_v33 }
  0x84   :  { %2879 = vmatprep.subr.bf16.mxu1 %v3010_v58 }
  0x85   :  { %2850 = vmatpush3.bf16.msra.mxu0 %v3011_v34 }
  0x86   :  { %2832 = vmatmul.mubr.bf16.gmra.mxu1 %v1208_v15  ;;  %2851 = vmatprep.subr.bf16.mxu0 %v3013_v25 }
  0x87   :  { %2880 = vmatpush3.bf16.msra.mxu1 %v3010_v58  ;;  %2835 = vmatprep.mubr.bf16.mxu1 %v1209_v36 }
  0x88   :  { %2881 = vmatprep.subr.bf16.mxu1 %v3012_v13  ;;  %2804 = vmatmul.mubr.bf16.gmra.mxu0 %v3931_v46 }
  0x89   :  { %2852 = vmatpush3.bf16.msra.mxu0 %v3013_v25  ;;  %2807 = vmatprep.mubr.bf16.mxu0 %v3932_v49 }
  0x8a   :  { %2853 = vmatprep.subr.bf16.mxu0 %v3015_v37 }
  0x8b   :  { %2882 = vmatpush3.bf16.msra.mxu1 %v3012_v13 }
  0x8c   :  { %2883 = vmatprep.subr.bf16.mxu1 %v3014_v23 }
  0x8d   :  { %2854 = vmatpush3.bf16.msra.mxu0 %v3015_v37 }
  0x8e   :  { %2836 = vmatmul.mubr.bf16.gmra.mxu1 %v1210_v53  ;;  %2855 = vmatprep.subr.bf16.mxu0 %v3017_v26 }
  0x8f   :  { %2884 = vmatpush3.bf16.msra.mxu1 %v3014_v23  ;;  %2839 = vmatprep.mubr.bf16.mxu1 %v1211_v47 }
  0x90   :  { %2885 = vmatprep.subr.bf16.mxu1 %v3016_v50  ;;  %2808 = vmatmul.mubr.bf16.gmra.mxu0 %v3933_v6 }
  0x91   :  { %2856 = vmatpush3.bf16.msra.mxu0 %v3017_v26  ;;  %2859 = vmatprep.mubr.bf16.mxu0 %v3329_v8  ;;  %v3022_v8 = vld [vmem:[%s3922_s4 + $0x230] sm:$0xff]  }
  0x92   :  { %2857 = vmatprep.subr.bf16.mxu0 %v3019_v54 }
  0x93   :  { %2886 = vmatpush3.bf16.msra.mxu1 %v3016_v50 }
  0x94   :  { %2887 = vmatprep.subr.bf16.mxu1 %v3018_v63 }
  0x95   :  { %2858 = vmatpush3.bf16.msra.mxu0 %v3019_v54 }
  0x96   :  { %2840 = vmatmul.mubr.bf16.gmra.mxu1 %v1212_v39  ;;  %2907 = vmatprep.subr.bf16.mxu0 %v3021_v11 }
  0x97   :  { %2888 = vmatpush3.bf16.msra.mxu1 %v3018_v63  ;;  %2891 = vmatprep.mubr.bf16.mxu1 %v3259_v40  ;;  %v3024_v40 = vld [vmem:[%s3922_s4 + $0x220] sm:$0xff]  }
  0x98   :  { %2889 = vmatprep.subr.bf16.mxu1 %v3020_v56  ;;  %2860 = vmatmul.mubr.bf16.vlgmr.msra.gmra.mxu0 %v3340_v12  ;;  %v1601_v12 = vld [vmem:[#allocation2 + $0x91] sm:$0xff] }
  0x99   :  { %2908 = vmatpush3.bf16.msra.mxu0 %v3021_v11  ;;  %2863 = vmatprep.mubr.bf16.mxu0 %v3370_v21  ;;  %v1613_v21 = vpack.c.bf16 %v1601_v12, %v3319_v4  ;;  %v3027_v4 = vld [vmem:[%s3922_s4 + $0x208] sm:$0xff]  }
  0x9a   :  { %2909 = vmatprep.subr.bf16.mxu0 %v3022_v8 }
  0x9b   :  { %2890 = vmatpush3.bf16.msra.mxu1 %v3020_v56 }
  0x9c   :  { %2939 = vmatprep.subr.bf16.mxu1 %v3021_v11 }
  0x9d   :  { %2910 = vmatpush3.bf16.msra.mxu0 %v3022_v8 }
  0x9e   :  { %2892 = vmatmul.mubr.bf16.vlgmr.msra.gmra.mxu1 %v3268_v44  ;;  %2911 = vmatprep.subr.bf16.mxu0 %v3023_v28  ;;  %v3025_v44 = vld [vmem:[%s3922_s4 + $0x218] sm:$0xff]  }
  0x9f   :  { %2947 = vmatpush3.bf16.msra.mxu1 %v3021_v11  ;;  %2895 = vmatprep.mubr.bf16.mxu1 %v3316_v3  ;;  %v3026_v3 = vld [vmem:[%s3922_s4 + $0x210] sm:$0xff]  }
  0xa0   :  { %2940 = vmatprep.subr.bf16.mxu1 %v3022_v8  ;;  %2864 = vmatmul.mubr.bf16.gmra.mxu0 %v1411_v7 }
  0xa1   :  { %2912 = vmatpush3.bf16.msra.mxu0 %v3023_v28  ;;  %2867 = vmatprep.mubr.bf16.mxu0 %v3407_v45  ;;  %v1415_v45 = vpack.c.bf16 %v3673_v27, %v3560_v42 }
  0xa2   :  { %2913 = vmatprep.subr.bf16.mxu0 %v3024_v40 }
  0xa3   :  { %2948 = vmatpush3.bf16.msra.mxu1 %v3022_v8 }
  0xa4   :  { %2941 = vmatprep.subr.bf16.mxu1 %v3023_v28 }
  0xa5   :  { %2914 = vmatpush3.bf16.msra.mxu0 %v3024_v40 }
  0xa6   :  { %2896 = vmatmul.mubr.bf16.gmra.mxu1 %v1613_v21  ;;  %2915 = vmatprep.subr.bf16.mxu0 %v3025_v44 }
  0xa7   :  { %2949 = vmatpush3.bf16.msra.mxu1 %v3023_v28  ;;  %2899 = vmatprep.mubr.bf16.mxu1 %v3374_v22  ;;  %v3028_v22 = vld [vmem:[%s3922_s4 + $0x200] sm:$0xff]  }
  0xa8   :  { %2942 = vmatprep.subr.bf16.mxu1 %v3024_v40  ;;  %2868 = vmatmul.mubr.bf16.gmra.mxu0 %v3417_v52  ;;  %v1609_v52 = vld [vmem:[#allocation2 + $0x131] sm:$0xff] }
  0xa9   :  { %2916 = vmatpush3.bf16.msra.mxu0 %v3025_v44  ;;  %2871 = vmatprep.mubr.bf16.mxu0 %v3445_v19  ;;  %v1617_v19 = vpack.c.bf16 %v1609_v52, %v3321_v5  ;;  %v1811_v5 = vld [vmem:[#allocation2 + $0x132] sm:$0xff] }
  0xaa   :  { %2917 = vmatprep.subr.bf16.mxu0 %v3026_v3 }
  0xab   :  { %2950 = vmatpush3.bf16.msra.mxu1 %v3024_v40 }
  0xac   :  { %2943 = vmatprep.subr.bf16.mxu1 %v3025_v44 }
  0xad   :  { %2918 = vmatpush3.bf16.msra.mxu0 %v3026_v3 }
  0xae   :  { %2900 = vmatmul.mubr.bf16.gmra.mxu1 %v3388_v29  ;;  %2919 = vmatprep.subr.bf16.mxu0 %v3027_v4  ;;  %v1803_v29 = vld [vmem:[#allocation2 + $0x92] sm:$0xff] }
  0xaf   :  { %2951 = vmatpush3.bf16.msra.mxu1 %v3025_v44  ;;  %2903 = vmatprep.mubr.bf16.mxu1 %v3411_v48  ;;  %v1815_v48 = vpack.c.bf16 %v1803_v29, %v3601_v35 }
  0xb0   :  { %2944 = vmatprep.subr.bf16.mxu1 %v3026_v3  ;;  %2872 = vmatmul.mubr.bf16.gmra.mxu0 %v1415_v45 }
  0xb1   :  { %2920 = vmatpush3.bf16.msra.mxu0 %v3027_v4  ;;  %2923 = vmatprep.mubr.bf16.mxu0 %v3458_v38  ;;  %v1819_v38 = vpack.c.bf16 %v1811_v5, %v3647_v55 }
  0xb2   :  { %2921 = vmatprep.subr.bf16.mxu0 %v3028_v22 }
  0xb3   :  { %2952 = vmatpush3.bf16.msra.mxu1 %v3026_v3 }
  0xb4   :  { %2945 = vmatprep.subr.bf16.mxu1 %v3027_v4 }
  0xb5   :  { %2922 = vmatpush3.bf16.msra.mxu0 %v3028_v22 }
  0xb6   :  { %2904 = vmatmul.mubr.bf16.gmra.mxu1 %v1617_v19 }
  0xb7   :  { %2953 = vmatpush3.bf16.msra.mxu1 %v3027_v4  ;;  %2931 = vmatprep.mubr.bf16.mxu1 %v3523_v18 }
  0xb8   :  { %2946 = vmatprep.subr.bf16.mxu1 %v3028_v22  ;;  %2924 = vmatmul.mubr.bf16.vlgmr.msra.gmra.mxu0 %v3462_v43 }
  0xb9   :  { %2927 = vmatprep.mubr.bf16.mxu0 %v3491_v2 }
  0xbb   :  { %2954 = vmatpush3.bf16.msra.mxu1 %v3028_v22 }
  0xbe   :  { %2932 = vmatmul.mubr.bf16.vlgmr.msra.gmra.mxu1 %v3527_v62 }
  0xbf   :  { %2935 = vmatprep.mubr.bf16.mxu1 %v3553_v61 }
  0xc0   :  { %2928 = vmatmul.mubr.bf16.gmra.mxu0 %v1815_v48 }
  0xc6   :  { %2936 = vmatmul.mubr.bf16.gmra.mxu1 %v1819_v38 }
  0xf6   :  { %v2669_v10 = vpop.f32.mrf.mxu0 }
  0xf8   :  { %v375_v18 = vpop.f32.mrf.mxu0 }
  0xfa   :  { %v2670_v17 = vpop.f32.mrf.mxu0 }
  0xfc   :  { %v378_v24 = vpop.f32.mrf.mxu0 }
  0xfe   :  { %v2701_v43 = vpop.f32.mrf.mxu1  ;;  %v2673_v0 = vpop.f32.mrf.mxu0 }
  0xff   :  { %v529_v2 = vadd.f32 %v2701_v43, %v2669_v10 }
 0x100   :  { %v520_v1 = vpop.f32.mrf.mxu1  ;;  %v391_v41 = vpop.f32.mrf.mxu0 }
 0x101   :  { %v521_v42 = vadd.f32 %v520_v1, %v375_v18 }
 0x102   :  { %v2702_v57 = vpop.f32.mrf.mxu1  ;;  %v2674_v30 = vpop.f32.mrf.mxu0 }
 0x103   :  { %v532_v62 = vadd.f32 %v2702_v57, %v2670_v17 }
 0x104   :  { %v523_v31 = vpop.f32.mrf.mxu1  ;;  %v394_v61 = vpop.f32.mrf.mxu0 }
 0x105   :  { %v524_v9 = vadd.f32 %v523_v31, %v378_v24 }
 0x106   :  { %v2705_v16 = vpop.f32.mrf.mxu1  ;;  %v2677_v59 = vpop.f32.mrf.mxu0 }
 0x107   :  { %v545_v51 = vadd.f32 %v2705_v16, %v2673_v0 }
 0x108   :  { %v536_v14 = vpop.f32.mrf.mxu1  ;;  %v407_v20 = vpop.f32.mrf.mxu0 }
 0x109   :  { %v537_v32 = vadd.f32 %v536_v14, %v391_v41 }
 0x10a   :  { %v2706_v33 = vpop.f32.mrf.mxu1  ;;  %v2678_v34 = vpop.f32.mrf.mxu0 }
 0x10b   :  { %v548_v35 = vadd.f32 %v2706_v33, %v2674_v30 }
 0x10c   :  { %v539_v58 = vpop.f32.mrf.mxu1  ;;  %v410_v60 = vpop.f32.mrf.mxu0 }
 0x10d   :  { %v540_v15 = vadd.f32 %v539_v58, %v394_v61 }
 0x10e   :  { %v2709_v25 = vpop.f32.mrf.mxu1  ;;  %v2681_v36 = vpop.f32.mrf.mxu0 }
 0x10f   :  { %v561_v13 = vadd.f32 %v2709_v25, %v2677_v59 }
 0x110   :  { %v552_v37 = vpop.f32.mrf.mxu1  ;;  %v423_v46 = vpop.f32.mrf.mxu0 }
 0x111   :  { %v553_v23 = vadd.f32 %v552_v37, %v407_v20 }
 0x112   :  { %v2710_v49 = vpop.f32.mrf.mxu1  ;;  %v2682_v53 = vpop.f32.mrf.mxu0 }
 0x113   :  { %v564_v26 = vadd.f32 %v2710_v49, %v2678_v34 }
 0x114   :  { %v555_v47 = vpop.f32.mrf.mxu1  ;;  %v426_v50 = vpop.f32.mrf.mxu0 }
 0x115   :  { %v556_v54 = vadd.f32 %v555_v47, %v410_v60 }
 0x116   :  { %v2713_v55 = vpop.f32.mrf.mxu1 }
 0x117   :  { %v577_v6 = vadd.f32 %v2713_v55, %v2681_v36 }
 0x118   :  { %v568_v63 = vpop.f32.mrf.mxu1  ;;  %v2733_v39 = vpop.f32.mrf.mxu0 }
 0x119   :  { %v569_v11 = vadd.f32 %v568_v63, %v423_v46  ;;  %v771_v56 = vadd.f32 %v2733_v39, %v529_v2 }
 0x11a   :  { %v2714_v8 = vpop.f32.mrf.mxu1  ;;  %v706_v28 = vpop.f32.mrf.mxu0 }
 0x11b   :  { %v580_v7 = vadd.f32 %v2714_v8, %v2682_v53  ;;  %v769_v40 = vadd.f32 %v706_v28, %v521_v42 }
 0x11c   :  { %v571_v12 = vpop.f32.mrf.mxu1  ;;  %v2734_v21 = vpop.f32.mrf.mxu0 }
 0x11d   :  { %v572_v44 = vadd.f32 %v571_v12, %v426_v50  ;;  %v772_v3 = vadd.f32 %v2734_v21, %v532_v62 }
 0x11e   :  { %v2765_v4 = vpop.f32.mrf.mxu1  ;;  %v709_v45 = vpop.f32.mrf.mxu0 }
 0x11f   :  { %v3716_v22 = vadd.f32 %v2765_v4, %v771_v56  ;;  %v770_v52 = vadd.f32 %v709_v45, %v524_v9 }
 0x120   :  { %v908_v19 = vpop.f32.mrf.mxu1  ;;  %v2737_v29 = vpop.f32.mrf.mxu0 }
 0x121   :  { %v3718_v48 = vadd.f32 %v908_v19, %v769_v40  ;;  %v775_v5 = vadd.f32 %v2737_v29, %v545_v51 }
 0x122   :  { %v2766_v38 = vpop.f32.mrf.mxu1  ;;  %v722_v10 = vpop.f32.mrf.mxu0 }
 0x123   :  { %v3720_v18 = vadd.f32 %v2766_v38, %v772_v3  ;;  %v773_v17 = vadd.f32 %v722_v10, %v537_v32 }
 0x124   :  { %v911_v24 = vpop.f32.mrf.mxu1  ;;  %v2738_v43 = vpop.f32.mrf.mxu0 }
 0x125   :  { %v3722_v0 = vadd.f32 %v911_v24, %v770_v52  ;;  %v776_v2 = vadd.f32 %v2738_v43, %v548_v35 }
 0x126   :  { %v2769_v1 = vpop.f32.mrf.mxu1  ;;  %v725_v27 = vpop.f32.mrf.mxu0 }
 0x127   :  { %v3724_v41 = vadd.f32 %v2769_v1, %v775_v5  ;;  %v774_v42 = vadd.f32 %v725_v27, %v540_v15 }
 0x128   :  { %v924_v57 = vpop.f32.mrf.mxu1  ;;  %v2741_v30 = vpop.f32.mrf.mxu0 }
 0x129   :  { %v975_v62 = vadd.f32 %v924_v57, %v773_v17  ;;  %v779_v31 = vadd.f32 %v2741_v30, %v561_v13 }
 0x12a   :  { %v2770_v61 = vpop.f32.mrf.mxu1  ;;  %v738_v9 = vpop.f32.mrf.mxu0 }
 0x12b   :  { %v3726_v16 = vadd.f32 %v2770_v61, %v776_v2  ;;  %v777_v59 = vadd.f32 %v738_v9, %v553_v23 }
 0x12c   :  { %v927_v51 = vpop.f32.mrf.mxu1  ;;  %v2742_v14 = vpop.f32.mrf.mxu0 }
 0x12d   :  { %v3728_v20 = vadd.f32 %v927_v51, %v774_v42  ;;  %v780_v32 = vadd.f32 %v2742_v14, %v564_v26 }
 0x12e   :  { %v2773_v33 = vpop.f32.mrf.mxu1  ;;  %v741_v34 = vpop.f32.mrf.mxu0 }
 0x12f   :  { %v3730_v35 = vadd.f32 %v2773_v33, %v779_v31  ;;  %v778_v58 = vadd.f32 %v741_v34, %v556_v54 }
 0x130   :  { %v940_v60 = vpop.f32.mrf.mxu1  ;;  %v2745_v15 = vpop.f32.mrf.mxu0 }
 0x131   :  { %v3732_v25 = vadd.f32 %v940_v60, %v777_v59  ;;  %v783_v36 = vadd.f32 %v2745_v15, %v577_v6 }
 0x132   :  { %v2774_v13 = vpop.f32.mrf.mxu1  ;;  %v754_v37 = vpop.f32.mrf.mxu0 }
 0x133   :  { %v3734_v46 = vadd.f32 %v2774_v13, %v780_v32  ;;  %v781_v23 = vadd.f32 %v754_v37, %v569_v11 }
 0x134   :  { %v943_v49 = vpop.f32.mrf.mxu1  ;;  %v2746_v53 = vpop.f32.mrf.mxu0 }
 0x135   :  { %v3736_v47 = vadd.f32 %v943_v49, %v778_v58  ;;  %v784_v26 = vadd.f32 %v2746_v53, %v580_v7 }
 0x136   :  { %v2777_v50 = vpop.f32.mrf.mxu1  ;;  %v757_v55 = vpop.f32.mrf.mxu0 }
 0x137   :  { %v3738_v63 = vadd.f32 %v2777_v50, %v783_v36  ;;  %v782_v54 = vadd.f32 %v757_v55, %v572_v44 }
 0x138   :  { %v956_v39 = vpop.f32.mrf.mxu1  ;;  %v2797_v56 = vpop.f32.mrf.mxu0 }
 0x139   :  { %v3740_v8 = vadd.f32 %v956_v39, %v781_v23 }
 0x13a   :  { %v2778_v6 = vpop.f32.mrf.mxu1  ;;  %v1110_v28 = vpop.f32.mrf.mxu0 }
 0x13b   :  { %v3742_v40 = vadd.f32 %v2778_v6, %v784_v26 }
 0x13c   :  { %v959_v12 = vpop.f32.mrf.mxu1  ;;  %v2798_v11 = vpop.f32.mrf.mxu0 }
 0x13d   :  { %v3744_v21 = vadd.f32 %v959_v12, %v782_v54 }
 0x13e   :  { %v2829_v3 = vpop.f32.mrf.mxu1  ;;  %v1113_v4 = vpop.f32.mrf.mxu0 }
 0x140   :  { %v1312_v7 = vpop.f32.mrf.mxu1  ;;  %v2801_v45 = vpop.f32.mrf.mxu0 }
 0x142   :  { %v2830_v52 = vpop.f32.mrf.mxu1  ;;  %v1126_v19 = vpop.f32.mrf.mxu0 }
 0x143   :  { %v3746_v29 = vadd.f32 %v1126_v19, %v975_v62 }
 0x144   :  { %v1315_v44 = vpop.f32.mrf.mxu1  ;;  %v2802_v5 = vpop.f32.mrf.mxu0 }
 0x146   :  { %v2833_v38 = vpop.f32.mrf.mxu1  ;;  %v1129_v10 = vpop.f32.mrf.mxu0 }
 0x148   :  { %v1328_v17 = vpop.f32.mrf.mxu1  ;;  %v2805_v24 = vpop.f32.mrf.mxu0 }
 0x14a   :  { %v2834_v43 = vpop.f32.mrf.mxu1  ;;  %v1142_v2 = vpop.f32.mrf.mxu0 }
 0x14c   :  { %v1331_v1 = vpop.f32.mrf.mxu1  ;;  %v2806_v27 = vpop.f32.mrf.mxu0 }
 0x14e   :  { %v2837_v42 = vpop.f32.mrf.mxu1  ;;  %v1145_v57 = vpop.f32.mrf.mxu0 }
 0x150   :  { %v1344_v30 = vpop.f32.mrf.mxu1  ;;  %v2809_v31 = vpop.f32.mrf.mxu0 }
 0x152   :  { %v2838_v61 = vpop.f32.mrf.mxu1  ;;  %v3748_v9 = vpop.f32.mrf.mxu0 }
 0x154   :  { %v1347_v59 = vpop.f32.mrf.mxu1  ;;  %v3750_v62 = vpop.f32.mrf.mxu0 }
 0x156   :  { %v3752_v51 = vpop.f32.mrf.mxu1  ;;  %v3754_v14 = vpop.f32.mrf.mxu0 }
 0x158   :  { %v3756_v32 = vpop.f32.mrf.mxu1  ;;  %v2861_v33 = vpop.f32.mrf.mxu0 }
 0x15a   :  { %v3758_v34 = vpop.f32.mrf.mxu1  ;;  %v3760_v58 = vpop.f32.mrf.mxu0 }
 0x15b   :  { %3934 = vst [vmem:[#allocation3_spill] sm:$0xff] %v3758_v34 }
 0x15c   :  { %v3762_v60 = vpop.f32.mrf.mxu1  ;;  %v2862_v15 = vpop.f32.mrf.mxu0 }
 0x15d   :  { %3935 = vst [vmem:[#allocation4_spill] sm:$0xff] %v3762_v60 }
 0x15e   :  { %v2893_v36 = vpop.f32.mrf.mxu1  ;;  %v3764_v13 = vpop.f32.mrf.mxu0 }
 0x160   :  { %v3766_v37 = vpop.f32.mrf.mxu1  ;;  %v3768_v23 = vpop.f32.mrf.mxu0 }
 0x161   :  { %3936 = vst [vmem:[#allocation5_spill] sm:$0xff] %v3766_v37  ;;  %3937 = vst [vmem:[#allocation6_spill] sm:$0xff] %v3768_v23 }
 0x162   :  { %v2894_v49 = vpop.f32.mrf.mxu1  ;;  %v3770_v53 = vpop.f32.mrf.mxu0 }
 0x163   :  { %3938 = vst [vmem:[#allocation7_spill] sm:$0xff] %v3770_v53 }
 0x164   :  { %v3772_v26 = vpop.f32.mrf.mxu1  ;;  %v3774_v50 = vpop.f32.mrf.mxu0 }
 0x165   :  { %3939 = vst [vmem:[#allocation8_spill] sm:$0xff] %v3772_v26  ;;  %3940 = vst [vmem:[#allocation9_spill] sm:$0xff] %v3774_v50 }
 0x166   :  { %v3776_v55 = vpop.f32.mrf.mxu1  ;;  %v3778_v54 = vpop.f32.mrf.mxu0 }
 0x167   :  { %3941 = vst [vmem:[#allocation10_spill] sm:$0xff] %v3776_v55  ;;  %3942 = vst [vmem:[#allocation11_spill] sm:$0xff] %v3778_v54  ;;  %v1175_v54 = vadd.f32 %v2797_v56, %v3716_v22 }
 0x168   :  { %v3780_v39 = vpop.f32.mrf.mxu1  ;;  %v2869_v6 = vpop.f32.mrf.mxu0 }
 0x169   :  { %3943 = vst [vmem:[#allocation12_spill] sm:$0xff] %v3780_v39  ;;  %v1173_v39 = vadd.f32 %v1110_v28, %v3718_v48  ;;  %v1180_v48 = vadd.f32 %v2802_v5, %v3726_v16  ;;  %v1379_v28 = vadd.f32 %v1328_v17, %v3746_v29  ;;  %v1187_v29 = vadd.f32 %v2809_v31, %v3738_v63 }
 0x16a   :  { %v3782_v12 = vpop.f32.mrf.mxu1  ;;  %v3784_v19 = vpop.f32.mrf.mxu0 }
 0x16b   :  { %3944 = vst [vmem:[#allocation13_spill] sm:$0xff] %v3782_v12  ;;  %3945 = vst [vmem:[#allocation14_spill] sm:$0xff] %v3784_v19  ;;  %v1176_v12 = vadd.f32 %v2798_v11, %v3720_v18  ;;  %v1178_v18 = vadd.f32 %v1129_v10, %v3728_v20  ;;  %v1183_v11 = vadd.f32 %v2805_v24, %v3730_v35 }
 0x16c   :  { %v3786_v60 = vpop.f32.mrf.mxu1  ;;  %v3788_v23 = vpop.f32.mrf.mxu0  ;;  %v1389_v24 = vadd.f32 %v3752_v51, %v1187_v29 }
 0x16d   :  { %3946 = vst [vmem:[#allocation15_spill] sm:$0xff] %v3786_v60  ;;  %3947 = vst [vmem:[#allocation16_spill] sm:$0xff] %v3788_v23  ;;  %v1174_v60 = vadd.f32 %v1113_v4, %v3722_v0  ;;  %v1179_v23 = vadd.f32 %v2801_v45, %v3724_v41  ;;  %v1378_v34 = vadd.f32 %v2830_v52, %v1176_v12 }
 0x16e   :  { %v3790_v53 = vpop.f32.mrf.mxu1  ;;  %v3792_v26 = vpop.f32.mrf.mxu0  ;;  %v1181_v0 = vadd.f32 %v1142_v2, %v3732_v25  ;;  %v1184_v41 = vadd.f32 %v2806_v27, %v3734_v46  ;;  %v1380_v45 = vadd.f32 %v1331_v1, %v1178_v18  ;;  %v1182_v52 = vadd.f32 %v1145_v57, %v3736_v47 }
 0x16f   :  { %3948 = vst [vmem:[#allocation17_spill] sm:$0xff] %v3790_v53  ;;  %3949 = vst [vmem:[#allocation18_spill] sm:$0xff] %v3792_v26  ;;  %v1377_v53 = vadd.f32 %v2829_v3, %v1175_v54  ;;  %v1375_v26 = vadd.f32 %v1312_v7, %v1173_v39  ;;  %v1376_v22 = vadd.f32 %v1315_v44, %v1174_v60 }
 0x170   :  { %v3794_v50 = vpop.f32.mrf.mxu1  ;;  %v3796_v55 = vpop.f32.mrf.mxu0  ;;  %v1381_v56 = vadd.f32 %v2833_v38, %v1179_v23  ;;  %v1382_v7 = vadd.f32 %v2834_v43, %v1180_v48  ;;  %v1385_v16 = vadd.f32 %v2837_v42, %v1183_v11  ;;  %v1383_v5 = vadd.f32 %v1344_v30, %v1181_v0  ;;  %v3952_v30 = vld [vmem:[#allocation3_spill] sm:$0xff] }
 0x171   :  { %3950 = vst [vmem:[#allocation19_spill] sm:$0xff] %v3794_v50  ;;  %3951 = vst [vmem:[#allocation20_spill] sm:$0xff] %v3796_v55  ;;  %v1580_v44 = vadd.f32 %v2861_v33, %v1377_v53  ;;  %v1386_v20 = vadd.f32 %v2838_v61, %v1184_v41  ;;  %v1384_v25 = vadd.f32 %v1347_v59, %v1182_v52  ;;  %v3953_v61 = vld [vmem:[#allocation5_spill] sm:$0xff]  ;;  %v3954_v59 = vld [vmem:[#allocation6_spill] sm:$0xff] }
 0x172   :  { %v3801_v37 = vpop.f32.mrf.mxu1  ;;  %v3803_v19 = vpop.f32.mrf.mxu0  ;;  %v1185_v46 = vadd.f32 %v3748_v9, %v3740_v8  ;;  %v1581_v17 = vadd.f32 %v2862_v15, %v1378_v34  ;;  %v1188_v47 = vadd.f32 %v3750_v62, %v3742_v40  ;;  %v1186_v43 = vadd.f32 %v3754_v14, %v3744_v21  ;;  %v3845_v21 = vld [vmem:[%s3928_s5] ss:$0 sm:$0xff]  ;;  %v3957_v60 = vld [vmem:[#allocation14_spill] sm:$0xff] }
 0x173   :  { %v1782_v10 = vadd.f32 %v2893_v36, %v1580_v44  ;;  %v1578_v2 = vadd.f32 %v3760_v58, %v1375_v26  ;;  %v1579_v8 = vadd.f32 %v3764_v13, %v1376_v22  ;;  %v1584_v40 = vadd.f32 %v3954_v59, %v1381_v56  ;;  %v3956_v34 = vld [vmem:[#allocation7_spill] sm:$0xff]  ;;  %v3958_v13 = vld [vmem:[#allocation9_spill] sm:$0xff] }
 0x174   :  { %v3807_v50 = vpop.f32.mrf.mxu1  ;;  %v3809_v55 = vpop.f32.mrf.mxu0  ;;  %v1387_v27 = vadd.f32 %v3756_v32, %v1185_v46  ;;  %v1783_v42 = vadd.f32 %v2894_v49, %v1581_v17  ;;  %v1390_v31 = vadd.f32 %v3952_v30, %v1188_v47  ;;  %v1588_v62 = vadd.f32 %v2869_v6, %v1385_v16  ;;  %v3955_v32 = vld [vmem:[#allocation8_spill] sm:$0xff]  ;;  %v3963_v41 = vld [vmem:[#allocation11_spill] sm:$0xff] }
 0x175   :  { %v1780_v9 = vadd.f32 %v3953_v61, %v1578_v2  ;;  %v1781_v33 = vadd.f32 %v3955_v32, %v1579_v8  ;;  %v1582_v58 = vadd.f32 %v3956_v34, %v1379_v28  ;;  %v1586_v15 = vadd.f32 %v3957_v60, %v1383_v5  ;;  %v3960_v26 = vld [vmem:[#allocation16_spill] sm:$0xff]  ;;  %v3962_v28 = vld [vmem:[#allocation10_spill] sm:$0xff] }
 0x176   :  { %v3817_v3 = vpop.f32.mrf.mxu1  ;;  %v3819_v4 = vpop.f32.mrf.mxu0  ;;  %v1585_v23 = vadd.f32 %v3958_v13, %v1382_v7  ;;  %v3959_v49 = vld [vmem:[#allocation17_spill] sm:$0xff]  ;;  %v1589_v54 = vadd.f32 %v3960_v26, %v1386_v20  ;;  %v1786_v0 = vadd.f32 %v3962_v28, %v1584_v40  ;;  %v1583_v52 = vadd.f32 %v3963_v41, %v1380_v45  ;;  %v3964_v44 = vld [vmem:[#allocation18_spill] sm:$0xff]  ;;  %v3965_v17 = vld [vmem:[#allocation4_spill] sm:$0xff] }
 0x177   :  { %v1790_v53 = vadd.f32 %v3959_v49, %v1588_v62  ;;  %v1587_v16 = vadd.f32 %v3964_v44, %v1384_v25  ;;  %v1388_v47 = vadd.f32 %v3965_v17, %v1186_v43  ;;  %v3966_v2 = vld [vmem:[#allocation12_spill] sm:$0xff]  ;;  %v1590_v62 = vadd.f32 %v3803_v19, %v1387_v27 }
 0x178   :  { %v3823_v38 = vpop.f32.mrf.mxu1  ;;  %v2925_v35 = vpop.f32.mrf.mxu0  ;;  %v3961_v22 = vld [vmem:[#allocation19_spill] sm:$0xff]  ;;  %v1791_v7 = vadd.f32 %v3801_v37, %v1589_v54  ;;  %v3969_v40 = vld [vmem:[#allocation20_spill] sm:$0xff] }
 0x179   :  { %v1984_v57 = vadd.f32 %v2925_v35, %v1782_v10  ;;  %v1788_v56 = vadd.f32 %v3961_v22, %v1586_v15  ;;  %v3968_v37 = vld [vmem:[#allocation15_spill] sm:$0xff]  ;;  %v1789_v25 = vadd.f32 %v3807_v50, %v1587_v16  ;;  %v1592_v43 = vadd.f32 %v3969_v40, %v1389_v24 }
 0x17a   :  { %v3833_v63 = vpop.f32.mrf.mxu1  ;;  %v1919_v1 = vpop.f32.mrf.mxu0  ;;  %v1785_v61 = vadd.f32 %v3968_v37, %v1583_v52  ;;  %v1591_v44 = vadd.f32 %v3819_v4, %v1388_v47  ;;  %v1792_v16 = vadd.f32 %v3823_v38, %v1590_v62 }
 0x17b   :  { %v1982_v6 = vadd.f32 %v1919_v1, %v1780_v9  ;;  %v2007_v48 = vadd.f32 %v3845_v21, %v1984_v57  ;;  %v1784_v1 = vadd.f32 %v3966_v2, %v1582_v58  ;;  %v1794_v22 = vadd.f32 %v3817_v3, %v1592_v43 }
 0x17c   :  { %v3840_v51 = vpop.f32.mrf.mxu1  ;;  %v2926_v14 = vpop.f32.mrf.mxu0 }
 0x17d   :  { %v1985_v36 = vadd.f32 %v2926_v14, %v1783_v42  ;;  %v3967_v42 = vld [vmem:[#allocation13_spill] sm:$0xff]  ;;  %v2005_v57 = vadd.f32 %v3845_v21, %v1982_v6  ;;  %v1593_v14 = vadd.f32 %v3809_v55, %v1390_v31 }
 0x17e   :  { %v2933_v39 = vpop.f32.mrf.mxu1  ;;  %v1922_v12 = vpop.f32.mrf.mxu0  ;;  %v1787_v8 = vadd.f32 %v3967_v42, %v1585_v23 }
 0x17f   :  { %v2008_v18 = vadd.f32 %v3845_v21, %v1985_v36  ;;  %v1983_v11 = vadd.f32 %v1922_v12, %v1781_v33  ;;  %v1992_v29 = vadd.f32 %v2933_v39, %v1790_v53 }
 0x180   :  { %v1951_v5 = vpop.f32.mrf.mxu1  ;;  %v2929_v20 = vpop.f32.mrf.mxu0 }
 0x181   :  { %v1990_v35 = vadd.f32 %v1951_v5, %v1788_v56  ;;  %v2022_v46 = vpack.c.bf16 %v2008_v18, %v2007_v48  ;;  %v2006_v10 = vadd.f32 %v3845_v21, %v1983_v11  ;;  %v1988_v59 = vadd.f32 %v2929_v20, %v1786_v0 }
 0x182   :  { %v2934_v45 = vpop.f32.mrf.mxu1  ;;  %v1935_v30 = vpop.f32.mrf.mxu0  ;;  %v2015_v58 = vadd.f32 %v3845_v21, %v1992_v29 }
 0x183   :  { %2500 = vst [vmem:[%s3929_s6 + $0x8] sm:$0xff] %v2022_v46   ;;  %v1993_v9 = vadd.f32 %v2934_v45, %v1791_v7  ;;  %v2021_v32 = vpack.c.bf16 %v2006_v10, %v2005_v57  ;;  %v2013_v60 = vadd.f32 %v3845_v21, %v1990_v35  ;;  %v2103_v36 = vunpack.c.l.bf16 %v2022_v46 }
 0x184   :  { %v1954_v33 = vpop.f32.mrf.mxu1  ;;  %v2930_v34 = vpop.f32.mrf.mxu0  ;;  %v2104_v31 = vunpack.c.h.bf16 %v2022_v46  ;;  %v2011_v53 = vadd.f32 %v3845_v21, %v1988_v59  ;;  %v1986_v48 = vadd.f32 %v1935_v30, %v1784_v1  ;;  %v1795_v7 = vadd.f32 %v3833_v63, %v1593_v14 }
 0x185   :  { %v2016_v50 = vadd.f32 %v3845_v21, %v1993_v9  ;;  %v1991_v15 = vadd.f32 %v1954_v33, %v1789_v25  ;;  %2457 = vst [vmem:[%s3929_s6] sm:$0xff] %v2021_v32   ;;  %v2101_v24 = vunpack.c.l.bf16 %v2021_v32  ;;  %v2102_v13 = vunpack.c.h.bf16 %v2021_v32 }
 0x186   :  { %v2937_v19 = vpop.f32.mrf.mxu1  ;;  %v1989_v27 = vadd.f32 %v2930_v34, %v1787_v8  ;;  %v1938_v55 = vpop.f32.mrf.mxu0  ;;  %v2141_v11 = vmul.f32 %v2103_v36, %v2103_v36  ;;  %v2142_v5 = vmul.f32 %v2104_v31, %v2104_v31  ;;  %v1793_v35 = vadd.f32 %v3840_v51, %v1591_v44 }
 0x187   :  { %v3879_v23 = vpack.c.bf16 %v2016_v50, %v2015_v58  ;;  %v2014_v49 = vadd.f32 %v3845_v21, %v1991_v15  ;;  %v2118_v26 = vadd.f32 %v2102_v13, %v2101_v24  ;;  %v2139_v54 = vmul.f32 %v2101_v24, %v2101_v24 }
 0x188   :  { %v2140_v39 = vmul.f32 %v2102_v13, %v2102_v13  ;;  %v1967_v6 = vpop.f32.mrf.mxu1  ;;  %v2012_v12 = vadd.f32 %v3845_v21, %v1989_v27  ;;  %v1987_v18 = vadd.f32 %v1938_v55, %v1785_v61  ;;  %v1996_v3 = vadd.f32 %v2937_v19, %v1794_v22 }
 0x189   :  { %2504 = vst [vmem:[%s3929_s6 + $0x28] sm:$0xff] %v3879_v23   ;;  %v2025_v56 = vpack.c.bf16 %v2014_v49, %v2013_v60  ;;  %v2119_v28 = vadd.f32 %v2118_v26, %v2103_v36  ;;  %v2009_v63 = vadd.f32 %v3845_v21, %v1986_v48  ;;  %v1994_v10 = vadd.f32 %v1967_v6, %v1792_v16 }
 0x18a   :  { %v2155_v0 = vadd.f32 %v2140_v39, %v2139_v54  ;;  %v2024_v41 = vpack.c.bf16 %v2012_v12, %v2011_v53  ;;  %v2938_v52 = vpop.f32.mrf.mxu1  ;;  %v2010_v4 = vadd.f32 %v3845_v21, %v1987_v18  ;;  %v2019_v2 = vadd.f32 %v3845_v21, %v1996_v3 }
 0x18b   :  { %2503 = vst [vmem:[%s3929_s6 + $0x20] sm:$0xff] %v2025_v56   ;;  %v1997_v46 = vadd.f32 %v2938_v52, %v1795_v7  ;;  %v2120_v17 = vadd.f32 %v2119_v28, %v2104_v31  ;;  %v2017_v30 = vadd.f32 %v3845_v21, %v1994_v10  ;;  %v2109_v14 = vunpack.c.l.bf16 %v2025_v56 }
 0x18c   :  { %v2156_v20 = vadd.f32 %v2155_v0, %v2141_v11  ;;  %2502 = vst [vmem:[%s3929_s6 + $0x18] sm:$0xff] %v2024_v41   ;;  %v1970_v29 = vpop.f32.mrf.mxu1  ;;  %v2023_v1 = vpack.c.bf16 %v2010_v4, %v2009_v63  ;;  %v2107_v37 = vunpack.c.l.bf16 %v2024_v41  ;;  %v2108_v59 = vunpack.c.h.bf16 %v2024_v41 }
 0x18d   :  { %v2020_v38 = vadd.f32 %v3845_v21, %v1997_v46  ;;  %v1995_v42 = vadd.f32 %v1970_v29, %v1793_v35  ;;  %v2110_v34 = vunpack.c.h.bf16 %v2025_v56  ;;  %v2111_v15 = vunpack.c.l.bf16 %v3879_v23 }
 0x18e   :  { %v2157_v47 = vadd.f32 %v2156_v20, %v2142_v5  ;;  %2501 = vst [vmem:[%s3929_s6 + $0x10] sm:$0xff] %v2023_v1   ;;  %v2105_v51 = vunpack.c.l.bf16 %v2023_v1  ;;  %v2106_v57 = vunpack.c.h.bf16 %v2023_v1  ;;  %v2145_v32 = vmul.f32 %v2107_v37, %v2107_v37  ;;  %v2117_v1 = vld [vmem:[%s3927_s7] sm:$0x3] }
 0x18f   :  { %v2028_v8 = vpack.c.bf16 %v2020_v38, %v2019_v2  ;;  %v2018_v45 = vadd.f32 %v3845_v21, %v1995_v42  ;;  %v2146_v58 = vmul.f32 %v2108_v59, %v2108_v59  ;;  %v2147_v36 = vmul.f32 %v2109_v14, %v2109_v14 }
 0x190   :  { %v2121_v61 = vadd.f32 %v2120_v17, %v2105_v51  ;;  %v2143_v25 = vmul.f32 %v2105_v51, %v2105_v51  ;;  %v2144_v43 = vmul.f32 %v2106_v57, %v2106_v57  ;;  %v2112_v19 = vunpack.c.h.bf16 %v3879_v23 }
 0x191   :  { %2506 = vst [vmem:[%s3929_s6 + $0x38] sm:$0xff] %v2028_v8   ;;  %v2027_v9 = vpack.c.bf16 %v2018_v45, %v2017_v30  ;;  %v2148_v27 = vmul.f32 %v2110_v34, %v2110_v34  ;;  %v2149_v49 = vmul.f32 %v2111_v15, %v2111_v15  ;;  %v2115_v56 = vunpack.c.l.bf16 %v2028_v8 }
 0x192   :  { %v2122_v40 = vadd.f32 %v2121_v61, %v2106_v57  ;;  %v2158_v62 = vadd.f32 %v2157_v47, %v2143_v25  ;;  %v2150_v39 = vmul.f32 %v2112_v19, %v2112_v19  ;;  %v2116_v28 = vunpack.c.h.bf16 %v2028_v8 }
 0x193   :  { %2505 = vst [vmem:[%s3929_s6 + $0x30] sm:$0xff] %v2027_v9   ;;  %v2113_v53 = vunpack.c.l.bf16 %v2027_v9  ;;  %v2114_v6 = vunpack.c.h.bf16 %v2027_v9  ;;  %v2153_v23 = vmul.f32 %v2115_v56, %v2115_v56 }
 0x194   :  { %v2123_v33 = vadd.f32 %v2122_v40, %v2107_v37  ;;  %v2159_v21 = vadd.f32 %v2158_v62, %v2144_v43  ;;  %v2154_v3 = vmul.f32 %v2116_v28, %v2116_v28 }
 0x195   :  { %v2151_v18 = vmul.f32 %v2113_v53, %v2113_v53  ;;  %v2152_v41 = vmul.f32 %v2114_v6, %v2114_v6 }
 0x196   :  { %v2124_v60 = vadd.f32 %v2123_v33, %v2108_v59  ;;  %v2160_v50 = vadd.f32 %v2159_v21, %v2145_v32 }
 0x198   :  { %v2125_v24 = vadd.f32 %v2124_v60, %v2109_v14  ;;  %v2161_v13 = vadd.f32 %v2160_v50, %v2146_v58 }
 0x19a   :  { %v2162_v55 = vadd.f32 %v2161_v13, %v2147_v36  ;;  %v2126_v31 = vadd.f32 %v2125_v24, %v2110_v34 }
 0x19c   :  { %v2127_v26 = vadd.f32 %v2126_v31, %v2111_v15  ;;  %v2163_v54 = vadd.f32 %v2162_v55, %v2148_v27 }
 0x19e   :  { %v2128_v12 = vadd.f32 %v2127_v26, %v2112_v19  ;;  %v2164_v22 = vadd.f32 %v2163_v54, %v2149_v49 }
 0x1a0   :  { %v2129_v48 = vadd.f32 %v2128_v12, %v2113_v53  ;;  %v2165_v11 = vadd.f32 %v2164_v22, %v2150_v39 }
 0x1a2   :  { %v2130_v0 = vadd.f32 %v2129_v48, %v2114_v6  ;;  %v2166_v52 = vadd.f32 %v2165_v11, %v2151_v18 }
 0x1a4   :  { %v2131_v7 = vadd.f32 %v2130_v0, %v2115_v56  ;;  %v2167_v44 = vadd.f32 %v2166_v52, %v2152_v41 }
 0x1a6   :  { %v2132_v16 = vadd.f32 %v2131_v7, %v2116_v28  ;;  %v2168_v5 = vadd.f32 %v2167_v44, %v2153_v23 }
 0x1a8   :  { %v2133_v20 = vrot.slane %v2132_v16, 4  ;;  %v2169_v29 = vadd.f32 %v2168_v5, %v2154_v3 }
 0x1aa   :  { %v2134_v35 = vadd.f32 %v2133_v20, %v2132_v16  ;;  %v2170_v63 = vrot.slane %v2169_v29, 4 }
 0x1ac   :  { %v2135_v46 = vrot.slane %v2134_v35, 2  ;;  %v2171_v4 = vadd.f32 %v2170_v63, %v2169_v29 }
 0x1ae   :  { %v2136_v10 = vadd.f32 %v2135_v46, %v2134_v35  ;;  %v2172_v17 = vrot.slane %v2171_v4, 2 }
 0x1b0   :  { %v2137_v47 = vrot.slane %v2136_v10, 1  ;;  %v2173_v2 = vadd.f32 %v2172_v17, %v2171_v4 }
 0x1b2   :  { %v2174_v38 = vrot.slane %v2173_v2, 1  ;;  %v2138_v42 = vadd.f32 %v2137_v47, %v2136_v10 }
 0x1b4   :  { %v2175_v8 = vadd.f32 %v2174_v38, %v2173_v2 }
 0x1b6   :  { %v2177_v51 = vsel %vm2176_vm0, %v2138_v42, %v2175_v8 }
 0x1b7   :  { %v2178_v57 = vadd.f32 %v2177_v51, %v2117_v1 }
 0x1b9   :  { %2179 = vst [vmem:[%s3927_s7] sm:$0x3] %v2178_v57 }

</bundles_post_ra>
